<compile_context>
chip_gen: v7x
topology: tpu7x:2x2x1
jax: 0.10.0
libtpu: 0.0.40
codegen_flags: <defaults>
</compile_context>

<pallas_src>
import functools

import jax
import jax.numpy as jnp
from jax.experimental import pallas as pl
from jax.experimental.pallas import tpu as pltpu


def window_attention_kernel(x_ref, wqkv_ref, bqkv_ref, wproj_ref, bproj_ref,
                            rpb_ref, o_ref, *, num_heads, head_dim, scale):
    # x_ref block: (TB, N, C) bf16; weights full-resident in VMEM (constant index_map).
    TB, N, C = x_ref.shape
    H, D = num_heads, head_dim
    M = TB * N

    # Flatten windows into one slab; only leading/sublane dims change (lane dim C kept).
    x2 = x_ref[...].reshape(M, C)                                           # (M, C) bf16

    # Fused QKV projection for all TB windows at once (MXU, f32 accumulation).
    qkv = jnp.dot(x2, wqkv_ref[...], preferred_element_type=jnp.float32)    # (M, 3C) f32
    qkv = qkv + bqkv_ref[...]

    # Per-head attention, batched over the TB windows; head-concat folded into the
    # output projection via accumulation (no jnp.concatenate).
    acc = jnp.zeros((M, C), jnp.float32)
    for h in range(H):
        qs = h * D
        q = (qkv[:, qs:qs + D] * scale).astype(jnp.bfloat16).reshape(TB, N, D)
        k = qkv[:, C + qs:C + qs + D].astype(jnp.bfloat16).reshape(TB, N, D)
        v = qkv[:, 2 * C + qs:2 * C + qs + D].astype(jnp.bfloat16).reshape(TB, N, D)

        # (TB, N, N) attention logits for this head across all TB windows.
        attn = jnp.einsum('bnd,bmd->bnm', q, k,
                          preferred_element_type=jnp.float32)
        attn = attn + rpb_ref[h][None]                                      # rel-pos bias

        # softmax over keys (f32 math; mask=None, dropout p=0 -> identity).
        attn = attn - jnp.max(attn, axis=-1, keepdims=True)
        p = jnp.exp(attn)
        p = p * pl.reciprocal(jnp.sum(p, axis=-1, keepdims=True), approx=True)

        ho = jnp.einsum('bnm,bmd->bnd', p.astype(jnp.bfloat16), v,
                        preferred_element_type=jnp.float32)                 # (TB, N, D)

        # Fold the head concat into the projection: out += ho_h @ Wproj[h].
        acc = acc + jnp.dot(ho.reshape(M, D).astype(jnp.bfloat16), wproj_ref[h],
                            preferred_element_type=jnp.float32)

    out = acc + bproj_ref[...]                                              # (M, C)
    o_ref[...] = out.reshape(TB, N, C).astype(o_ref.dtype)


def _pick_tb(B_, tb_target):
    tb = min(tb_target, B_)
    while B_ % tb:
        tb -= 1
    return tb


def window_attention(x, wqkv, bqkv, wproj, bproj, rpb, *, num_heads, tb_target=16):
    """x: (B_, N, C) f32; wqkv: (C, 3C); bqkv: (1, 3C); wproj: (C, C); bproj: (1, C);
    rpb: (H, N, N). Weights in (in, out) layout so the kernel computes x @ W + b."""
    B_, N, C = x.shape
    head_dim = C // num_heads
    scale = head_dim ** -0.5

    # TODO(synk): for 7x7 windows (N=49), pad N to a multiple of 8 with -inf bias cols
    # before calling the kernel; here N is assumed sublane-aligned (multiple of 8).
    TB = _pick_tb(B_, tb_target)

    # bf16 MXU operands (halves activation/weight DMA); f32 accumulation in-kernel.
    x_bf = x.astype(jnp.bfloat16)
    wqkv_bf = wqkv.astype(jnp.bfloat16)
    wproj_r = wproj.reshape(num_heads, head_dim, C).astype(jnp.bfloat16)    # (H, D, C)
    bqkv_f = bqkv.astype(jnp.float32)
    bproj_f = bproj.astype(jnp.float32)
    rpb_f = rpb.astype(jnp.float32)

    kernel = functools.partial(
        window_attention_kernel,
        num_heads=num_heads, head_dim=head_dim, scale=scale)

    return pl.pallas_call(
        kernel,
        out_shape=jax.ShapeDtypeStruct((B_, N, C), x.dtype),
        grid_spec=pltpu.PrefetchScalarGridSpec(
            num_scalar_prefetch=0,
            grid=(B_ // TB,),                                  # TB windows per grid step
            in_specs=[
                pl.BlockSpec((TB, N, C), lambda b: (b, 0, 0)),            # x tile
                pl.BlockSpec((C, 3 * C), lambda b: (0, 0)),               # Wqkv (full, bf16)
                pl.BlockSpec((1, 3 * C), lambda b: (0, 0)),               # bqkv
                pl.BlockSpec((num_heads, head_dim, C), lambda b: (0, 0, 0)),  # Wproj (H, D, C)
                pl.BlockSpec((1, C), lambda b: (0, 0)),                   # bproj
                pl.BlockSpec((num_heads, N, N), lambda b: (0, 0, 0)),     # rel-pos bias
            ],
            out_specs=pl.BlockSpec((TB, N, C), lambda b: (b, 0, 0)),
        ),
        compiler_params=pltpu.CompilerParams(
            dimension_semantics=("parallel",),
            vmem_limit_bytes=48 * 1024 * 1024),
    )(x_bf, wqkv_bf, bqkv_f, wproj_r, bproj_f, rpb_f)


def make_relative_position_index(Wh, Ww):
    # Same construction as Swin's WindowAttention.__init__
    coords = jnp.stack(jnp.meshgrid(jnp.arange(Wh), jnp.arange(Ww), indexing="ij"))  # (2,Wh,Ww)
    coords_flat = coords.reshape(2, -1)                                              # (2, N)
    rel = coords_flat[:, :, None] - coords_flat[:, None, :]                          # (2, N, N)
    rel = rel.transpose(1, 2, 0)                                                     # (N, N, 2)
    rel = rel.at[:, :, 0].add(Wh - 1)
    rel = rel.at[:, :, 1].add(Ww - 1)
    rel = rel.at[:, :, 0].multiply(2 * Ww - 1)
    return rel.sum(-1)                                                               # (N, N)


if __name__ == "__main__":
    # Small shapes consistent with the module: (num_windows*B, window_size^2, dim).
    B_, window_size, dim, num_heads = 16, 4, 32, 4
    N = window_size * window_size
    head_dim = dim // num_heads

    key = jax.random.PRNGKey(0)
    k1, k2, k3, k4, k5, k6 = jax.random.split(key, 6)

    x = jax.random.normal(k1, (B_, N, dim), jnp.float32)

    # Deterministic synthetic parameters (trunc_normal-ish scale 0.02), (in, out) layout.
    wqkv = jax.random.normal(k2, (dim, 3 * dim), jnp.float32) * 0.02
    bqkv = jax.random.normal(k3, (1, 3 * dim), jnp.float32) * 0.02
    wproj = jax.random.normal(k4, (dim, dim), jnp.float32) * 0.02
    bproj = jax.random.normal(k5, (1, dim), jnp.float32) * 0.02
    rpb_table = jax.random.normal(
        k6, ((2 * window_size - 1) * (2 * window_size - 1), num_heads), jnp.float32) * 0.02

    # Gather the relative-position-bias table into (num_heads, N, N).
    rel_idx = make_relative_position_index(window_size, window_size)                  # (N, N)
    rpb = rpb_table[rel_idx.reshape(-1)].reshape(N, N, num_heads).transpose(2, 0, 1)  # (H, N, N)

    out = window_attention(x, wqkv, bqkv, wproj, bproj, rpb, num_heads=num_heads, tb_target=8)
    out = jax.block_until_ready(out)

    # Pure-JAX f32 reference for correctness (kernel uses bf16 MXU operands -> loosened tol).
    scale = head_dim ** -0.5
    qkv = (x @ wqkv + bqkv[0]).reshape(B_, N, 3, num_heads, head_dim).transpose(2, 0, 3, 1, 4)
    q, k, v = qkv[0] * scale, qkv[1], qkv[2]
    attn = jnp.einsum("bhnd,bhmd->bhnm", q, k) + rpb[None]
    attn = jax.nn.softmax(attn, axis=-1)
    ref = jnp.einsum("bhnm,bhmd->bhnd", attn, v).transpose(0, 2, 1, 3).reshape(B_, N, dim)
    ref = ref @ wproj + bproj[0]

    assert out.shape == ref.shape and out.dtype == ref.dtype
    assert jnp.allclose(out, ref, atol=2e-2, rtol=2e-2), float(jnp.max(jnp.abs(out - ref)))
    print("KERNEL_OK")
</pallas_src>

<mosaic_0001>
module attributes {stable_mosaic.version = 11 : i64} {
  func.func @window_attention_kernel(%arg0: i32, %arg1: memref<8x16x32xbf16, #tpu.memory_space<vmem>>, %arg2: memref<32x96xbf16, #tpu.memory_space<vmem>>, %arg3: memref<1x96xf32, #tpu.memory_space<vmem>>, %arg4: memref<4x8x32xbf16, #tpu.memory_space<vmem>>, %arg5: memref<1x32xf32, #tpu.memory_space<vmem>>, %arg6: memref<4x16x16xf32, #tpu.memory_space<vmem>>, %arg7: memref<8x16x32xf32, #tpu.memory_space<vmem>>) attributes {dimension_semantics = [#tpu.dimension_semantics<parallel>], iteration_bounds = array<i64: 2>, scalar_prefetch = 0 : i64, scratch_operands = 0 : i64, tpu.core_type = #tpu.core_type<tc>, window_params = [{transform_indices = @transform_0, window_bounds = array<i64: 8, 16, 32>}, {pipeline_mode = #tpu.pipeline_mode<synchronous>, transform_indices = @transform_1, window_bounds = array<i64: 32, 96>}, {pipeline_mode = #tpu.pipeline_mode<synchronous>, transform_indices = @transform_2, window_bounds = array<i64: 1, 96>}, {pipeline_mode = #tpu.pipeline_mode<synchronous>, transform_indices = @transform_3, window_bounds = array<i64: 4, 8, 32>}, {pipeline_mode = #tpu.pipeline_mode<synchronous>, transform_indices = @transform_4, window_bounds = array<i64: 1, 32>}, {pipeline_mode = #tpu.pipeline_mode<synchronous>, transform_indices = @transform_5, window_bounds = array<i64: 4, 16, 16>}, {transform_indices = @transform_6, window_bounds = array<i64: 8, 16, 32>}]} {
    %c0 = arith.constant 0 : index
    %c0_0 = arith.constant 0 : index
    %c0_1 = arith.constant 0 : index
    %0 = vector.load %arg1[%c0, %c0_0, %c0_1] : memref<8x16x32xbf16, #tpu.memory_space<vmem>>, vector<8x16x32xbf16>
    %1 = vector.shape_cast %0 : vector<8x16x32xbf16> to vector<128x32xbf16>
    %c0_2 = arith.constant 0 : index
    %c0_3 = arith.constant 0 : index
    %2 = vector.load %arg2[%c0_2, %c0_3] : memref<32x96xbf16, #tpu.memory_space<vmem>>, vector<32x96xbf16>
    %cst = arith.constant dense<0.000000e+00> : vector<128x96xf32>
    %3 = tpu.matmul %1, %2, %cst {dimension_numbers = #tpu.dot_dimension_numbers<[1], [0], [0], [1], [0, 0, 1, 1], [], []>} : vector<128x32xbf16>, vector<32x96xbf16>, vector<128x96xf32> -> vector<128x96xf32>
    %c0_4 = arith.constant 0 : index
    %c0_5 = arith.constant 0 : index
    %4 = vector.load %arg3[%c0_4, %c0_5] : memref<1x96xf32, #tpu.memory_space<vmem>>, vector<1x96xf32>
    %5 = vector.broadcast %4 : vector<1x96xf32> to vector<128x96xf32>
    %6 = arith.addf %3, %5 : vector<128x96xf32>
    %cst_6 = arith.constant 0.000000e+00 : f32
    %7 = vector.broadcast %cst_6 : f32 to vector<128x32xf32>
    %8 = vector.extract_strided_slice %6 {offsets = [0, 0], sizes = [128, 8], strides = [1, 1]} : vector<128x96xf32> to vector<128x8xf32>
    %cst_7 = arith.constant 0.353553385 : f32
    %9 = vector.broadcast %cst_7 : f32 to vector<128x8xf32>
    %10 = arith.mulf %8, %9 : vector<128x8xf32>
    %11 = arith.truncf %10 : vector<128x8xf32> to vector<128x8xbf16>
    %12 = vector.shape_cast %11 : vector<128x8xbf16> to vector<8x16x8xbf16>
    %13 = vector.extract_strided_slice %6 {offsets = [0, 32], sizes = [128, 8], strides = [1, 1]} : vector<128x96xf32> to vector<128x8xf32>
    %14 = arith.truncf %13 : vector<128x8xf32> to vector<128x8xbf16>
    %15 = vector.shape_cast %14 : vector<128x8xbf16> to vector<8x16x8xbf16>
    %16 = vector.extract_strided_slice %6 {offsets = [0, 64], sizes = [128, 8], strides = [1, 1]} : vector<128x96xf32> to vector<128x8xf32>
    %17 = arith.truncf %16 : vector<128x8xf32> to vector<128x8xbf16>
    %18 = vector.shape_cast %17 : vector<128x8xbf16> to vector<8x16x8xbf16>
    "tpu.trace_start"() <{level = 10 : i32, message = "bnd,bmd->bnm"}> : () -> ()
    %cst_8 = arith.constant dense<0.000000e+00> : vector<8x16x16xf32>
    %19 = tpu.matmul %12, %15, %cst_8 {dimension_numbers = #tpu.dot_dimension_numbers<[2], [2], [1], [1], [0, 0, 0, 1, 1, 1], [0], [0]>} : vector<8x16x8xbf16>, vector<8x16x8xbf16>, vector<8x16x16xf32> -> vector<8x16x16xf32>
    "tpu.trace_stop"() : () -> ()
    %c0_9 = arith.constant 0 : index
    %c0_10 = arith.constant 0 : index
    %c0_11 = arith.constant 0 : index
    %20 = vector.load %arg6[%c0_9, %c0_10, %c0_11] : memref<4x16x16xf32, #tpu.memory_space<vmem>>, vector<1x16x16xf32>
    %21 = vector.shape_cast %20 : vector<1x16x16xf32> to vector<16x16xf32>
    %22 = vector.shape_cast %21 : vector<16x16xf32> to vector<1x16x16xf32>
    %23 = vector.broadcast %22 : vector<1x16x16xf32> to vector<8x16x16xf32>
    %24 = arith.addf %19, %23 : vector<8x16x16xf32>
    %cst_12 = arith.constant dense<0xFF800000> : vector<8x16xf32>
    %25 = vector.multi_reduction <maximumf>, %24, %cst_12 [2] : vector<8x16x16xf32> to vector<8x16xf32>
    %26 = vector.shape_cast %25 : vector<8x16xf32> to vector<8x16x1xf32>
    %27 = vector.broadcast %26 : vector<8x16x1xf32> to vector<8x16x16xf32>
    %28 = arith.subf %24, %27 : vector<8x16x16xf32>
    %29 = math.exp %28 : vector<8x16x16xf32>
    %cst_13 = arith.constant dense<0.000000e+00> : vector<8x16xf32>
    %30 = vector.multi_reduction <add>, %29, %cst_13 [2] : vector<8x16x16xf32> to vector<8x16xf32>
    %31 = vector.shape_cast %30 : vector<8x16xf32> to vector<8x16x1xf32>
    %32 = tpu.reciprocal %31 {approx = true} : vector<8x16x1xf32> -> vector<8x16x1xf32>
    %33 = vector.broadcast %32 : vector<8x16x1xf32> to vector<8x16x16xf32>
    %34 = arith.mulf %29, %33 : vector<8x16x16xf32>
    %35 = arith.truncf %34 : vector<8x16x16xf32> to vector<8x16x16xbf16>
    "tpu.trace_start"() <{level = 10 : i32, message = "bnm,bmd->bnd"}> : () -> ()
    %cst_14 = arith.constant dense<0.000000e+00> : vector<8x16x8xf32>
    %36 = tpu.matmul %35, %18, %cst_14 {dimension_numbers = #tpu.dot_dimension_numbers<[2], [1], [1], [2], [0, 0, 0, 1, 1, 2], [0], [0]>} : vector<8x16x16xbf16>, vector<8x16x8xbf16>, vector<8x16x8xf32> -> vector<8x16x8xf32>
    "tpu.trace_stop"() : () -> ()
    %37 = vector.shape_cast %36 : vector<8x16x8xf32> to vector<128x8xf32>
    %38 = arith.truncf %37 : vector<128x8xf32> to vector<128x8xbf16>
    %c0_15 = arith.constant 0 : index
    %c0_16 = arith.constant 0 : index
    %c0_17 = arith.constant 0 : index
    %39 = vector.load %arg4[%c0_15, %c0_16, %c0_17] : memref<4x8x32xbf16, #tpu.memory_space<vmem>>, vector<1x8x32xbf16>
    %40 = vector.shape_cast %39 : vector<1x8x32xbf16> to vector<8x32xbf16>
    %cst_18 = arith.constant dense<0.000000e+00> : vector<128x32xf32>
    %41 = tpu.matmul %38, %40, %cst_18 {dimension_numbers = #tpu.dot_dimension_numbers<[1], [0], [0], [1], [0, 0, 1, 1], [], []>} : vector<128x8xbf16>, vector<8x32xbf16>, vector<128x32xf32> -> vector<128x32xf32>
    %42 = arith.addf %7, %41 : vector<128x32xf32>
    %43 = vector.extract_strided_slice %6 {offsets = [0, 8], sizes = [128, 8], strides = [1, 1]} : vector<128x96xf32> to vector<128x8xf32>
    %cst_19 = arith.constant 0.353553385 : f32
    %44 = vector.broadcast %cst_19 : f32 to vector<128x8xf32>
    %45 = arith.mulf %43, %44 : vector<128x8xf32>
    %46 = arith.truncf %45 : vector<128x8xf32> to vector<128x8xbf16>
    %47 = vector.shape_cast %46 : vector<128x8xbf16> to vector<8x16x8xbf16>
    %48 = vector.extract_strided_slice %6 {offsets = [0, 40], sizes = [128, 8], strides = [1, 1]} : vector<128x96xf32> to vector<128x8xf32>
    %49 = arith.truncf %48 : vector<128x8xf32> to vector<128x8xbf16>
    %50 = vector.shape_cast %49 : vector<128x8xbf16> to vector<8x16x8xbf16>
    %51 = vector.extract_strided_slice %6 {offsets = [0, 72], sizes = [128, 8], strides = [1, 1]} : vector<128x96xf32> to vector<128x8xf32>
    %52 = arith.truncf %51 : vector<128x8xf32> to vector<128x8xbf16>
    %53 = vector.shape_cast %52 : vector<128x8xbf16> to vector<8x16x8xbf16>
    "tpu.trace_start"() <{level = 10 : i32, message = "bnd,bmd->bnm"}> : () -> ()
    %cst_20 = arith.constant dense<0.000000e+00> : vector<8x16x16xf32>
    %54 = tpu.matmul %47, %50, %cst_20 {dimension_numbers = #tpu.dot_dimension_numbers<[2], [2], [1], [1], [0, 0, 0, 1, 1, 1], [0], [0]>} : vector<8x16x8xbf16>, vector<8x16x8xbf16>, vector<8x16x16xf32> -> vector<8x16x16xf32>
    "tpu.trace_stop"() : () -> ()
    %c1 = arith.constant 1 : index
    %c0_21 = arith.constant 0 : index
    %c0_22 = arith.constant 0 : index
    %55 = vector.load %arg6[%c1, %c0_21, %c0_22] : memref<4x16x16xf32, #tpu.memory_space<vmem>>, vector<1x16x16xf32>
    %56 = vector.shape_cast %55 : vector<1x16x16xf32> to vector<16x16xf32>
    %57 = vector.shape_cast %56 : vector<16x16xf32> to vector<1x16x16xf32>
    %58 = vector.broadcast %57 : vector<1x16x16xf32> to vector<8x16x16xf32>
    %59 = arith.addf %54, %58 : vector<8x16x16xf32>
    %cst_23 = arith.constant dense<0xFF800000> : vector<8x16xf32>
    %60 = vector.multi_reduction <maximumf>, %59, %cst_23 [2] : vector<8x16x16xf32> to vector<8x16xf32>
    %61 = vector.shape_cast %60 : vector<8x16xf32> to vector<8x16x1xf32>
    %62 = vector.broadcast %61 : vector<8x16x1xf32> to vector<8x16x16xf32>
    %63 = arith.subf %59, %62 : vector<8x16x16xf32>
    %64 = math.exp %63 : vector<8x16x16xf32>
    %cst_24 = arith.constant dense<0.000000e+00> : vector<8x16xf32>
    %65 = vector.multi_reduction <add>, %64, %cst_24 [2] : vector<8x16x16xf32> to vector<8x16xf32>
    %66 = vector.shape_cast %65 : vector<8x16xf32> to vector<8x16x1xf32>
    %67 = tpu.reciprocal %66 {approx = true} : vector<8x16x1xf32> -> vector<8x16x1xf32>
    %68 = vector.broadcast %67 : vector<8x16x1xf32> to vector<8x16x16xf32>
    %69 = arith.mulf %64, %68 : vector<8x16x16xf32>
    %70 = arith.truncf %69 : vector<8x16x16xf32> to vector<8x16x16xbf16>
    "tpu.trace_start"() <{level = 10 : i32, message = "bnm,bmd->bnd"}> : () -> ()
    %cst_25 = arith.constant dense<0.000000e+00> : vector<8x16x8xf32>
    %71 = tpu.matmul %70, %53, %cst_25 {dimension_numbers = #tpu.dot_dimension_numbers<[2], [1], [1], [2], [0, 0, 0, 1, 1, 2], [0], [0]>} : vector<8x16x16xbf16>, vector<8x16x8xbf16>, vector<8x16x8xf32> -> vector<8x16x8xf32>
    "tpu.trace_stop"() : () -> ()
    %72 = vector.shape_cast %71 : vector<8x16x8xf32> to vector<128x8xf32>
    %73 = arith.truncf %72 : vector<128x8xf32> to vector<128x8xbf16>
    %c1_26 = arith.constant 1 : index
    %c0_27 = arith.constant 0 : index
    %c0_28 = arith.constant 0 : index
    %74 = vector.load %arg4[%c1_26, %c0_27, %c0_28] : memref<4x8x32xbf16, #tpu.memory_space<vmem>>, vector<1x8x32xbf16>
    %75 = vector.shape_cast %74 : vector<1x8x32xbf16> to vector<8x32xbf16>
    %cst_29 = arith.constant dense<0.000000e+00> : vector<128x32xf32>
    %76 = tpu.matmul %73, %75, %cst_29 {dimension_numbers = #tpu.dot_dimension_numbers<[1], [0], [0], [1], [0, 0, 1, 1], [], []>} : vector<128x8xbf16>, vector<8x32xbf16>, vector<128x32xf32> -> vector<128x32xf32>
    %77 = arith.addf %42, %76 : vector<128x32xf32>
    %78 = vector.extract_strided_slice %6 {offsets = [0, 16], sizes = [128, 8], strides = [1, 1]} : vector<128x96xf32> to vector<128x8xf32>
    %cst_30 = arith.constant 0.353553385 : f32
    %79 = vector.broadcast %cst_30 : f32 to vector<128x8xf32>
    %80 = arith.mulf %78, %79 : vector<128x8xf32>
    %81 = arith.truncf %80 : vector<128x8xf32> to vector<128x8xbf16>
    %82 = vector.shape_cast %81 : vector<128x8xbf16> to vector<8x16x8xbf16>
    %83 = vector.extract_strided_slice %6 {offsets = [0, 48], sizes = [128, 8], strides = [1, 1]} : vector<128x96xf32> to vector<128x8xf32>
    %84 = arith.truncf %83 : vector<128x8xf32> to vector<128x8xbf16>
    %85 = vector.shape_cast %84 : vector<128x8xbf16> to vector<8x16x8xbf16>
    %86 = vector.extract_strided_slice %6 {offsets = [0, 80], sizes = [128, 8], strides = [1, 1]} : vector<128x96xf32> to vector<128x8xf32>
    %87 = arith.truncf %86 : vector<128x8xf32> to vector<128x8xbf16>
    %88 = vector.shape_cast %87 : vector<128x8xbf16> to vector<8x16x8xbf16>
    "tpu.trace_start"() <{level = 10 : i32, message = "bnd,bmd->bnm"}> : () -> ()
    %cst_31 = arith.constant dense<0.000000e+00> : vector<8x16x16xf32>
    %89 = tpu.matmul %82, %85, %cst_31 {dimension_numbers = #tpu.dot_dimension_numbers<[2], [2], [1], [1], [0, 0, 0, 1, 1, 1], [0], [0]>} : vector<8x16x8xbf16>, vector<8x16x8xbf16>, vector<8x16x16xf32> -> vector<8x16x16xf32>
    "tpu.trace_stop"() : () -> ()
    %c2 = arith.constant 2 : index
    %c0_32 = arith.constant 0 : index
    %c0_33 = arith.constant 0 : index
    %90 = vector.load %arg6[%c2, %c0_32, %c0_33] : memref<4x16x16xf32, #tpu.memory_space<vmem>>, vector<1x16x16xf32>
    %91 = vector.shape_cast %90 : vector<1x16x16xf32> to vector<16x16xf32>
    %92 = vector.shape_cast %91 : vector<16x16xf32> to vector<1x16x16xf32>
    %93 = vector.broadcast %92 : vector<1x16x16xf32> to vector<8x16x16xf32>
    %94 = arith.addf %89, %93 : vector<8x16x16xf32>
    %cst_34 = arith.constant dense<0xFF800000> : vector<8x16xf32>
    %95 = vector.multi_reduction <maximumf>, %94, %cst_34 [2] : vector<8x16x16xf32> to vector<8x16xf32>
    %96 = vector.shape_cast %95 : vector<8x16xf32> to vector<8x16x1xf32>
    %97 = vector.broadcast %96 : vector<8x16x1xf32> to vector<8x16x16xf32>
    %98 = arith.subf %94, %97 : vector<8x16x16xf32>
    %99 = math.exp %98 : vector<8x16x16xf32>
    %cst_35 = arith.constant dense<0.000000e+00> : vector<8x16xf32>
    %100 = vector.multi_reduction <add>, %99, %cst_35 [2] : vector<8x16x16xf32> to vector<8x16xf32>
    %101 = vector.shape_cast %100 : vector<8x16xf32> to vector<8x16x1xf32>
    %102 = tpu.reciprocal %101 {approx = true} : vector<8x16x1xf32> -> vector<8x16x1xf32>
    %103 = vector.broadcast %102 : vector<8x16x1xf32> to vector<8x16x16xf32>
    %104 = arith.mulf %99, %103 : vector<8x16x16xf32>
    %105 = arith.truncf %104 : vector<8x16x16xf32> to vector<8x16x16xbf16>
    "tpu.trace_start"() <{level = 10 : i32, message = "bnm,bmd->bnd"}> : () -> ()
    %cst_36 = arith.constant dense<0.000000e+00> : vector<8x16x8xf32>
    %106 = tpu.matmul %105, %88, %cst_36 {dimension_numbers = #tpu.dot_dimension_numbers<[2], [1], [1], [2], [0, 0, 0, 1, 1, 2], [0], [0]>} : vector<8x16x16xbf16>, vector<8x16x8xbf16>, vector<8x16x8xf32> -> vector<8x16x8xf32>
    "tpu.trace_stop"() : () -> ()
    %107 = vector.shape_cast %106 : vector<8x16x8xf32> to vector<128x8xf32>
    %108 = arith.truncf %107 : vector<128x8xf32> to vector<128x8xbf16>
    %c2_37 = arith.constant 2 : index
    %c0_38 = arith.constant 0 : index
    %c0_39 = arith.constant 0 : index
    %109 = vector.load %arg4[%c2_37, %c0_38, %c0_39] : memref<4x8x32xbf16, #tpu.memory_space<vmem>>, vector<1x8x32xbf16>
    %110 = vector.shape_cast %109 : vector<1x8x32xbf16> to vector<8x32xbf16>
    %cst_40 = arith.constant dense<0.000000e+00> : vector<128x32xf32>
    %111 = tpu.matmul %108, %110, %cst_40 {dimension_numbers = #tpu.dot_dimension_numbers<[1], [0], [0], [1], [0, 0, 1, 1], [], []>} : vector<128x8xbf16>, vector<8x32xbf16>, vector<128x32xf32> -> vector<128x32xf32>
    %112 = arith.addf %77, %111 : vector<128x32xf32>
    %113 = vector.extract_strided_slice %6 {offsets = [0, 24], sizes = [128, 8], strides = [1, 1]} : vector<128x96xf32> to vector<128x8xf32>
    %cst_41 = arith.constant 0.353553385 : f32
    %114 = vector.broadcast %cst_41 : f32 to vector<128x8xf32>
    %115 = arith.mulf %113, %114 : vector<128x8xf32>
    %116 = arith.truncf %115 : vector<128x8xf32> to vector<128x8xbf16>
    %117 = vector.shape_cast %116 : vector<128x8xbf16> to vector<8x16x8xbf16>
    %118 = vector.extract_strided_slice %6 {offsets = [0, 56], sizes = [128, 8], strides = [1, 1]} : vector<128x96xf32> to vector<128x8xf32>
    %119 = arith.truncf %118 : vector<128x8xf32> to vector<128x8xbf16>
    %120 = vector.shape_cast %119 : vector<128x8xbf16> to vector<8x16x8xbf16>
    %121 = vector.extract_strided_slice %6 {offsets = [0, 88], sizes = [128, 8], strides = [1, 1]} : vector<128x96xf32> to vector<128x8xf32>
    %122 = arith.truncf %121 : vector<128x8xf32> to vector<128x8xbf16>
    %123 = vector.shape_cast %122 : vector<128x8xbf16> to vector<8x16x8xbf16>
    "tpu.trace_start"() <{level = 10 : i32, message = "bnd,bmd->bnm"}> : () -> ()
    %cst_42 = arith.constant dense<0.000000e+00> : vector<8x16x16xf32>
    %124 = tpu.matmul %117, %120, %cst_42 {dimension_numbers = #tpu.dot_dimension_numbers<[2], [2], [1], [1], [0, 0, 0, 1, 1, 1], [0], [0]>} : vector<8x16x8xbf16>, vector<8x16x8xbf16>, vector<8x16x16xf32> -> vector<8x16x16xf32>
    "tpu.trace_stop"() : () -> ()
    %c3 = arith.constant 3 : index
    %c0_43 = arith.constant 0 : index
    %c0_44 = arith.constant 0 : index
    %125 = vector.load %arg6[%c3, %c0_43, %c0_44] : memref<4x16x16xf32, #tpu.memory_space<vmem>>, vector<1x16x16xf32>
    %126 = vector.shape_cast %125 : vector<1x16x16xf32> to vector<16x16xf32>
    %127 = vector.shape_cast %126 : vector<16x16xf32> to vector<1x16x16xf32>
    %128 = vector.broadcast %127 : vector<1x16x16xf32> to vector<8x16x16xf32>
    %129 = arith.addf %124, %128 : vector<8x16x16xf32>
    %cst_45 = arith.constant dense<0xFF800000> : vector<8x16xf32>
    %130 = vector.multi_reduction <maximumf>, %129, %cst_45 [2] : vector<8x16x16xf32> to vector<8x16xf32>
    %131 = vector.shape_cast %130 : vector<8x16xf32> to vector<8x16x1xf32>
    %132 = vector.broadcast %131 : vector<8x16x1xf32> to vector<8x16x16xf32>
    %133 = arith.subf %129, %132 : vector<8x16x16xf32>
    %134 = math.exp %133 : vector<8x16x16xf32>
    %cst_46 = arith.constant dense<0.000000e+00> : vector<8x16xf32>
    %135 = vector.multi_reduction <add>, %134, %cst_46 [2] : vector<8x16x16xf32> to vector<8x16xf32>
    %136 = vector.shape_cast %135 : vector<8x16xf32> to vector<8x16x1xf32>
    %137 = tpu.reciprocal %136 {approx = true} : vector<8x16x1xf32> -> vector<8x16x1xf32>
    %138 = vector.broadcast %137 : vector<8x16x1xf32> to vector<8x16x16xf32>
    %139 = arith.mulf %134, %138 : vector<8x16x16xf32>
    %140 = arith.truncf %139 : vector<8x16x16xf32> to vector<8x16x16xbf16>
    "tpu.trace_start"() <{level = 10 : i32, message = "bnm,bmd->bnd"}> : () -> ()
    %cst_47 = arith.constant dense<0.000000e+00> : vector<8x16x8xf32>
    %141 = tpu.matmul %140, %123, %cst_47 {dimension_numbers = #tpu.dot_dimension_numbers<[2], [1], [1], [2], [0, 0, 0, 1, 1, 2], [0], [0]>} : vector<8x16x16xbf16>, vector<8x16x8xbf16>, vector<8x16x8xf32> -> vector<8x16x8xf32>
    "tpu.trace_stop"() : () -> ()
    %142 = vector.shape_cast %141 : vector<8x16x8xf32> to vector<128x8xf32>
    %143 = arith.truncf %142 : vector<128x8xf32> to vector<128x8xbf16>
    %c3_48 = arith.constant 3 : index
    %c0_49 = arith.constant 0 : index
    %c0_50 = arith.constant 0 : index
    %144 = vector.load %arg4[%c3_48, %c0_49, %c0_50] : memref<4x8x32xbf16, #tpu.memory_space<vmem>>, vector<1x8x32xbf16>
    %145 = vector.shape_cast %144 : vector<1x8x32xbf16> to vector<8x32xbf16>
    %cst_51 = arith.constant dense<0.000000e+00> : vector<128x32xf32>
    %146 = tpu.matmul %143, %145, %cst_51 {dimension_numbers = #tpu.dot_dimension_numbers<[1], [0], [0], [1], [0, 0, 1, 1], [], []>} : vector<128x8xbf16>, vector<8x32xbf16>, vector<128x32xf32> -> vector<128x32xf32>
    %147 = arith.addf %112, %146 : vector<128x32xf32>
    %c0_52 = arith.constant 0 : index
    %c0_53 = arith.constant 0 : index
    %148 = vector.load %arg5[%c0_52, %c0_53] : memref<1x32xf32, #tpu.memory_space<vmem>>, vector<1x32xf32>
    %149 = vector.broadcast %148 : vector<1x32xf32> to vector<128x32xf32>
    %150 = arith.addf %147, %149 : vector<128x32xf32>
    %151 = vector.shape_cast %150 : vector<128x32xf32> to vector<8x16x32xf32>
    %c0_54 = arith.constant 0 : index
    %c0_55 = arith.constant 0 : index
    %c0_56 = arith.constant 0 : index
    %152 = vector.load %arg7[%c0_54, %c0_55, %c0_56] : memref<8x16x32xf32, #tpu.memory_space<vmem>>, vector<8x16x32xf32>
    tpu.vector_store %arg7[%c0_54, %c0_55, %c0_56], %151 {strides = array<i32>} : memref<8x16x32xf32, #tpu.memory_space<vmem>>, vector<8x16x32xf32>,
    return
  }
  func.func @transform_0(%arg0: i32) -> (i32, i32, i32) {
    %c0_i32 = arith.constant 0 : i32
    %c0_i32_0 = arith.constant 0 : i32
    %c0_i32_1 = arith.constant 0 : i32
    return %arg0, %c0_i32, %c0_i32_0 : i32, i32, i32
  }
  func.func @transform_1(%arg0: i32) -> (i32, i32) {
    %c0_i32 = arith.constant 0 : i32
    %c0_i32_0 = arith.constant 0 : i32
    %c0_i32_1 = arith.constant 0 : i32
    return %c0_i32, %c0_i32_0 : i32, i32
  }
  func.func @transform_2(%arg0: i32) -> (i32, i32) {
    %c0_i32 = arith.constant 0 : i32
    %c0_i32_0 = arith.constant 0 : i32
    %c0_i32_1 = arith.constant 0 : i32
    return %c0_i32, %c0_i32_0 : i32, i32
  }
  func.func @transform_3(%arg0: i32) -> (i32, i32, i32) {
    %c0_i32 = arith.constant 0 : i32
    %c0_i32_0 = arith.constant 0 : i32
    %c0_i32_1 = arith.constant 0 : i32
    %c0_i32_2 = arith.constant 0 : i32
    return %c0_i32, %c0_i32_0, %c0_i32_1 : i32, i32, i32
  }
  func.func @transform_4(%arg0: i32) -> (i32, i32) {
    %c0_i32 = arith.constant 0 : i32
    %c0_i32_0 = arith.constant 0 : i32
    %c0_i32_1 = arith.constant 0 : i32
    return %c0_i32, %c0_i32_0 : i32, i32
  }
  func.func @transform_5(%arg0: i32) -> (i32, i32, i32) {
    %c0_i32 = arith.constant 0 : i32
    %c0_i32_0 = arith.constant 0 : i32
    %c0_i32_1 = arith.constant 0 : i32
    %c0_i32_2 = arith.constant 0 : i32
    return %c0_i32, %c0_i32_0, %c0_i32_1 : i32, i32, i32
  }
  func.func @transform_6(%arg0: i32) -> (i32, i32, i32) {
    %c0_i32 = arith.constant 0 : i32
    %c0_i32_0 = arith.constant 0 : i32
    %c0_i32_1 = arith.constant 0 : i32
    return %arg0, %c0_i32, %c0_i32_0 : i32, i32, i32
  }
}

</mosaic_0001>

<bundles_post_ra>
// kernel: tpu_custom_call.1
= control target key start
LH: loop header
LB: loop body
LE: loop exit
PB: predicated region body
PF: predicated region fallthrough
CT: control target
= control target key end

     0   :  { %11 = vsyncpa [#allocation3], 0  ;;  %s8359_s0 = inlined_call_operand.hbm [shape: bf16[16,16,32], index: 0, kind: input, shape index: {}]   ;;  %s8360_s1 = inlined_call_operand.hbm [shape: bf16[32,96], index: 1, kind: input, shape index: {}]   ;;  %s8361_s2 = inlined_call_operand.vmem [shape: f32[1,96], index: 2, kind: input, shape index: {}]   ;;  %s8362_s3 = inlined_call_operand.hbm [shape: bf16[4,8,32], index: 3, kind: input, shape index: {}]   ;;  %s8363_s4 = inlined_call_operand.vmem [shape: f32[1,32], index: 4, kind: input, shape index: {}]   ;;  %s8364_s5 = inlined_call_operand.hbm [shape: f32[4,16,16], index: 5, kind: input, shape index: {}]   ;;  %s8365_s6 = inlined_call_operand.hbm [shape: f32[16,16,32], index: 6, kind: output, shape index: {}]  }
   0x1   :  { %13 = vsyncpa [#allocation3 + $0x1], 0 }
   0x2   :  { %14 = vsyncpa [#allocation6], 0 }
   0x3   :  { %15 = vsyncpa [#allocation9], 0 }
   0x4   :  { %16 = vsyncpa [#allocation4], 0 }
   0x5   :  { %18 = vsyncpa [#allocation4 + $0x1], 0  ;;  %s6619_s21 = smov 0   ;;  %s6621_s22 = smov 0  }
   0x6   :  { %s6623_s23 = smov 0   ;;  %s6625_s24 = smov 0  }
   0x7 LB: > { %s6640_s25 = sadd.s32 4294967295, %s6558_s24   ;;  %s5160_s26 = sadd.s32 4294967294, %s6558_s24   ;;  %s6558_s24 = sphi %s6625_s24, %s8447_s24   ;;  %s6554_s23 = sphi %s6623_s23, %s8446_s23   ;;  %s6550_s22 = sphi %s6621_s22, %s8445_s22   ;;  %s6546_s21 = sphi %s6619_s21, %s8444_s21  }
   0x8   : > { %p44_p0 = scmp.ne.s32.totalorder %s6550_s22, %s6546_s21  ;;  %p8366_p1 = scmp.eq.s32.totalorder %s6640_s25, 0 }
   0x9   : > { %p179_p3 = scmp.eq.s32.totalorder %s5160_s26, 1  ;;  %p5161_p5 = scmp.ge.s32.totalorder %s6558_s24, 1 }
   0xa   : > { %p6649_p4 = por %p8366_p1, %p44_p0  ;;  %p186_p7 = scmp.lt.s32.totalorder %s6558_s24, 3 }
   0xb   : > { %p6654_p6 = por %p179_p3, %p44_p0  ;;  %s6560_s30 = smov [#allocation5]  }
   0xc   : > { %s8387_s27 = scalar_select %p6649_p4, 1, 0 }
   0xd   : > { %s8388_s28 = scalar_select %p6654_p6, 1, 0 }
   0xe   : > { %p6659_p8 = pnand %p5161_p5, %p186_p7  ;;  %s198_s7 = sshll.u32 %s6560_s30, 4  ;;  %s6663_s7 = int_to_ptr.vmem [resolvable:$true] %s198_s7 }
   0xf   : > { %s6561_s9 = smov [#allocation7]   ;;  %s6562_s11 = smov [#allocation8]  }
  0x10   : > { %s8389_s29 = scalar_select %p6659_p8, 1, 0 }
  0x11   : > { %p6024_p9 = pneg %p6659_p8  ;;  %s214_s10 = sshll.u32 %s6561_s9, 4  ;;  %s6674_s10 = int_to_ptr.vmem [resolvable:$true] %s214_s10 }
  0x12   : > { %s6676_s12 = sshll.u32 %s6562_s11, 4  ;;  %s6370_s15 = scalar_lea.hbm %s8360_s1, 256  ;;  %s231_s12 = int_to_ptr.vmem [resolvable:$true] %s6676_s12 }
  0x13   : > { %p6670_p11 = pnand %p6024_p9, %p8366_p1  ;;  %p6371_p12 = scmp.ne.s32.totalorder %s8360_s1, %s6370_s15 }
  0x14   : > { %p6377_p5 = scmp.lt.u32.totalorder %s6370_s15, %s8360_s1 }
  0x15   : > { %p6686_p13 = pneg %p6670_p11 }
  0x17   : > { %p6373_p0 = pnand %p6686_p13, %p6371_p12 }
  0x19   : > { %p6374_p3 = pneg %p6373_p0 }
  0x1b   : > { %p6379_p7 = pnand %p6377_p5, %p6374_p3 }
  0x1d   : > { %6382 = shalt.err (!%p6379_p7)
}
  0x1e   : > { %s6383_s26 = scalar_lea.vmem %s6663_s7, 256  ;;  %p6391_p2 = scmp.lt.s32.totalorder %s6663_s7, %s6663_s7 }
  0x1f   : > { %p6384_p9 = scmp.ne.s32.totalorder %s6663_s7, %s6383_s26  ;;  %p6392_p6 = scmp.lt.s32.totalorder %s6383_s26, %s6383_s26 }
  0x21   : > { %p6386_p10 = pnand %p6384_p9, %p6686_p13  ;;  %p6393_p12 = por %p6392_p6, %p6391_p2 }
  0x23   : > { %p6387_p1 = pneg %p6386_p10 }
  0x25   : > { %p6394_p0 = pnand %p6393_p12, %p6387_p1 }
  0x27   : > { %6397 = shalt.err (!%p6394_p0)
}
  0x28   : > { %s6563_s30 = smov 64   ;;  %s6564_s9 = smov 4  }
  0x29   : > { %6027 = dma.hbm_to_vmem [thread:$0]  (!%p6670_p11), %s8360_s1, 256, %s6663_s7, [#allocation6], %s6563_s30, %s6563_s30, %s6564_s9  }
  0x2a   : > { %s6398_s16 = scalar_lea.hbm %s8362_s3, 256 }
  0x2b   : > { %p6399_p1 = scmp.ne.s32.totalorder %s8362_s3, %s6398_s16  ;;  %p6405_p10 = scmp.lt.u32.totalorder %s6398_s16, %s8362_s3 }
  0x2d   : > { %p6401_p2 = pnand %p6399_p1, %p6686_p13 }
  0x2f   : > { %p6402_p6 = pneg %p6401_p2 }
  0x31   : > { %p6407_p3 = pnand %p6405_p10, %p6402_p6 }
  0x33   : > { %6410 = shalt.err (!%p6407_p3)
}
  0x34   : > { %s6411_s7 = scalar_lea.vmem %s6674_s10, 256  ;;  %p6419_p12 = scmp.lt.s32.totalorder %s6674_s10, %s6674_s10 }
  0x35   : > { %p6412_p5 = scmp.ne.s32.totalorder %s6674_s10, %s6411_s7  ;;  %p6420_p0 = scmp.lt.s32.totalorder %s6411_s7, %s6411_s7 }
  0x37   : > { %p6414_p7 = pnand %p6412_p5, %p6686_p13  ;;  %p6421_p1 = por %p6420_p0, %p6419_p12 }
  0x39   : > { %p6415_p9 = pneg %p6414_p7 }
  0x3b   : > { %p6422_p2 = pnand %p6421_p1, %p6415_p9 }
  0x3d   : > { %6425 = shalt.err (!%p6422_p2)
}
  0x3e   : > { %6030 = dma.hbm_to_vmem [thread:$0]  (!%p6670_p11), %s8362_s3, 256, %s6674_s10, [#allocation6], %s6563_s30, %s6563_s30, %s6564_s9  }
  0x3f   : > { %s6426_s16 = scalar_lea.hbm %s8364_s5, 1024 }
  0x40   : > { %p6427_p6 = scmp.ne.s32.totalorder %s8364_s5, %s6426_s16  ;;  %p6433_p5 = scmp.lt.u32.totalorder %s6426_s16, %s8364_s5 }
  0x42   : > { %p6429_p10 = pnand %p6427_p6, %p6686_p13 }
  0x44   : > { %p6430_p3 = pneg %p6429_p10 }
  0x46   : > { %p6435_p7 = pnand %p6433_p5, %p6430_p3 }
  0x48   : > { %6438 = shalt.err (!%p6435_p7)
}
  0x49   : > { %s6439_s7 = scalar_lea.vmem %s231_s12, 1024  ;;  %p6447_p1 = scmp.lt.s32.totalorder %s231_s12, %s231_s12 }
  0x4a   : > { %p6440_p9 = scmp.ne.s32.totalorder %s231_s12, %s6439_s7  ;;  %p6448_p2 = scmp.lt.s32.totalorder %s6439_s7, %s6439_s7 }
  0x4c   : > { %p6442_p12 = pnand %p6440_p9, %p6686_p13  ;;  %p6449_p4 = por %p6448_p2, %p6447_p1 }
  0x4e   : > { %p6443_p0 = pneg %p6442_p12 }
  0x50   : > { %p6450_p8 = pnand %p6449_p4, %p6443_p0 }
  0x52   : > { %6453 = shalt.err (!%p6450_p8)
}
  0x53   : > { %s6565_s10 = smov 128   ;;  %s6566_s18 = smov 8  }
  0x54   : > { %6033 = dma.hbm_to_vmem [thread:$0]  (!%p6670_p11), %s8364_s5, 1024, %s231_s12, [#allocation9], %s6565_s10, %s6565_s10, %s6566_s18  }
  0x55   : > { %s6756_s14 = sadd.s32 1, %s6558_s24   ;;  %s31_s16 = sadd.s32 1, %s6554_s23 }
  0x56   : > { %s28_s15 = ssub.s32 %s6558_s24, %s6756_s14  ;;  %p38_p8 = scmp.ne.s32.totalorder %s6554_s23, %s6550_s22 }
  0x57   : > { %p29_p4 = scmp.eq.s32.totalorder %s28_s15, 0  ;;  %p39_p13 = scmp.eq.s32.totalorder %s6558_s24, 0 }
  0x58   : > { %p6045_p6 = scmp.lt.s32.totalorder %s6558_s24, 2  ;;  %p8392_p3 = scmp.eq.s32.totalorder %s6640_s25, 1 }
  0x59   : > { %s6766_s17 = scalar_select %p29_p4, %s6554_s23, %s31_s16  }
  0x5a   : > { %p40_p10 = por %p39_p13, %p38_p8  ;;  %p6770_p5 = por %p8392_p3, %p38_p8 }
  0x5b   : > { %s244_s8 = sand.u32 1, %s6554_s23   ;;  %s5299_s20 = sshll.u32 %s6558_s24, 10 }
  0x5c   : > { %s5166_s12 = sshll.u32 %s244_s8, 6  ;;  %s6779_s10 = scalar_lea.hbm %s8359_s0, %s5299_s20 }
  0x5d   : > { %s248_s18 = scalar_lea.vmem [#allocation2], %s5166_s12  ;;  %p6781_p11 = pnand %p6045_p6, %p40_p10 }
  0x5e   : > { %s256_s11 = sshll.u32 %s248_s18, 4  ;;  %s6787_s15 = scalar_lea.sflag [#allocation3], %s244_s8  ;;  %s6785_s11 = int_to_ptr.vmem [resolvable:$true] %s256_s11 }
  0x5f   : > { %s6454_s16 = scalar_lea.hbm %s6779_s10, 1024  ;;  %p6456_p9 = pneg %p6781_p11 }
  0x60   : > { %p6455_p7 = scmp.ne.s32.totalorder %s6779_s10, %s6454_s16  ;;  %s6459_s26 = scalar_lea.hbm %s8359_s0, 2048 }
  0x61   : > { %p6460_p1 = scmp.lt.u32.totalorder %s6779_s10, %s8359_s0  ;;  %p6461_p2 = scmp.lt.u32.totalorder %s6459_s26, %s6454_s16 }
  0x62   : > { %p6457_p12 = pnand %p6456_p9, %p6455_p7  ;;  %p6463_p8 = scmp.lt.u32.totalorder %s6454_s16, %s6779_s10 }
  0x63   : > { %p6462_p4 = por %p6461_p2, %p6460_p1 }
  0x64   : > { %p6458_p0 = pneg %p6457_p12 }
  0x65   : > { %p6464_p13 = por %p6463_p8, %p6462_p4 }
  0x67   : > { %p6465_p6 = pnand %p6464_p13, %p6458_p0 }
  0x69   : > { %6468 = shalt.err (!%p6465_p6)
}
  0x6a   : > { %s6469_s8 = scalar_lea.vmem %s6785_s11, 1024  ;;  %s6567_s20 = smov [#allocation2]  }
  0x6b   : > { %p6470_p10 = scmp.ne.s32.totalorder %s6785_s11, %s6469_s8  ;;  %s6474_s12 = sshll.u32 %s6567_s20, 4  ;;  %s6475_s12 = int_to_ptr.vmem [resolvable:$false] %s6474_s12 }
  0x6c   : > { %s6476_s7 = scalar_lea.vmem %s6475_s12, 2048  ;;  %p6477_p12 = scmp.lt.s32.totalorder %s6785_s11, %s6475_s12 }
  0x6d   : > { %p6472_p3 = pnand %p6470_p10, %p6456_p9  ;;  %p6478_p1 = scmp.lt.s32.totalorder %s6476_s7, %s6469_s8 }
  0x6f   : > { %p6473_p7 = pneg %p6472_p3  ;;  %p6479_p2 = por %p6478_p1, %p6477_p12 }
  0x71   : > { %p6480_p4 = pnand %p6479_p2, %p6473_p7 }
  0x73   : > { %6483 = shalt.err (!%p6480_p4)
}
  0x74   : > { %6037 = dma.hbm_to_vmem [thread:$0]  (!%p6781_p11), %s6779_s10, 1024, %s6785_s11, %s6787_s15, %s6563_s30, %s6563_s30, %s6564_s9  }
  0x75   : > { %p8395_p9 = scmp.ne.s32.totalorder %s8389_s29, 0 }
  0x77   : > { %268 = sbr.rel (%p8395_p9) target bundleno = 3831 (0xef7), region = 44 }
  0x7e   : > { %s6821_s16 = sand.u32 1, %s6550_s22   ;;  %p8396_p0 = scmp.ne.s32.totalorder %s8387_s27, 0 }
  0x7f   : > { %s5171_s26 = sshll.u32 %s6821_s16, 6  ;;  %s271_s18 = scalar_lea.sflag [#allocation3], %s6821_s16 }
  0x80   : > { %s6825_s8 = scalar_lea.vmem [#allocation2], %s5171_s26 }
  0x81   : > { %6529 = dma.done.wait (%p8396_p0), %s271_s18, 1024  }
  0x82   : > { %6531 = vsyncadd (%p8396_p0), %s271_s18, 4294966272  ;;  %p8397_p11 = scmp.eq.s32.totalorder %s6640_s25, 0 }
  0x84   : > { %6533 = dma.done.wait (%p8397_p11), [#allocation6], 512   ;;  %p8398_p8 = pmov %p8397_p11 }
  0x86   : > { %6535 = vsyncadd (%p8398_p8), [#allocation6], 4294966784  ;;  %p8399_p13 = pmov %p8398_p8 }
  0x87   : > { %p8400_p6 = pmov %p8398_p8 }
  0x88   : > { %6537 = dma.done.wait (%p8399_p13), [#allocation9], 1024  }
  0x89   : > { %6539 = vsyncadd (%p8400_p6), [#allocation9], 4294966272  ;;  %v6104_v0 = vld [vmem:[#allocation5] sm:$0xff]   ;;  %v6105_v1 = vld [vmem:[#allocation5 + $0x8] sm:$0xff]   ;;  %vm397_vm0 = vcmask 261120   ;;  %v8369_v10 = vmov 0.0  }
  0x8a   : > { %5476 = vmatprep.subr.bf16.mxu0 %v6104_v0  ;;  %v6106_v2 = vld [vmem:[%s6825_s8] sm:$0xff]   ;;  %5952 = vmatprep.subr.bf16.mxu1 %v6104_v0  ;;  %v6107_v3 = vld [vmem:[%s6825_s8 + $0x8] sm:$0xff]   ;;  %v6108_v4 = vld [vmem:[%s6825_s8 + $0x10] sm:$0xff]   ;;  %vm6569_vm1 = vmmov 0   ;;  %s6570_s30 = smov 96   ;;  %vm556_vm2 = vcmask 64512  }
  0x8b   : > { %5477 = vmatpush3.bf16.msra.mxu0 %v6104_v0  ;;  %5954 = vmatpush3.bf16.msra.mxu1 %v6104_v0  ;;  %v6110_v5 = vld [vmem:[%s6825_s8 + $0x20] sm:$0xff]   ;;  %v6111_v6 = vld [vmem:[%s6825_s8 + $0x28] sm:$0xff]   ;;  %v6112_v7 = vld [vmem:[%s6825_s8 + $0x30] sm:$0xff]   ;;  %vm954_vm3 = vcmask 130048   ;;  %s6571_s9 = smov 64   ;;  %s6572_s10 = smov 120  }
  0x8c   : > { %5478 = vmatprep.subr.bf16.mxu0 %v6105_v1  ;;  %5480 = vmatprep.mubr.msk.bf16.mxu0 %vm397_vm0, %v6106_v2  ;;  %v6109_v8 = vld [vmem:[%s6825_s8 + $0x18] sm:$0xff]   ;;  %v5176_v11 = vld [vmem:[%s8361_s2] ss:$0 sm:$0xff]  ;;  %s6573_s11 = smov 88   ;;  %s6574_s13 = smov 56   ;;  %vm2537_vm4 = vcmask 1043456  }
  0x8d   : > { %5953 = vmatprep.subr.bf16.mxu1 %v6105_v1  ;;  %5488 = vmatprep.mubr.msk.bf16.mxu1 %vm397_vm0, %v6110_v5  ;;  %v6113_v9 = vld [vmem:[%s6825_s8 + $0x38] sm:$0xff]   ;;  %s6575_s15 = smov 80   ;;  %s6576_s20 = smov 112  }
  0x8e   : > { %s6577_s12 = smov 48   ;;  %s6578_s7 = smov 72  }
  0x8f   : > { %5479 = vmatpush3.bf16.msra.mxu0 %v6105_v1  ;;  %5955 = vmatpush3.bf16.msra.mxu1 %v6105_v1  ;;  %s6579_s26 = smov 104   ;;  %s6580_s18 = smov 40  }
  0x90   : > { %5496 = vmatprep.subr.bf16.mxu1 %v8369_v10  ;;  %5520 = vmatprep.subr.bf16.mxu0 %v8369_v10  ;;  %s5175_s8 = sshll.u32 %s6821_s16, 7 }
  0x92   : > { %5481 = vmatmul.mubr.msk.bf16.vlgmr.msra.gmra.mrb[0].mxu0 %vm397_vm0, %v6107_v3  ;;  %5489 = vmatmul.mubr.msk.bf16.vlgmr.msra.gmra.mrb[0].mxu1 %vm397_vm0, %v6111_v6 }
  0x93   : > { %5484 = vmatprep.mubr.msk.bf16.mxu0 %vm397_vm0, %v6108_v4  ;;  %5492 = vmatprep.mubr.msk.bf16.mxu1 %vm397_vm0, %v6112_v7 }
  0x9a   : > { %5485 = vmatmul.mubr.msk.bf16.gmra.mrb[4].mxu0 %vm397_vm0, %v6109_v8  ;;  %5493 = vmatmul.mubr.msk.bf16.gmra.mrb[4].mxu1 %vm397_vm0, %v6113_v9 }
  0x9b   : > { %5498 = vmatprep.mubr.msk.bf16.mxu1 %vm6569_vm1, %v8369_v10  ;;  %5522 = vmatprep.mubr.msk.bf16.mxu0 %vm6569_vm1, %v8369_v10 }
 0x165   : > { %v5482_v12 = vpop.f32.mrb[0].mxu0  ;;  %v5490_v13 = vpop.f32.mrb[0].mxu1 }
 0x166   : > { %v465_v14 = vadd.f32 %v5482_v12, %v5176_v11  ;;  %v456_v15 = vpop.f32.mrb[1].mxu0  ;;  %v497_v16 = vadd.f32 %v5490_v13, %v5176_v11  ;;  %v488_v17 = vpop.f32.mrb[1].mxu1 }
 0x167   : > { %v457_v18 = vadd.f32 %v5176_v11, %v456_v15  ;;  %v5483_v19 = vpop.f32.mrb[2].mxu0  ;;  %v489_v20 = vadd.f32 %v5176_v11, %v488_v17  ;;  %v5491_v21 = vpop.f32.mrb[2].mxu1 }
 0x168   : > { %v521_v22 = vmul.f32 0.35355338, %v465_v14  ;;  %v468_v23 = vadd.f32 %v5483_v19, %v5176_v11  ;;  %v459_v24 = vpop.f32.mrb[3].mxu0  ;;  %v529_v25 = vmul.f32 0.35355338, %v497_v16  ;;  %v500_v26 = vadd.f32 %v5491_v21, %v5176_v11  ;;  %v491_v27 = vpop.f32.mrb[3].mxu1 }
 0x169   : > { %v519_v28 = vmul.f32 0.35355338, %v457_v18  ;;  %v460_v29 = vadd.f32 %v5176_v11, %v459_v24  ;;  %v527_v30 = vmul.f32 0.35355338, %v489_v20  ;;  %v492_v31 = vadd.f32 %v5176_v11, %v491_v27 }
 0x16a   : > { %v522_v32 = vmul.f32 0.35355338, %v468_v23  ;;  %v6864_v33 = vpack.c.bf16 %v468_v23, %v465_v14  ;;  %v530_v34 = vmul.f32 0.35355338, %v500_v26  ;;  %v6866_v35 = vpack.c.bf16 %v500_v26, %v497_v16 }
 0x16b   : > { %v520_v36 = vmul.f32 0.35355338, %v460_v29  ;;  %v6868_v37 = vpack.c.bf16 %v460_v29, %v457_v18  ;;  %v528_v38 = vmul.f32 0.35355338, %v492_v31  ;;  %v6870_v39 = vpack.c.bf16 %v492_v31, %v489_v20  ;;  %v551_v29 = vld [vmem:[#allocation8] sm:$0xff]  ;;  %v552_v31 = vld [vmem:[#allocation8 + $0x8] sm:$0xff] }
 0x16c   : > { %v6872_v40 = vpack.c.bf16 %v522_v32, %v521_v22  ;;  %v6874_v41 = vpack.c.bf16 %v530_v34, %v529_v25 }
 0x16d   : > { %v6876_v42 = vpack.c.bf16 %v520_v36, %v519_v28  ;;  %v5486_v43 = vpop.f32.mrb[4].mxu0  ;;  %554 = vrot.lane.b32.xlu0 %v6868_v37, %s6570_s30  ;;  %v6880_v44 = vpack.c.bf16 %v528_v38, %v527_v30  ;;  %v5494_v45 = vpop.f32.mrb[4].mxu1 }
 0x16e   : > { %8401 = vst [vmem:[#allocation15_spill] sm:$0xff] %v6872_v40  ;;  %8402 = vst [vmem:[#allocation16_spill] sm:$0xff] %v6874_v41  ;;  %v481_v46 = vadd.f32 %v5486_v43, %v5176_v11  ;;  %v472_v47 = vpop.f32.mrb[5].mxu0  ;;  %v513_v48 = vadd.f32 %v5494_v45, %v5176_v11  ;;  %v504_v49 = vpop.f32.mrb[5].mxu1 }
 0x16f   : > { %8403 = vst [vmem:[#allocation17_spill] sm:$0xff] %v6876_v42  ;;  %8404 = vst [vmem:[#allocation18_spill] sm:$0xff] %v6880_v44  ;;  %v473_v50 = vadd.f32 %v5176_v11, %v472_v47  ;;  %v5487_v51 = vpop.f32.mrb[6].mxu0  ;;  %v505_v52 = vadd.f32 %v5176_v11, %v504_v49  ;;  %v5495_v53 = vpop.f32.mrb[6].mxu1 }
 0x170   : > { %v525_v54 = vmul.f32 0.35355338, %v481_v46  ;;  %v484_v55 = vadd.f32 %v5487_v51, %v5176_v11  ;;  %v475_v56 = vpop.f32.mrb[7].mxu0  ;;  %v533_v57 = vmul.f32 0.35355338, %v513_v48  ;;  %v516_v58 = vadd.f32 %v5495_v53, %v5176_v11  ;;  %v507_v59 = vpop.f32.mrb[7].mxu1 }
 0x171   : > { %v523_v60 = vmul.f32 0.35355338, %v473_v50  ;;  %v476_v61 = vadd.f32 %v5176_v11, %v475_v56  ;;  %605 = vrot.lane.b32.xlu0 %v6864_v33, %s6570_s30  ;;  %v531_v62 = vmul.f32 0.35355338, %v505_v52  ;;  %v508_v63 = vadd.f32 %v5176_v11, %v507_v59 }
 0x172   : > { %v526_v0 = vmul.f32 0.35355338, %v484_v55  ;;  %v6884_v1 = vpack.c.bf16 %v484_v55, %v481_v46  ;;  %v534_v2 = vmul.f32 0.35355338, %v516_v58  ;;  %v6886_v3 = vpack.c.bf16 %v516_v58, %v513_v48 }
 0x173   : > { %v524_v4 = vmul.f32 0.35355338, %v476_v61  ;;  %v6888_v5 = vpack.c.bf16 %v476_v61, %v473_v50  ;;  %v532_v6 = vmul.f32 0.35355338, %v508_v63  ;;  %v6890_v7 = vpack.c.bf16 %v508_v63, %v505_v52 }
 0x174   : > { %v6892_v8 = vpack.c.bf16 %v526_v0, %v525_v54  ;;  %v6894_v9 = vpack.c.bf16 %v534_v2, %v533_v57 }
 0x175   : > { %v6896_v12 = vpack.c.bf16 %v524_v4, %v523_v60  ;;  %655 = vrot.lane.b32.xlu1 %v6888_v5, %s6570_s30  ;;  %805 = vrot.lane.b32.xlu0 %v6866_v35, %s6570_s30  ;;  %v6902_v11 = vpack.c.bf16 %v532_v6, %v531_v62 }
 0x176   : > { %8405 = vst [vmem:[#allocation19_spill] sm:$0xff] %v6892_v8 }
 0x177   : > { %8406 = vst [vmem:[#allocation20_spill] sm:$0xff] %v6896_v12 }
 0x179   : > { %705 = vrot.lane.b32.xlu1 %v6884_v1, %s6570_s30  ;;  %755 = vrot.lane.b32.xlu0 %v6870_v39, %s6570_s30 }
 0x17d   : > { %905 = vrot.lane.b32.xlu1 %v6886_v3, %s6570_s30 }
 0x181   : > { %855 = vrot.lane.b32.xlu1 %v6890_v7, %s6570_s30  ;;  %s8274_s30 = scalar_lea.vmem [#allocation10], %s5175_s8 }
 0x1df   : > { %v555_v13 = vpop.permute.xlu0 %554 }
 0x1e0   : > { %v561_v14 = vsel %vm556_vm2, %v555_v13, 0 }
 0x1e1   : > { %5497 = vmatpush3.bf16.xpose.msra.mxu1 %v561_v14 }
 0x1e2   : > { %5502 = vmatprep.subr.bf16.mxu1 %v8369_v10 }
 0x1e3   : > { %v606_v15 = vpop.permute.xlu0 %605 }
 0x1e4   : > { %v611_v18 = vsel %vm556_vm2, %v606_v15, 0 }
 0x1e7   : > { %v656_v16 = vpop.permute.xlu1 %655  ;;  %v806_v17 = vpop.permute.xlu0 %805 }
 0x1e8   : > { %5499 = vmatmul.mubr.msk.bf16.vlgmr.msra.gmra.mrb[8].mxu1 %vm556_vm2, %v6876_v42  ;;  %v661_v23 = vsel %vm556_vm2, %v656_v16, 0  ;;  %v811_v27 = vsel %vm556_vm2, %v806_v17, 0 }
 0x1e9   : > { %5503 = vmatpush3.bf16.xpose.msra.mxu1 %v611_v18  ;;  %5504 = vmatprep.mubr.msk.bf16.mxu1 %vm6569_vm1, %v8369_v10 }
 0x1ea   : > { %5508 = vmatprep.subr.bf16.mxu1 %v8369_v10 }
 0x1eb   : > { %v706_v19 = vpop.permute.xlu1 %705  ;;  %v756_v20 = vpop.permute.xlu0 %755 }
 0x1ec   : > { %v761_v21 = vsel %vm556_vm2, %v756_v20, 0  ;;  %v711_v26 = vsel %vm556_vm2, %v706_v19, 0 }
 0x1ed   : > { %5521 = vmatpush3.bf16.xpose.msra.mxu0 %v761_v21 }
 0x1ee   : > { %5532 = vmatprep.subr.bf16.mxu0 %v8369_v10 }
 0x1ef   : > { %v906_v22 = vpop.permute.xlu1 %905 }
 0x1f0   : > { %5505 = vmatmul.mubr.msk.bf16.vlgmr.msra.gmra.mrb[12].mxu1 %vm556_vm2, %v6872_v40  ;;  %v911_v28 = vsel %vm556_vm2, %v906_v22, 0 }
 0x1f1   : > { %5509 = vmatpush3.bf16.xpose.msra.mxu1 %v661_v23  ;;  %5510 = vmatprep.mubr.msk.bf16.mxu1 %vm6569_vm1, %v8369_v10 }
 0x1f2   : > { %5514 = vmatprep.subr.bf16.mxu1 %v8369_v10 }
 0x1f3   : > { %v856_v24 = vpop.permute.xlu1 %855 }
 0x1f4   : > { %v861_v25 = vsel %vm556_vm2, %v856_v24, 0  ;;  %5523 = vmatmul.mubr.msk.bf16.vlgmr.msra.gmra.mrb[8].mxu0 %vm556_vm2, %v6880_v44 }
 0x1f5   : > { %5533 = vmatpush3.bf16.xpose.msra.mxu0 %v861_v25  ;;  %5534 = vmatprep.mubr.msk.bf16.mxu0 %vm6569_vm1, %v8369_v10 }
 0x1f6   : > { %5544 = vmatprep.subr.bf16.mxu0 %v8369_v10 }
 0x1f8   : > { %5511 = vmatmul.mubr.msk.bf16.vlgmr.msra.gmra.mrb[16].mxu1 %vm556_vm2, %v6896_v12 }
 0x1f9   : > { %5515 = vmatpush3.bf16.xpose.msra.mxu1 %v711_v26  ;;  %5516 = vmatprep.mubr.msk.bf16.mxu1 %vm6569_vm1, %v8369_v10 }
 0x1fa   : > { %5526 = vmatprep.subr.bf16.mxu1 %v8369_v10 }
 0x1fc   : > { %5535 = vmatmul.mubr.msk.bf16.vlgmr.msra.gmra.mrb[12].mxu0 %vm556_vm2, %v6902_v11 }
 0x1fd   : > { %5546 = vmatprep.mubr.msk.bf16.mxu0 %vm6569_vm1, %v8369_v10 }
 0x200   : > { %5517 = vmatmul.mubr.msk.bf16.vlgmr.msra.gmra.mrb[20].mxu1 %vm556_vm2, %v6892_v8 }
 0x201   : > { %5527 = vmatpush3.bf16.xpose.msra.mxu1 %v811_v27  ;;  %5528 = vmatprep.mubr.msk.bf16.mxu1 %vm6569_vm1, %v8369_v10 }
 0x202   : > { %5538 = vmatprep.subr.bf16.mxu1 %v8369_v10 }
 0x208   : > { %5529 = vmatmul.mubr.msk.bf16.vlgmr.msra.gmra.mrb[24].mxu1 %vm556_vm2, %v6874_v41 }
 0x209   : > { %5539 = vmatpush3.bf16.xpose.msra.mxu1 %v911_v28  ;;  %5540 = vmatprep.mubr.msk.bf16.mxu1 %vm6569_vm1, %v8369_v10 }
 0x20a   : > { %5550 = vmatprep.subr.bf16.mxu1 %v8369_v10 }
 0x210   : > { %5541 = vmatmul.mubr.msk.bf16.vlgmr.msra.gmra.mrb[28].mxu1 %vm556_vm2, %v6894_v9 }
 0x211   : > { %5552 = vmatprep.mubr.msk.bf16.mxu1 %vm6569_vm1, %v8369_v10 }
 0x2bb   : > { %v597_v30 = vpop.f32.mrb[8].mxu1 }
 0x2bc   : > { %v6960_v32 = vadd.f32 %v597_v30, %v551_v29  ;;  %v5500_v34 = vpop.f32.mrb[9].mxu1 }
 0x2bd   : > { %v600_v36 = vpop.f32.mrb[10].mxu1 }
 0x2be   : > { %v6962_v38 = vadd.f32 %v600_v36, %v552_v31  ;;  %v5501_v43 = vpop.f32.mrb[11].mxu1 }
 0x2c3   : > { %v647_v45 = vpop.f32.mrb[12].mxu1 }
 0x2c4   : > { %v6964_v46 = vadd.f32 %v647_v45, %v551_v29  ;;  %v5506_v47 = vpop.f32.mrb[13].mxu1 }
 0x2c5   : > { %v650_v48 = vpop.f32.mrb[14].mxu1 }
 0x2c6   : > { %v651_v49 = vadd.f32 %v650_v48, %v552_v31  ;;  %v5507_v50 = vpop.f32.mrb[15].mxu1  ;;  %v961_v51 = vsel %vm954_vm3, %v6964_v46, -inf }
 0x2c7   : > { %v797_v52 = vpop.f32.mrb[8].mxu0  ;;  %962 = vmax.xlane.f32.xlu0 %v961_v51 }
 0x2c8   : > { %v6968_v53 = vadd.f32 %v797_v52, %v551_v29  ;;  %v5524_v54 = vpop.f32.mrb[9].mxu0  ;;  %v964_v55 = vsel %vm954_vm3, %v651_v49, -inf }
 0x2c9   : > { %v800_v56 = vpop.f32.mrb[10].mxu0  ;;  %965 = vmax.xlane.f32.xlu1 %v964_v55 }
 0x2ca   : > { %v6971_v57 = vadd.f32 %v800_v56, %v552_v31  ;;  %v5525_v58 = vpop.f32.mrb[11].mxu0 }
 0x2cb   : > { %v697_v59 = vpop.f32.mrb[16].mxu1 }
 0x2cc   : > { %v6973_v60 = vadd.f32 %v697_v59, %v551_v29  ;;  %v5512_v61 = vpop.f32.mrb[17].mxu1 }
 0x2cd   : > { %v700_v62 = vpop.f32.mrb[18].mxu1 }
 0x2ce   : > { %v6975_v63 = vadd.f32 %v700_v62, %v552_v31  ;;  %v5513_v0 = vpop.f32.mrb[19].mxu1 }
 0x2cf   : > { %v897_v2 = vpop.f32.mrb[12].mxu0 }
 0x2d0   : > { %v6977_v4 = vadd.f32 %v897_v2, %v551_v29  ;;  %v5536_v6 = vpop.f32.mrb[13].mxu0 }
 0x2d1   : > { %v900_v13 = vpop.f32.mrb[14].mxu0 }
 0x2d2   : > { %v6979_v14 = vadd.f32 %v900_v13, %v552_v31  ;;  %v5537_v15 = vpop.f32.mrb[15].mxu0 }
 0x2d3   : > { %v747_v16 = vpop.f32.mrb[20].mxu1 }
 0x2d4   : > { %v748_v17 = vadd.f32 %v747_v16, %v551_v29  ;;  %v5518_v18 = vpop.f32.mrb[21].mxu1 }
 0x2d5   : > { %v750_v19 = vpop.f32.mrb[22].mxu1 }
 0x2d6   : > { %v751_v20 = vadd.f32 %v750_v19, %v552_v31  ;;  %v5519_v21 = vpop.f32.mrb[23].mxu1  ;;  %v973_v22 = vsel %vm954_vm3, %v748_v17, -inf }
 0x2d7   : > { %974 = vmax.xlane.f32.xlu0 %v973_v22 }
 0x2d8   : > { %v976_v23 = vsel %vm954_vm3, %v751_v20, -inf }
 0x2db   : > { %977 = vmax.xlane.f32.xlu0 %v976_v23  ;;  %v847_v24 = vpop.f32.mrb[24].mxu1 }
 0x2dc   : > { %v848_v25 = vadd.f32 %v847_v24, %v551_v29  ;;  %v5530_v26 = vpop.f32.mrb[25].mxu1 }
 0x2dd   : > { %v850_v27 = vpop.f32.mrb[26].mxu1 }
 0x2de   : > { %v851_v28 = vadd.f32 %v850_v27, %v552_v31  ;;  %v5531_v30 = vpop.f32.mrb[27].mxu1  ;;  %v985_v34 = vsel %vm954_vm3, %v848_v25, -inf }
 0x2df   : > { %986 = vmax.xlane.f32.xlu1 %v985_v34 }
 0x2e0   : > { %v988_v36 = vsel %vm954_vm3, %v851_v28, -inf }
 0x2e1   : > { %989 = vmax.xlane.f32.xlu0 %v988_v36 }
 0x2e3   : > { %v947_v43 = vpop.f32.mrb[28].mxu1 }
 0x2e4   : > { %v6985_v45 = vadd.f32 %v947_v43, %v551_v29  ;;  %v5542_v47 = vpop.f32.mrb[29].mxu1 }
 0x2e5   : > { %v950_v48 = vpop.f32.mrb[30].mxu1 }
 0x2e6   : > { %v951_v50 = vadd.f32 %v950_v48, %v552_v31  ;;  %v5543_v51 = vpop.f32.mrb[31].mxu1  ;;  %v997_v52 = vsel %vm954_vm3, %v6985_v45, -inf }
 0x2e7   : > { %998 = vmax.xlane.f32.xlu1 %v997_v52 }
 0x2e8   : > { %v1000_v54 = vsel %vm954_vm3, %v951_v50, -inf }
 0x2e9   : > { %1001 = vmax.xlane.f32.xlu0 %v1000_v54 }
 0x2f8   : > { %1186 = vrot.lane.b32.xlu1 %v6864_v33, %s6571_s9 }
 0x354   : > { %v963_v55 = vpop.xlane.xlu0 %962 }
 0x355   : > { %v1005_v56 = vsub.f32 %v6964_v46, %v963_v55 }
 0x356   : > { %v966_v29 = vpop.xlane.xlu1 %965 }
 0x357   : > { %v1023_v58 = vmul.f32 1.442695, %v1005_v56  ;;  %v1006_v59 = vsub.f32 %v651_v49, %v966_v29 }
 0x359   : > { %6114 = vpow2.f32 %v1023_v58  ;;  %v1025_v31 = vmul.f32 1.442695, %v1006_v59  ;;  %v955_v59 = vsel %vm954_vm3, %v6960_v32, -inf }
 0x35b   : > { %6116 = vpow2.f32 %v1025_v31  ;;  %v958_v31 = vsel %vm954_vm3, %v6962_v38, -inf }
 0x363   : > { %v6993_v61 = vpop.eup %6114 }
 0x364   : > { %v975_v62 = vpop.xlane.xlu0 %974  ;;  %v1057_v0 = vsel %vm954_vm3, %v6993_v61, 0.0 }
 0x365   : > { %v6997_v2 = vpop.eup %6116  ;;  %v1009_v6 = vsub.f32 %v748_v17, %v975_v62  ;;  %1058 = vadd.xlane.f32.xlu1 %v1057_v0  ;;  %v967_v62 = vsel %vm954_vm3, %v6973_v60, -inf  ;;  %v979_v0 = vsel %vm954_vm3, %v6968_v53, -inf }
 0x366   : > { %v1060_v13 = vsel %vm954_vm3, %v6997_v2, 0.0 }
 0x367   : > { %v1031_v46 = vmul.f32 1.442695, %v1009_v6  ;;  %1061 = vadd.xlane.f32.xlu0 %v1060_v13  ;;  %v970_v6 = vsel %vm954_vm3, %v6975_v63, -inf }
 0x368   : > { %v978_v15 = vpop.xlane.xlu0 %977 }
 0x369   : > { %6118 = vpow2.f32 %v1031_v46  ;;  %v1010_v49 = vsub.f32 %v751_v20, %v978_v15  ;;  %v991_v46 = vsel %vm954_vm3, %v6977_v4, -inf }
 0x36b   : > { %v1033_v16 = vmul.f32 1.442695, %v1010_v49 }
 0x36c   : > { %v987_v18 = vpop.xlane.xlu1 %986 }
 0x36d   : > { %6120 = vpow2.f32 %v1033_v16  ;;  %v1013_v19 = vsub.f32 %v848_v25, %v987_v18  ;;  %v982_v18 = vsel %vm954_vm3, %v6971_v57, -inf }
 0x36e   : > { %v990_v21 = vpop.xlane.xlu0 %989 }
 0x36f   : > { %v1039_v22 = vmul.f32 1.442695, %v1013_v19  ;;  %v1014_v23 = vsub.f32 %v851_v28, %v990_v21 }
 0x371   : > { %6122 = vpow2.f32 %v1039_v22  ;;  %v1041_v24 = vmul.f32 1.442695, %v1014_v23  ;;  %v994_v22 = vsel %vm954_vm3, %v6979_v14, -inf }
 0x373   : > { %v7001_v26 = vpop.eup %6118  ;;  %6124 = vpow2.f32 %v1041_v24 }
 0x374   : > { %v999_v17 = vpop.xlane.xlu1 %998  ;;  %v1069_v27 = vsel %vm954_vm3, %v7001_v26, 0.0 }
 0x375   : > { %1070 = vadd.xlane.f32.xlu1 %v1069_v27  ;;  %v1017_v51 = vsub.f32 %v6985_v45, %v999_v17 }
 0x376   : > { %v1002_v47 = vpop.xlane.xlu0 %1001 }
 0x377   : > { %v7005_v30 = vpop.eup %6120  ;;  %v1018_v48 = vsub.f32 %v951_v50, %v1002_v47  ;;  %v1047_v54 = vmul.f32 1.442695, %v1017_v51 }
 0x378   : > { %v1187_v20 = vpop.permute.xlu1 %1186  ;;  %v1072_v34 = vsel %vm954_vm3, %v7005_v30, 0.0 }
 0x379   : > { %5551 = vmatpush3.bf16.msra.mxu1 %v1187_v20  ;;  %1073 = vadd.xlane.f32.xlu0 %v1072_v34  ;;  %v1049_v52 = vmul.f32 1.442695, %v1018_v48 }
 0x37a   : > { %5562 = vmatprep.subr.bf16.mxu1 %v8369_v10 }
 0x37b   : > { %v7010_v25 = vpop.eup %6122  ;;  %6126 = vpow2.f32 %v1049_v52 }
 0x37c   : > { %v1081_v28 = vsel %vm954_vm3, %v7010_v25, 0.0  ;;  %6128 = vpow2.f32 %v1047_v54 }
 0x37d   : > { %v7014_v36 = vpop.eup %6124  ;;  %1082 = vadd.xlane.f32.xlu1 %v1081_v28 }
 0x37e   : > { %v1084_v43 = vsel %vm954_vm3, %v7014_v36, 0.0 }
 0x37f   : > { %1085 = vadd.xlane.f32.xlu0 %v1084_v43 }
 0x385   : > { %v7025_v55 = vpop.eup %6126 }
 0x386   : > { %v7027_v56 = vpop.eup %6128  ;;  %v1096_v29 = vsel %vm954_vm3, %v7025_v55, 0.0 }
 0x387   : > { %v1093_v58 = vsel %vm954_vm3, %v7027_v56, 0.0 }
 0x38e   : > { %1374 = vrot.lane.b32.xlu1 %v6866_v35, %s6571_s9 }
 0x392   : > { %1468 = vrot.lane.b32.xlu1 %v6886_v3, %s6571_s9 }
 0x395   : > { %1280 = vrot.lane.b32.xlu0 %v6884_v1, %s6571_s9 }
 0x3b4   : > { %1097 = vadd.xlane.f32.xlu0 %v1096_v29 }
 0x3b6   : > { %1094 = vadd.xlane.f32.xlu1 %v1093_v58 }
 0x3c7   : > { %1580 = vrot.lane.b32.xlu1 %v6872_v40, %s6572_s10 }
 0x3ca   : > { %1582 = vrot.lane.b32.xlu0 %v6864_v33, %s6573_s11 }
 0x3cb   : > { %1684 = vrot.lane.b32.xlu1 %v6892_v8, %s6572_s10 }
 0x3ce   : > { %1686 = vrot.lane.b32.xlu0 %v6884_v1, %s6573_s11 }
 0x3cf   : > { %1788 = vrot.lane.b32.xlu1 %v6874_v41, %s6572_s10 }
 0x3d2   : > { %1790 = vrot.lane.b32.xlu0 %v6866_v35, %s6573_s11 }
 0x3d3   : > { %1892 = vrot.lane.b32.xlu1 %v6894_v9, %s6572_s10 }
 0x3d6   : > { %1894 = vrot.lane.b32.xlu0 %v6886_v3, %s6573_s11 }
 0x3f2   : > { %v1059_v45 = vpop.xlane.xlu1 %1058 }
 0x3f3   : > { %6130 = vrcp.f32 %v1059_v45 }
 0x3f4   : > { %v1062_v50 = vpop.xlane.xlu0 %1061 }
 0x3f5   : > { %6132 = vrcp.f32 %v1062_v50  ;;  %956 = vmax.xlane.f32.xlu0 %v955_v59 }
 0x3f7   : > { %959 = vmax.xlane.f32.xlu1 %v958_v31 }
 0x3f9   : > { %968 = vmax.xlane.f32.xlu0 %v967_v62 }
 0x3fb   : > { %980 = vmax.xlane.f32.xlu1 %v979_v0 }
 0x3fd   : > { %v6131_v13 = vpop.eup %6130  ;;  %971 = vmax.xlane.f32.xlu0 %v970_v6 }
 0x3fe   : > { %v1117_v49 = vmul.f32 %v6131_v13, %v6993_v61 }
 0x3ff   : > { %v6133_v15 = vpop.eup %6132  ;;  %992 = vmax.xlane.f32.xlu1 %v991_v46 }
 0x400   : > { %v1118_v16 = vmul.f32 %v6133_v15, %v6997_v2 }
 0x401   : > { %983 = vmax.xlane.f32.xlu0 %v982_v18 }
 0x402   : > { %v1071_v19 = vpop.xlane.xlu1 %1070  ;;  %v1132_v21 = vpack.c.bf16 %v1118_v16, %v1117_v49 }
 0x403   : > { %6134 = vrcp.f32 %v1071_v19 }
 0x404   : > { %5553 = vmatmul.mubr.msk.bf16.vlgmr.msra.gmra.mrb[32].mxu1 %vm954_vm3, %v1132_v21 }
 0x405   : > { %995 = vmax.xlane.f32.xlu0 %v994_v22  ;;  %5564 = vmatprep.mubr.msk.bf16.mxu1 %vm6569_vm1, %v8369_v10 }
 0x406   : > { %v1074_v23 = vpop.xlane.xlu0 %1073 }
 0x407   : > { %6136 = vrcp.f32 %v1074_v23 }
 0x40a   : > { %v1083_v61 = vpop.xlane.xlu1 %1082 }
 0x40b   : > { %6138 = vrcp.f32 %v1083_v61 }
 0x40c   : > { %v1086_v2 = vpop.xlane.xlu0 %1085 }
 0x40d   : > { %6140 = vrcp.f32 %v1086_v2  ;;  %v6135_v24 = vpop.eup %6134 }
 0x40e   : > { %v1121_v20 = vmul.f32 %v6135_v24, %v7001_v26  ;;  %v1375_v47 = vpop.permute.xlu1 %1374 }
 0x410   : > { %v1281_v17 = vpop.permute.xlu0 %1280 }
 0x411   : > { %v6137_v27 = vpop.eup %6136  ;;  %5563 = vmatpush3.bf16.msra.mxu1 %v1281_v17 }
 0x412   : > { %v1122_v34 = vmul.f32 %v6137_v27, %v7005_v30  ;;  %5574 = vmatprep.subr.bf16.mxu1 %v8369_v10  ;;  %v1469_v30 = vpop.permute.xlu1 %1468 }
 0x414   : > { %v1134_v28 = vpack.c.bf16 %v1122_v34, %v1121_v20 }
 0x415   : > { %v6139_v43 = vpop.eup %6138 }
 0x416   : > { %5565 = vmatmul.mubr.msk.bf16.vlgmr.msra.gmra.mrb[36].mxu1 %vm954_vm3, %v1134_v28  ;;  %v1125_v26 = vmul.f32 %v6139_v43, %v7010_v25 }
 0x417   : > { %v6141_v48 = vpop.eup %6140  ;;  %5575 = vmatpush3.bf16.msra.mxu1 %v1375_v47  ;;  %5576 = vmatprep.mubr.msk.bf16.mxu1 %vm6569_vm1, %v8369_v10 }
 0x418   : > { %v1126_v51 = vmul.f32 %v6141_v48, %v7014_v36  ;;  %5586 = vmatprep.subr.bf16.mxu1 %v8369_v10 }
 0x41a   : > { %v1136_v52 = vpack.c.bf16 %v1126_v51, %v1125_v26 }
 0x41e   : > { %5577 = vmatmul.mubr.msk.bf16.vlgmr.msra.gmra.mrb[40].mxu1 %vm954_vm3, %v1136_v52 }
 0x41f   : > { %5587 = vmatpush3.bf16.msra.mxu1 %v1469_v30  ;;  %5588 = vmatprep.mubr.msk.bf16.mxu1 %vm6569_vm1, %v8369_v10 }
 0x420   : > { %5598 = vmatprep.subr.bf16.mxu1 %v8369_v10 }
 0x441   : > { %v1098_v54 = vpop.xlane.xlu0 %1097 }
 0x442   : > { %6142 = vrcp.f32 %v1098_v54 }
 0x443   : > { %v1095_v29 = vpop.xlane.xlu1 %1094 }
 0x444   : > { %6144 = vrcp.f32 %v1095_v29 }
 0x445   : > { %v1583_v50 = vpop.permute.xlu0 %1582 }
 0x446   : > { %v1588_v31 = vsel %vm556_vm2, %v1583_v50, 0 }
 0x447   : > { %v1581_v0 = vpop.permute.xlu1 %1580 }
 0x449   : > { %v1687_v62 = vpop.permute.xlu0 %1686 }
 0x44a   : > { %v1692_v6 = vsel %vm556_vm2, %v1687_v62, 0 }
 0x44c   : > { %v6143_v58 = vpop.eup %6142 }
 0x44d   : > { %v1130_v45 = vmul.f32 %v6143_v58, %v7025_v55  ;;  %v1791_v55 = vpop.permute.xlu0 %1790 }
 0x44e   : > { %v6145_v36 = vpop.eup %6144  ;;  %v1796_v13 = vsel %vm556_vm2, %v1791_v55, 0 }
 0x44f   : > { %v1129_v25 = vmul.f32 %v6145_v36, %v7027_v56  ;;  %v1685_v56 = vpop.permute.xlu1 %1684 }
 0x451   : > { %v1138_v59 = vpack.c.bf16 %v1130_v45, %v1129_v25  ;;  %v1895_v46 = vpop.permute.xlu0 %1894 }
 0x452   : > { %v1900_v49 = vsel %vm556_vm2, %v1895_v46, 0 }
 0x453   : > { %5589 = vmatmul.mubr.msk.bf16.vlgmr.msra.gmra.mrb[44].mxu1 %vm954_vm3, %v1138_v59  ;;  %v1789_v15 = vpop.permute.xlu1 %1788 }
 0x454   : > { %5599 = vmatpush3.bf16.xpose.msra.mxu1 %v1588_v31  ;;  %5600 = vmatprep.mubr.msk.bf16.mxu1 %vm6569_vm1, %v8369_v10 }
 0x455   : > { %5610 = vmatprep.subr.bf16.mxu1 %v8369_v10 }
 0x457   : > { %v1893_v16 = vpop.permute.xlu1 %1892 }
 0x45b   : > { %5601 = vmatmul.mubr.msk.bf16.vlgmr.msra.gmra.mrb[48].mxu1 %vm556_vm2, %v1581_v0 }
 0x45c   : > { %5611 = vmatpush3.bf16.xpose.msra.mxu1 %v1692_v6  ;;  %5612 = vmatprep.mubr.msk.bf16.mxu1 %vm6569_vm1, %v8369_v10 }
 0x45d   : > { %5622 = vmatprep.subr.bf16.mxu1 %v8369_v10 }
 0x463   : > { %5613 = vmatmul.mubr.msk.bf16.vlgmr.msra.gmra.mrb[52].mxu1 %vm556_vm2, %v1685_v56 }
 0x464   : > { %5623 = vmatpush3.bf16.xpose.msra.mxu1 %v1796_v13  ;;  %5624 = vmatprep.mubr.msk.bf16.mxu1 %vm6569_vm1, %v8369_v10 }
 0x465   : > { %5634 = vmatprep.subr.bf16.mxu1 %v8369_v10 }
 0x46b   : > { %5625 = vmatmul.mubr.msk.bf16.vlgmr.msra.gmra.mrb[56].mxu1 %vm556_vm2, %v1789_v15 }
 0x46c   : > { %5635 = vmatpush3.bf16.xpose.msra.mxu1 %v1900_v49  ;;  %5636 = vmatprep.mubr.msk.bf16.mxu1 %vm6569_vm1, %v8369_v10 }
 0x46d   : > { %5646 = vmatprep.subr.bf16.mxu1 %v8369_v10 }
 0x473   : > { %5637 = vmatmul.mubr.msk.bf16.vlgmr.msra.gmra.mrb[60].mxu1 %vm556_vm2, %v1893_v16 }
 0x474   : > { %5648 = vmatprep.mubr.msk.bf16.mxu1 %vm6569_vm1, %v8369_v10 }
 0x482   : > { %v957_v18 = vpop.xlane.xlu0 %956 }
 0x483   : > { %v1003_v19 = vsub.f32 %v6960_v32, %v957_v18 }
 0x484   : > { %v960_v21 = vpop.xlane.xlu1 %959 }
 0x485   : > { %v1019_v22 = vmul.f32 1.442695, %v1003_v19  ;;  %v1004_v23 = vsub.f32 %v6962_v38, %v960_v21 }
 0x486   : > { %v969_v61 = vpop.xlane.xlu0 %968 }
 0x487   : > { %6146 = vpow2.f32 %v1019_v22  ;;  %v1021_v2 = vmul.f32 1.442695, %v1004_v23  ;;  %v1007_v24 = vsub.f32 %v6973_v60, %v969_v61 }
 0x488   : > { %v981_v17 = vpop.xlane.xlu1 %980 }
 0x489   : > { %6148 = vpow2.f32 %v1021_v2  ;;  %v1027_v27 = vmul.f32 1.442695, %v1007_v24  ;;  %v1011_v20 = vsub.f32 %v6968_v53, %v981_v17 }
 0x48a   : > { %v972_v34 = vpop.xlane.xlu0 %971 }
 0x48b   : > { %6150 = vpow2.f32 %v1027_v27  ;;  %v1035_v28 = vmul.f32 1.442695, %v1011_v20  ;;  %v1008_v43 = vsub.f32 %v6975_v63, %v972_v34 }
 0x48c   : > { %v993_v32 = vpop.xlane.xlu1 %992 }
 0x48d   : > { %6152 = vpow2.f32 %v1035_v28  ;;  %v1029_v47 = vmul.f32 1.442695, %v1008_v43  ;;  %v1015_v38 = vsub.f32 %v6977_v4, %v993_v32 }
 0x48e   : > { %v984_v48 = vpop.xlane.xlu0 %983 }
 0x48f   : > { %6154 = vpow2.f32 %v1029_v47  ;;  %v1043_v51 = vmul.f32 1.442695, %v1015_v38  ;;  %v1012_v60 = vsub.f32 %v6971_v57, %v984_v48 }
 0x491   : > { %v7115_v26 = vpop.eup %6146  ;;  %6156 = vpow2.f32 %v1043_v51  ;;  %v1037_v52 = vmul.f32 1.442695, %v1012_v60 }
 0x492   : > { %v996_v53 = vpop.xlane.xlu0 %995  ;;  %v1051_v30 = vsel %vm954_vm3, %v7115_v26, 0.0 }
 0x493   : > { %v7119_v54 = vpop.eup %6148  ;;  %6158 = vpow2.f32 %v1037_v52  ;;  %v1016_v63 = vsub.f32 %v6979_v14, %v996_v53  ;;  %1052 = vadd.xlane.f32.xlu1 %v1051_v30  ;;  %v7218_v53 = vld [vmem:[#allocation8 + $0x10] sm:$0xff] }
 0x494   : > { %v1054_v4 = vsel %vm954_vm3, %v7119_v54, 0.0 }
 0x495   : > { %v7124_v29 = vpop.eup %6150  ;;  %v1045_v57 = vmul.f32 1.442695, %v1016_v63  ;;  %1055 = vadd.xlane.f32.xlu0 %v1054_v4 }
 0x496   : > { %v1063_v58 = vsel %vm954_vm3, %v7124_v29, 0.0 }
 0x497   : > { %v7128_v36 = vpop.eup %6152  ;;  %6160 = vpow2.f32 %v1045_v57  ;;  %1064 = vadd.xlane.f32.xlu1 %v1063_v58 }
 0x498   : > { %v1075_v14 = vsel %vm954_vm3, %v7128_v36, 0.0 }
 0x499   : > { %v7130_v45 = vpop.eup %6154 }
 0x49a   : > { %v1066_v25 = vsel %vm954_vm3, %v7130_v45, 0.0 }
 0x49b   : > { %v7136_v50 = vpop.eup %6156  ;;  %1076 = vadd.xlane.f32.xlu1 %v1075_v14  ;;  %1067 = vadd.xlane.f32.xlu0 %v1066_v25  ;;  %v7224_v14 = vld [vmem:[#allocation8 + $0x18] sm:$0xff] }
 0x49c   : > { %v1087_v31 = vsel %vm954_vm3, %v7136_v50, 0.0 }
 0x49d   : > { %v7138_v59 = vpop.eup %6158 }
 0x49e   : > { %v1078_v62 = vsel %vm954_vm3, %v7138_v59, 0.0 }
 0x49f   : > { %1088 = vadd.xlane.f32.xlu1 %v1087_v31  ;;  %1079 = vadd.xlane.f32.xlu0 %v1078_v62 }
 0x4a1   : > { %v7144_v0 = vpop.eup %6160 }
 0x4a2   : > { %v1090_v6 = vsel %vm954_vm3, %v7144_v0, 0.0 }
 0x4a3   : > { %1091 = vadd.xlane.f32.xlu0 %v1090_v6 }
 0x4b0   : > { %1139 = vrot.lane.b32.xlu1 %v6868_v37, %s6571_s9 }
 0x4b4   : > { %1327 = vrot.lane.b32.xlu1 %v6870_v39, %s6571_s9 }
 0x4b8   : > { %1421 = vrot.lane.b32.xlu1 %v6890_v7, %s6571_s9 }
 0x4b9   : > { %1233 = vrot.lane.b32.xlu0 %v6888_v5, %s6571_s9  ;;  %s5301_s9 = sshll.u32 %s6640_s25, 11  ;;  %s5044_s25 = scalar_lea.sflag [#allocation4], %s6821_s16 }
 0x4bc   : > { %1528 = vrot.lane.b32.xlu1 %v6876_v42, %s6572_s10 }
 0x4bd   : > { %1530 = vrot.lane.b32.xlu0 %v6868_v37, %s6573_s11 }
 0x4c0   : > { %1632 = vrot.lane.b32.xlu1 %v6896_v12, %s6572_s10 }
 0x4c1   : > { %1634 = vrot.lane.b32.xlu0 %v6888_v5, %s6573_s11 }
 0x4c4   : > { %1736 = vrot.lane.b32.xlu1 %v6880_v44, %s6572_s10 }
 0x4c5   : > { %1738 = vrot.lane.b32.xlu0 %v6870_v39, %s6573_s11 }
 0x4c8   : > { %1840 = vrot.lane.b32.xlu1 %v6902_v11, %s6572_s10  ;;  %s5058_s10 = sshll.u32 %s8274_s30, 4  ;;  %s8309_s10 = int_to_ptr.vmem [resolvable:$true] %s5058_s10 }
 0x4c9   : > { %1842 = vrot.lane.b32.xlu0 %v6890_v7, %s6573_s11 }
 0x4cc   : > { %2174 = vrot.lane.b32.xlu1 %v6864_v33, %s6574_s13 }
 0x4cd   : > { %2268 = vrot.lane.b32.xlu0 %v6884_v1, %s6574_s13 }
 0x4d0   : > { %2362 = vrot.lane.b32.xlu1 %v6866_v35, %s6574_s13 }
 0x4d1   : > { %2767 = vrot.lane.b32.xlu0 %v6868_v37, %s6575_s15 }
 0x4d4   : > { %2456 = vrot.lane.b32.xlu1 %v6886_v3, %s6574_s13 }
 0x4d5   : > { %2818 = vrot.lane.b32.xlu0 %v6864_v33, %s6575_s15 }
 0x4d7   : > { %v7184_v55 = vpop.f32.mrb[32].mxu1 }
 0x4d8   : > { %2765 = vrot.lane.b32.xlu1 %v6876_v42, %s6576_s20  ;;  %v5554_v56 = vpop.f32.mrb[33].mxu1 }
 0x4d9   : > { %2869 = vrot.lane.b32.xlu0 %v6888_v5, %s6575_s15  ;;  %v7190_v13 = vpop.f32.mrb[34].mxu1 }
 0x4da   : > { %v5555_v15 = vpop.f32.mrb[35].mxu1 }
 0x4dc   : > { %2816 = vrot.lane.b32.xlu1 %v6872_v40, %s6576_s20 }
 0x4dd   : > { %2920 = vrot.lane.b32.xlu0 %v6884_v1, %s6575_s15 }
 0x4e0   : > { %2867 = vrot.lane.b32.xlu1 %v6896_v12, %s6576_s20 }
 0x4e9   : > { %v7200_v49 = vpop.f32.mrb[36].mxu1 }
 0x4ea   : > { %8407 = vst [vmem:[#allocation21_spill] sm:$0xff] %v7200_v49  ;;  %v5566_v16 = vpop.f32.mrb[37].mxu1 }
 0x4eb   : > { %v7202_v18 = vpop.f32.mrb[38].mxu1 }
 0x4ec   : > { %8408 = vst [vmem:[#allocation22_spill] sm:$0xff] %v7202_v18  ;;  %v5567_v21 = vpop.f32.mrb[39].mxu1 }
 0x4f1   : > { %v7206_v22 = vpop.f32.mrb[40].mxu1 }
 0x4f2   : > { %8409 = vst [vmem:[#allocation23_spill] sm:$0xff] %v7206_v22  ;;  %v5578_v23 = vpop.f32.mrb[41].mxu1 }
 0x4f3   : > { %v7208_v61 = vpop.f32.mrb[42].mxu1 }
 0x4f4   : > { %8410 = vst [vmem:[#allocation24_spill] sm:$0xff] %v7208_v61  ;;  %v5579_v24 = vpop.f32.mrb[43].mxu1 }
 0x520   : > { %v1053_v17 = vpop.xlane.xlu1 %1052 }
 0x521   : > { %6162 = vrcp.f32 %v1053_v17 }
 0x522   : > { %v1056_v27 = vpop.xlane.xlu0 %1055 }
 0x523   : > { %6164 = vrcp.f32 %v1056_v27 }
 0x524   : > { %v1065_v20 = vpop.xlane.xlu1 %1064 }
 0x526   : > { %v7212_v34 = vpop.f32.mrb[44].mxu1 }
 0x527   : > { %8411 = vst [vmem:[#allocation25_spill] sm:$0xff] %v7212_v34  ;;  %v5590_v28 = vpop.f32.mrb[45].mxu1 }
 0x528   : > { %v1077_v43 = vpop.xlane.xlu1 %1076  ;;  %v1068_v32 = vpop.xlane.xlu0 %1067 }
 0x529   : > { %v7214_v47 = vpop.f32.mrb[46].mxu1  ;;  %6166 = vrcp.f32 %v1068_v32 }
 0x52a   : > { %8412 = vst [vmem:[#allocation26_spill] sm:$0xff] %v7214_v47  ;;  %v5591_v48 = vpop.f32.mrb[47].mxu1  ;;  %6168 = vrcp.f32 %v1065_v20 }
 0x52b   : > { %v6163_v51 = vpop.eup %6162 }
 0x52c   : > { %v1089_v60 = vpop.xlane.xlu1 %1088  ;;  %v1080_v52 = vpop.xlane.xlu0 %1079  ;;  %v1115_v25 = vmul.f32 %v6163_v51, %v7115_v26 }
 0x52d   : > { %v6165_v30 = vpop.eup %6164  ;;  %6170 = vrcp.f32 %v1080_v52 }
 0x52e   : > { %v1116_v63 = vmul.f32 %v6165_v30, %v7119_v54  ;;  %v1624_v4 = vpop.f32.mrb[48].mxu1  ;;  %6172 = vrcp.f32 %v1077_v43 }
 0x52f   : > { %v7222_v57 = vadd.f32 %v1624_v4, %v7218_v53  ;;  %v5602_v58 = vpop.f32.mrb[49].mxu1 }
 0x530   : > { %v1140_v31 = vpop.permute.xlu1 %1139  ;;  %v1092_v62 = vpop.xlane.xlu0 %1091  ;;  %v1131_v16 = vpack.c.bf16 %v1116_v63, %v1115_v25 }
 0x531   : > { %v1627_v6 = vpop.f32.mrb[50].mxu1  ;;  %5545 = vmatpush3.bf16.msra.mxu0 %v1140_v31  ;;  %v1949_v56 = vsel %vm954_vm3, %v7222_v57, -inf  ;;  %6174 = vrcp.f32 %v1092_v62 }
 0x532   : > { %v7230_v15 = vadd.f32 %v1627_v6, %v7224_v14  ;;  %v5603_v54 = vpop.f32.mrb[51].mxu1  ;;  %1950 = vmax.xlane.f32.xlu0 %v1949_v56  ;;  %5556 = vmatprep.subr.bf16.mxu0 %v8369_v10  ;;  %6176 = vrcp.f32 %v1089_v60 }
 0x533   : > { %v6167_v21 = vpop.eup %6166 }
 0x534   : > { %v1328_v23 = vpop.permute.xlu1 %1327  ;;  %5547 = vmatmul.mubr.msk.bf16.vlgmr.msra.gmra.mrb[16].mxu0 %vm954_vm3, %v1131_v16  ;;  %v1234_v26 = vpop.permute.xlu0 %1233  ;;  %v1952_v24 = vsel %vm954_vm3, %v7230_v15, -inf  ;;  %v1120_v27 = vmul.f32 %v6167_v21, %v7130_v45 }
 0x535   : > { %v6169_v17 = vpop.eup %6168  ;;  %1953 = vmax.xlane.f32.xlu1 %v1952_v24  ;;  %5557 = vmatpush3.bf16.msra.mxu0 %v1234_v26 }
 0x536   : > { %v7237_v20 = vpop.f32.mrb[52].mxu1  ;;  %5558 = vmatprep.mubr.msk.bf16.mxu0 %vm6569_vm1, %v8369_v10  ;;  %5568 = vmatprep.subr.bf16.mxu0 %v8369_v10  ;;  %v1119_v43 = vmul.f32 %v6169_v17, %v7124_v29 }
 0x537   : > { %v5614_v28 = vpop.f32.mrb[53].mxu1  ;;  %v6171_v30 = vpop.eup %6170 }
 0x538   : > { %v1422_v32 = vpop.permute.xlu1 %1421  ;;  %v1731_v48 = vpop.f32.mrb[54].mxu1  ;;  %v1133_v52 = vpack.c.bf16 %v1120_v27, %v1119_v43  ;;  %v1124_v4 = vmul.f32 %v6171_v30, %v7138_v59  ;;  %v7283_v30 = vadd.f32 %v7237_v20, %v7218_v53 }
 0x539   : > { %v5615_v51 = vpop.f32.mrb[55].mxu1  ;;  %v6173_v45 = vpop.eup %6172 }
 0x53a   : > { %v1123_v25 = vmul.f32 %v6173_v45, %v7128_v36  ;;  %v1531_v17 = vpop.permute.xlu0 %1530 }
 0x53b   : > { %v6175_v56 = vpop.eup %6174  ;;  %v1536_v43 = vsel %vm556_vm2, %v1531_v17, 0 }
 0x53c   : > { %v1529_v63 = vpop.permute.xlu1 %1528  ;;  %5559 = vmatmul.mubr.msk.bf16.vlgmr.msra.gmra.mrb[20].mxu0 %vm954_vm3, %v1133_v52  ;;  %v1135_v6 = vpack.c.bf16 %v1124_v4, %v1123_v25  ;;  %v6177_v16 = vpop.eup %6176  ;;  %v1128_v59 = vmul.f32 %v6175_v56, %v7144_v0  ;;  %v1961_v25 = vsel %vm954_vm3, %v7283_v30, -inf }
 0x53d   : > { %5569 = vmatpush3.bf16.msra.mxu0 %v1328_v23  ;;  %5570 = vmatprep.mubr.msk.bf16.mxu0 %vm6569_vm1, %v8369_v10  ;;  %v1127_v23 = vmul.f32 %v6177_v16, %v7136_v50 }
 0x53e   : > { %v1832_v58 = vpop.f32.mrb[56].mxu1  ;;  %5580 = vmatprep.subr.bf16.mxu0 %v8369_v10  ;;  %v1635_v50 = vpop.permute.xlu0 %1634 }
 0x53f   : > { %v5626_v29 = vpop.f32.mrb[57].mxu1  ;;  %v1137_v28 = vpack.c.bf16 %v1128_v59, %v1127_v23  ;;  %v7286_v45 = vadd.f32 %v1832_v58, %v7218_v53 }
 0x540   : > { %v1633_v31 = vpop.permute.xlu1 %1632  ;;  %v7249_v62 = vpop.f32.mrb[58].mxu1  ;;  %v7291_v29 = vadd.f32 %v1731_v48, %v7224_v14 }
 0x541   : > { %v5627_v60 = vpop.f32.mrb[59].mxu1  ;;  %v1973_v20 = vsel %vm954_vm3, %v7286_v45, -inf }
 0x542   : > { %v1739_v51 = vpop.permute.xlu0 %1738  ;;  %v1964_v58 = vsel %vm954_vm3, %v7291_v29, -inf }
 0x543   : > { %v1744_v52 = vsel %vm556_vm2, %v1739_v51, 0 }
 0x544   : > { %v1737_v54 = vpop.permute.xlu1 %1736  ;;  %5571 = vmatmul.mubr.msk.bf16.vlgmr.msra.gmra.mrb[24].mxu0 %vm954_vm3, %v1135_v6 }
 0x545   : > { %5581 = vmatpush3.bf16.msra.mxu0 %v1422_v32  ;;  %5582 = vmatprep.mubr.msk.bf16.mxu0 %vm6569_vm1, %v8369_v10  ;;  %v1640_v32 = vsel %vm556_vm2, %v1635_v50, 0 }
 0x546   : > { %2918 = vrot.lane.b32.xlu1 %v6892_v8, %s6576_s20  ;;  %v7257_v36 = vpop.f32.mrb[60].mxu1  ;;  %5592 = vmatprep.subr.bf16.mxu0 %v8369_v10 }
 0x547   : > { %v5638_v21 = vpop.f32.mrb[61].mxu1 }
 0x548   : > { %v1841_v26 = vpop.permute.xlu1 %1840  ;;  %2971 = vrot.lane.b32.xlu0 %v6870_v39, %s6575_s15  ;;  %v7263_v24 = vpop.f32.mrb[62].mxu1 }
 0x549   : > { %v5639_v27 = vpop.f32.mrb[63].mxu1 }
 0x54c   : > { %v2175_v0 = vpop.permute.xlu1 %2174  ;;  %5583 = vmatmul.mubr.msk.bf16.vlgmr.msra.gmra.mrb[28].mxu0 %vm954_vm3, %v1137_v28 }
 0x54d   : > { %5647 = vmatpush3.bf16.msra.mxu1 %v2175_v0  ;;  %5594 = vmatprep.mubr.msk.bf16.mxu0 %vm6569_vm1, %v8369_v10 }
 0x54e   : > { %5593 = vmatpush3.bf16.xpose.msra.mxu0 %v1536_v43  ;;  %5658 = vmatprep.subr.bf16.mxu1 %v8369_v10 }
 0x54f   : > { %5604 = vmatprep.subr.bf16.mxu0 %v8369_v10 }
 0x555   : > { %5595 = vmatmul.mubr.msk.bf16.vlgmr.msra.gmra.mrb[32].mxu0 %vm556_vm2, %v1529_v63  ;;  %v1843_v63 = vpop.permute.xlu0 %1842 }
 0x556   : > { %5605 = vmatpush3.bf16.xpose.msra.mxu0 %v1640_v32  ;;  %5606 = vmatprep.mubr.msk.bf16.mxu0 %vm6569_vm1, %v8369_v10  ;;  %v1848_v4 = vsel %vm556_vm2, %v1843_v63, 0 }
 0x557   : > { %5616 = vmatprep.subr.bf16.mxu0 %v8369_v10 }
 0x55d   : > { %5607 = vmatmul.mubr.msk.bf16.vlgmr.msra.gmra.mrb[36].mxu0 %vm556_vm2, %v1633_v31 }
 0x55e   : > { %5617 = vmatpush3.bf16.xpose.msra.mxu0 %v1744_v52  ;;  %5618 = vmatprep.mubr.msk.bf16.mxu0 %vm6569_vm1, %v8369_v10 }
 0x55f   : > { %5628 = vmatprep.subr.bf16.mxu0 %v8369_v10 }
 0x565   : > { %5619 = vmatmul.mubr.msk.bf16.vlgmr.msra.gmra.mrb[40].mxu0 %vm556_vm2, %v1737_v54 }
 0x566   : > { %5629 = vmatpush3.bf16.xpose.msra.mxu0 %v1848_v4  ;;  %5630 = vmatprep.mubr.msk.bf16.mxu0 %vm6569_vm1, %v8369_v10 }
 0x567   : > { %1962 = vmax.xlane.f32.xlu0 %v1961_v25  ;;  %5640 = vmatprep.subr.bf16.mxu0 %v8369_v10 }
 0x56a   : > { %1974 = vmax.xlane.f32.xlu1 %v1973_v20 }
 0x56b   : > { %1965 = vmax.xlane.f32.xlu0 %v1964_v58  ;;  %v7334_v58 = vadd.f32 %v7257_v36, %v7218_v53 }
 0x56d   : > { %5631 = vmatmul.mubr.msk.bf16.vlgmr.msra.gmra.mrb[44].mxu0 %vm556_vm2, %v1841_v26  ;;  %v1985_v36 = vsel %vm954_vm3, %v7334_v58, -inf }
 0x56e   : > { %5642 = vmatprep.mubr.msk.bf16.mxu0 %vm6569_vm1, %v8369_v10 }
 0x607   : > { %v7305_v48 = vpop.f32.mrb[16].mxu0 }
 0x608   : > { %v5548_v31 = vpop.f32.mrb[17].mxu0 }
 0x609   : > { %v7307_v60 = vpop.f32.mrb[18].mxu0 }
 0x60a   : > { %v5549_v56 = vpop.f32.mrb[19].mxu0 }
 0x60f   : > { %v7311_v54 = vpop.f32.mrb[20].mxu0 }
 0x610   : > { %v5560_v16 = vpop.f32.mrb[21].mxu0 }
 0x611   : > { %v7313_v59 = vpop.f32.mrb[22].mxu0 }
 0x612   : > { %v5561_v23 = vpop.f32.mrb[23].mxu0 }
 0x613   : > { %v7343_v23 = vadd.f32 %v7249_v62, %v7224_v14 }
 0x615   : > { %v1976_v62 = vsel %vm954_vm3, %v7343_v23, -inf }
 0x617   : > { %v7317_v26 = vpop.f32.mrb[24].mxu0 }
 0x618   : > { %8413 = vst [vmem:[#allocation27_spill] sm:$0xff] %v7317_v26  ;;  %v5572_v17 = vpop.f32.mrb[25].mxu0 }
 0x619   : > { %v7319_v27 = vpop.f32.mrb[26].mxu0 }
 0x61a   : > { %8414 = vst [vmem:[#allocation28_spill] sm:$0xff] %v7319_v27  ;;  %v5573_v0 = vpop.f32.mrb[27].mxu0 }
 0x61b   : > { %v7347_v0 = vpop.permute.xlu0 %2268 }
 0x61f   : > { %v7323_v43 = vpop.f32.mrb[28].mxu0 }
 0x620   : > { %8415 = vst [vmem:[#allocation29_spill] sm:$0xff] %v7323_v43  ;;  %v5584_v50 = vpop.f32.mrb[29].mxu0 }
 0x621   : > { %v7325_v32 = vpop.f32.mrb[30].mxu0 }
 0x622   : > { %8416 = vst [vmem:[#allocation30_spill] sm:$0xff] %v7325_v32  ;;  %v5585_v52 = vpop.f32.mrb[31].mxu0 }
 0x623   : > { %v7353_v52 = vadd.f32 %v7263_v24, %v7224_v14 }
 0x628   : > { %v1572_v63 = vpop.f32.mrb[32].mxu0 }
 0x629   : > { %v7330_v4 = vadd.f32 %v1572_v63, %v7218_v53  ;;  %v5596_v25 = vpop.f32.mrb[33].mxu0 }
 0x62a   : > { %v1575_v20 = vpop.f32.mrb[34].mxu0  ;;  %v7357_v25 = vpop.permute.xlu1 %2362 }
 0x62b   : > { %v7337_v31 = vadd.f32 %v1575_v20, %v7224_v14  ;;  %v5597_v56 = vpop.f32.mrb[35].mxu0  ;;  %v1943_v16 = vsel %vm954_vm3, %v7330_v4, -inf }
 0x62c   : > { %1944 = vmax.xlane.f32.xlu1 %v1943_v16  ;;  %v7359_v16 = vpop.permute.xlu0 %2767 }
 0x62d   : > { %v1946_v17 = vsel %vm954_vm3, %v7337_v31, -inf }
 0x62e   : > { %1947 = vmax.xlane.f32.xlu0 %v1946_v17  ;;  %v1988_v17 = vsel %vm954_vm3, %v7353_v52, -inf }
 0x630   : > { %v1676_v50 = vpop.f32.mrb[36].mxu0  ;;  %1986 = vmax.xlane.f32.xlu1 %v1985_v36  ;;  %v7363_v36 = vpop.permute.xlu1 %2456 }
 0x631   : > { %v5608_v63 = vpop.f32.mrb[37].mxu0 }
 0x632   : > { %v1679_v20 = vpop.f32.mrb[38].mxu0  ;;  %1977 = vmax.xlane.f32.xlu0 %v1976_v62  ;;  %v7367_v63 = vpop.permute.xlu0 %2818 }
 0x633   : > { %v5609_v56 = vpop.f32.mrb[39].mxu0 }
 0x634   : > { %v7371_v28 = vpop.permute.xlu1 %2765 }
 0x636   : > { %1989 = vmax.xlane.f32.xlu0 %v1988_v17  ;;  %v7373_v62 = vpop.permute.xlu0 %2869 }
 0x638   : > { %v7365_v38 = vpop.f32.mrb[40].mxu0  ;;  %v7381_v46 = vpop.permute.xlu1 %2816 }
 0x639   : > { %v5620_v24 = vpop.f32.mrb[41].mxu0 }
 0x63a   : > { %v7369_v51 = vpop.f32.mrb[42].mxu0  ;;  %v7383_v24 = vpop.permute.xlu0 %2920 }
 0x63b   : > { %v5621_v2 = vpop.f32.mrb[43].mxu0 }
 0x63c   : > { %v7385_v6 = vpop.permute.xlu1 %2867 }
 0x63e   : > { %v1951_v2 = vpop.xlane.xlu0 %1950 }
 0x640   : > { %v7375_v56 = vpop.f32.mrb[44].mxu0  ;;  %v1954_v10 = vpop.xlane.xlu1 %1953 }
 0x641   : > { %v5632_v19 = vpop.f32.mrb[45].mxu0  ;;  %3022 = vrot.lane.b32.xlu1 %v6866_v35, %s6575_s15  ;;  %v1994_v40 = vsub.f32 %v7230_v15, %v1954_v10  ;;  %v7406_v15 = vadd.f32 %v1679_v20, %v7224_v14 }
 0x642   : > { %v7379_v17 = vpop.f32.mrb[46].mxu0  ;;  %v7389_v34 = vpop.permute.xlu0 %2971  ;;  %v1993_v19 = vsub.f32 %v7222_v57, %v1951_v2  ;;  %v7399_v57 = vadd.f32 %v1676_v50, %v7218_v53 }
 0x643   : > { %v5633_v21 = vpop.f32.mrb[47].mxu0 }
 0x644   : > { %v7392_v47 = vpop.permute.xlu1 %2918  ;;  %v2011_v43 = vmul.f32 1.442695, %v1993_v19 }
 0x646   : > { %v1963_v12 = vpop.xlane.xlu0 %1962  ;;  %6178 = vpow2.f32 %v2011_v43 }
 0x647   : > { %v1997_v21 = vsub.f32 %v7283_v30, %v1963_v12  ;;  %v1955_v12 = vsel %vm954_vm3, %v7399_v57, -inf }
 0x648   : > { %v1975_v32 = vpop.xlane.xlu1 %1974 }
 0x649   : > { %v2019_v61 = vmul.f32 1.442695, %v1997_v21  ;;  %v2001_v42 = vsub.f32 %v7286_v45, %v1975_v32 }
 0x64a   : > { %v1966_v22 = vpop.xlane.xlu0 %1965 }
 0x64b   : > { %v1998_v26 = vsub.f32 %v7291_v29, %v1966_v22  ;;  %6180 = vpow2.f32 %v2019_v61  ;;  %v2027_v27 = vmul.f32 1.442695, %v2001_v42 }
 0x64c   : > { %2969 = vrot.lane.b32.xlu0 %v6880_v44, %s6576_s20  ;;  %v2013_v44 = vmul.f32 1.442695, %v1994_v40 }
 0x64d   : > { %v2021_v2 = vmul.f32 1.442695, %v1998_v26 }
 0x64e   : > { %6182 = vpow2.f32 %v2013_v44  ;;  %v1958_v44 = vsel %vm954_vm3, %v7406_v15, -inf }
 0x64f   : > { %6184 = vpow2.f32 %v2027_v27 }
 0x650   : > { %v7403_v10 = vpop.eup %6178  ;;  %6186 = vpow2.f32 %v2021_v2 }
 0x651   : > { %v2045_v40 = vsel %vm954_vm3, %v7403_v10, 0.0 }
 0x655   : > { %v7410_v42 = vpop.eup %6180 }
 0x656   : > { %v2057_v61 = vsel %vm954_vm3, %v7410_v42, 0.0 }
 0x658   : > { %v6183_v22 = vpop.eup %6182 }
 0x659   : > { %v7416_v30 = vpop.eup %6184  ;;  %v2048_v45 = vsel %vm954_vm3, %v6183_v22, 0.0 }
 0x65a   : > { %v6187_v29 = vpop.eup %6186  ;;  %v2069_v26 = vsel %vm954_vm3, %v7416_v30, 0.0 }
 0x65b   : > { %v2060_v27 = vsel %vm954_vm3, %v6187_v29, 0.0 }
 0x665   : > { %1956 = vmax.xlane.f32.xlu1 %v1955_v12 }
 0x669   : > { %2046 = vadd.xlane.f32.xlu1 %v2045_v40 }
 0x66b   : > { %1959 = vmax.xlane.f32.xlu0 %v1958_v44 }
 0x66d   : > { %2058 = vadd.xlane.f32.xlu1 %v2057_v61 }
 0x66f   : > { %2049 = vadd.xlane.f32.xlu0 %v2048_v45 }
 0x671   : > { %2070 = vadd.xlane.f32.xlu1 %v2069_v26 }
 0x673   : > { %2061 = vadd.xlane.f32.xlu0 %v2060_v27 }
 0x6b9   : > { %v7422_v43 = vpop.xlane.xlu1 %1944 }
 0x6bb   : > { %v7424_v32 = vpop.xlane.xlu0 %1947 }
 0x6bd   : > { %v1987_v50 = vpop.xlane.xlu1 %1986 }
 0x6be   : > { %v2005_v20 = vsub.f32 %v7334_v58, %v1987_v50 }
 0x6bf   : > { %v1978_v19 = vpop.xlane.xlu0 %1977 }
 0x6c0   : > { %v2035_v21 = vmul.f32 1.442695, %v2005_v20  ;;  %v2002_v2 = vsub.f32 %v7343_v23, %v1978_v19 }
 0x6c2   : > { %6188 = vpow2.f32 %v2035_v21  ;;  %v2029_v12 = vmul.f32 1.442695, %v2002_v2 }
 0x6c3   : > { %v1990_v40 = vpop.xlane.xlu0 %1989 }
 0x6c4   : > { %6190 = vpow2.f32 %v2029_v12  ;;  %v2006_v44 = vsub.f32 %v7353_v52, %v1990_v40  ;;  %v7445_v52 = vpop.permute.xlu1 %3022  ;;  %v7451_v40 = vadd.f32 %v7365_v38, %v7218_v53 }
 0x6c6   : > { %v2037_v61 = vmul.f32 1.442695, %v2006_v44 }
 0x6c7   : > { %v7447_v19 = vpop.permute.xlu0 %2969 }
 0x6c8   : > { %6192 = vpow2.f32 %v2037_v61 }
 0x6cc   : > { %v7429_v45 = vpop.eup %6188 }
 0x6cd   : > { %v2081_v26 = vsel %vm954_vm3, %v7429_v45, 0.0 }
 0x6ce   : > { %v7433_v27 = vpop.eup %6190  ;;  %2082 = vadd.xlane.f32.xlu1 %v2081_v26  ;;  %v1967_v26 = vsel %vm954_vm3, %v7451_v40, -inf }
 0x6cf   : > { %v2072_v58 = vsel %vm954_vm3, %v7433_v27, 0.0 }
 0x6d0   : > { %2073 = vadd.xlane.f32.xlu0 %v2072_v58  ;;  %v7457_v58 = vadd.f32 %v7369_v51, %v7224_v14 }
 0x6d2   : > { %v7437_v23 = vpop.eup %6192 }
 0x6d3   : > { %v2084_v50 = vsel %vm954_vm3, %v7437_v23, 0.0 }
 0x6d4   : > { %2085 = vadd.xlane.f32.xlu0 %v2084_v50 }
 0x6df   : > { %3073 = vrot.lane.b32.xlu1 %v6890_v7, %s6575_s15 }
 0x6ea   : > { %3020 = vrot.lane.b32.xlu0 %v6874_v41, %s6576_s20  ;;  %v1970_v41 = vsel %vm954_vm3, %v7457_v58, -inf }
 0x6f2   : > { %v1957_v20 = vpop.xlane.xlu1 %1956 }
 0x6f6   : > { %v2047_v2 = vpop.xlane.xlu1 %2046 }
 0x6f7   : > { %6194 = vrcp.f32 %v2047_v2 }
 0x6f8   : > { %v1960_v21 = vpop.xlane.xlu0 %1959 }
 0x6fa   : > { %v2059_v61 = vpop.xlane.xlu1 %2058 }
 0x6fc   : > { %v2050_v12 = vpop.xlane.xlu0 %2049 }
 0x6fd   : > { %6196 = vrcp.f32 %v2050_v12 }
 0x700   : > { %v2062_v44 = vpop.xlane.xlu0 %2061 }
 0x701   : > { %6198 = vrcp.f32 %v2062_v44  ;;  %v6195_v50 = vpop.eup %6194 }
 0x702   : > { %6200 = vrcp.f32 %v2059_v61  ;;  %v2105_v38 = vmul.f32 %v6195_v50, %v7403_v10  ;;  %v1996_v10 = vsub.f32 %v7406_v15, %v1960_v21 }
 0x703   : > { %1968 = vmax.xlane.f32.xlu1 %v1967_v26  ;;  %v8417_v26 = vmov 0.0  }
 0x707   : > { %v6197_v2 = vpop.eup %6196 }
 0x708   : > { %v2106_v12 = vmul.f32 %v6197_v2, %v6183_v22  ;;  %v2017_v22 = vmul.f32 1.442695, %v1996_v10 }
 0x709   : > { %1971 = vmax.xlane.f32.xlu0 %v1970_v41  ;;  %v1991_v41 = vsub.f32 %v7330_v4, %v7422_v43 }
 0x70a   : > { %v2120_v49 = vpack.c.bf16 %v2106_v12, %v2105_v38 }
 0x70b   : > { %v6199_v44 = vpop.eup %6198 }
 0x70c   : > { %5649 = vmatmul.mubr.msk.bf16.vlgmr.msra.gmra.mrb[64].mxu1 %vm954_vm3, %v2120_v49  ;;  %v6201_v18 = vpop.eup %6200  ;;  %v2110_v51 = vmul.f32 %v6199_v44, %v6187_v29  ;;  %v2007_v49 = vmul.f32 1.442695, %v1991_v41 }
 0x70d   : > { %5659 = vmatpush3.bf16.msra.mxu1 %v7347_v0  ;;  %5660 = vmatprep.mubr.msk.bf16.mxu1 %vm6569_vm1, %v8417_v26  ;;  %v2109_v61 = vmul.f32 %v6201_v18, %v7410_v42  ;;  %v1992_v18 = vsub.f32 %v7337_v31, %v7424_v32  ;;  %v7485_v42 = vadd.f32 %v7375_v56, %v7218_v53 }
 0x70e   : > { %5670 = vmatprep.subr.bf16.mxu1 %v8417_v26  ;;  %6202 = vpow2.f32 %v2007_v49  ;;  %v7493_v31 = vadd.f32 %v7379_v17, %v7224_v14 }
 0x70f   : > { %v2122_v8 = vpack.c.bf16 %v2110_v51, %v2109_v61  ;;  %v2009_v0 = vmul.f32 1.442695, %v1992_v18  ;;  %v1979_v4 = vsel %vm954_vm3, %v7485_v42, -inf }
 0x710   : > { %v1982_v53 = vsel %vm954_vm3, %v7493_v31, -inf }
 0x711   : > { %6204 = vpow2.f32 %v2009_v0 }
 0x714   : > { %3124 = vrot.lane.b32.xlu1 %v6886_v3, %s6575_s15  ;;  %5661 = vmatmul.mubr.msk.bf16.vlgmr.msra.gmra.mrb[68].mxu1 %vm954_vm3, %v2122_v8  ;;  %v1995_v8 = vsub.f32 %v7399_v57, %v1957_v20  ;;  %v2071_v20 = vpop.xlane.xlu1 %2070  ;;  %s8307_s15 = scalar_lea.hbm %s8365_s6, %s5301_s9 }
 0x715   : > { %5671 = vmatpush3.bf16.msra.mxu1 %v7357_v25  ;;  %5672 = vmatprep.mubr.msk.bf16.mxu1 %vm6569_vm1, %v8417_v26 }
 0x716   : > { %5682 = vmatprep.subr.bf16.mxu1 %v8417_v26  ;;  %v2015_v25 = vmul.f32 1.442695, %v1995_v8 }
 0x718   : > { %6206 = vpow2.f32 %v2015_v25  ;;  %v7489_v29 = vpop.eup %6202 }
 0x719   : > { %6208 = vpow2.f32 %v2017_v22  ;;  %v2039_v57 = vsel %vm954_vm3, %v7489_v29, 0.0 }
 0x71a   : > { %6210 = vrcp.f32 %v2071_v20 }
 0x71b   : > { %v7497_v15 = vpop.eup %6204 }
 0x71c   : > { %v2042_v56 = vsel %vm954_vm3, %v7497_v15, 0.0 }
 0x71f   : > { %3071 = vrot.lane.b32.xlu0 %v6902_v11, %s6576_s20 }
 0x722   : > { %v7503_v43 = vpop.eup %6206 }
 0x723   : > { %v2051_v14 = vsel %vm954_vm3, %v7503_v43, 0.0  ;;  %v7507_v17 = vpop.eup %6208 }
 0x724   : > { %v2054_v32 = vsel %vm954_vm3, %v7507_v17, 0.0  ;;  %v6211_v38 = vpop.eup %6210 }
 0x725   : > { %v2113_v44 = vmul.f32 %v6211_v38, %v7416_v30  ;;  %v2773_v30 = vsel %vm556_vm2, %v7359_v16, 0  ;;  %v2875_v16 = vsel %vm556_vm2, %v7373_v62, 0 }
 0x738   : > { %1980 = vmax.xlane.f32.xlu1 %v1979_v4 }
 0x73c   : > { %2040 = vadd.xlane.f32.xlu1 %v2039_v57 }
 0x73e   : > { %1983 = vmax.xlane.f32.xlu0 %v1982_v53 }
 0x740   : > { %2043 = vadd.xlane.f32.xlu1 %v2042_v56 }
 0x744   : > { %2052 = vadd.xlane.f32.xlu1 %v2051_v14 }
 0x748   : > { %2055 = vadd.xlane.f32.xlu1 %v2054_v32 }
 0x754   : > { %3122 = vrot.lane.b32.xlu0 %v6894_v9, %s6576_s20  ;;  %s6484_s20 = scalar_lea.vmem %s8309_s10, 2048 }
 0x755   : > { %p6485_p10 = scmp.ne.s32.totalorder %s8309_s10, %s6484_s20 }
 0x757   : > { %p6486_p3 = pnand %p6485_p10, %p6770_p5 }
 0x759   : > { %p6487_p7 = pneg %p6486_p3 }
 0x75b   : > { %v2083_v50 = vpop.xlane.xlu1 %2082 }
 0x75d   : > { %v2074_v21 = vpop.xlane.xlu0 %2073 }
 0x75e   : > { %6212 = vrcp.f32 %v2074_v21 }
 0x761   : > { %v2086_v2 = vpop.xlane.xlu0 %2085 }
 0x762   : > { %6214 = vrcp.f32 %v2086_v2 }
 0x763   : > { %6216 = vrcp.f32 %v2083_v50 }
 0x768   : > { %v6213_v12 = vpop.eup %6212 }
 0x769   : > { %v2114_v51 = vmul.f32 %v6213_v12, %v7433_v27 }
 0x76b   : > { %v2124_v61 = vpack.c.bf16 %v2114_v51, %v2113_v44 }
 0x76c   : > { %v6215_v41 = vpop.eup %6214 }
 0x76d   : > { %5673 = vmatmul.mubr.msk.bf16.vlgmr.msra.gmra.mrb[72].mxu1 %vm954_vm3, %v2124_v61  ;;  %v6217_v49 = vpop.eup %6216  ;;  %v2118_v18 = vmul.f32 %v6215_v41, %v7437_v23  ;;  %v2977_v23 = vsel %vm556_vm2, %v7389_v34, 0 }
 0x76e   : > { %5683 = vmatpush3.bf16.msra.mxu1 %v7363_v36  ;;  %5684 = vmatprep.mubr.msk.bf16.mxu1 %vm6569_vm1, %v8417_v26  ;;  %v2117_v0 = vmul.f32 %v6217_v49, %v7429_v45  ;;  %v2824_v36 = vsel %vm556_vm2, %v7367_v63, 0  ;;  %v3074_v63 = vpop.permute.xlu1 %3073  ;;  %v3021_v45 = vpop.permute.xlu0 %3020 }
 0x76f   : > { %5724 = vmatprep.subr.bf16.mxu1 %v8417_v26  ;;  %v3079_v10 = vsel %vm556_vm2, %v3074_v63, 0 }
 0x770   : > { %v2126_v8 = vpack.c.bf16 %v2118_v18, %v2117_v0 }
 0x775   : > { %5685 = vmatmul.mubr.msk.bf16.vlgmr.msra.gmra.mrb[76].mxu1 %vm954_vm3, %v2126_v8 }
 0x776   : > { %5726 = vmatprep.mubr.msk.bf16.mxu1 %vm6569_vm1, %v8417_v26 }
 0x777   : > { %5725 = vmatpush3.bf16.xpose.msra.mxu1 %v2773_v30 }
 0x778   : > { %5730 = vmatprep.subr.bf16.mxu1 %v8417_v26 }
 0x77e   : > { %5727 = vmatmul.mubr.msk.bf16.vlgmr.msra.gmra.mrb[80].mxu1 %vm556_vm2, %v7371_v28  ;;  %v2926_v28 = vsel %vm556_vm2, %v7383_v24, 0 }
 0x77f   : > { %5731 = vmatpush3.bf16.xpose.msra.mxu1 %v2824_v36  ;;  %5732 = vmatprep.mubr.msk.bf16.mxu1 %vm6569_vm1, %v8417_v26 }
 0x780   : > { %5736 = vmatprep.subr.bf16.mxu1 %v8417_v26 }
 0x786   : > { %5733 = vmatmul.mubr.msk.bf16.vlgmr.msra.gmra.mrb[84].mxu1 %vm556_vm2, %v7381_v46 }
 0x787   : > { %5737 = vmatpush3.bf16.xpose.msra.mxu1 %v2875_v16  ;;  %5738 = vmatprep.mubr.msk.bf16.mxu1 %vm6569_vm1, %v8417_v26 }
 0x788   : > { %5742 = vmatprep.subr.bf16.mxu1 %v8417_v26 }
 0x78e   : > { %5739 = vmatmul.mubr.msk.bf16.vlgmr.msra.gmra.mrb[88].mxu1 %vm556_vm2, %v7385_v6 }
 0x78f   : > { %5743 = vmatpush3.bf16.xpose.msra.mxu1 %v2926_v28  ;;  %5744 = vmatprep.mubr.msk.bf16.mxu1 %vm6569_vm1, %v8417_v26 }
 0x790   : > { %v1969_v62 = vpop.xlane.xlu1 %1968  ;;  %5748 = vmatprep.subr.bf16.mxu1 %v8417_v26 }
 0x791   : > { %v1999_v46 = vsub.f32 %v7451_v40, %v1969_v62  ;;  %v3028_v40 = vsel %vm556_vm2, %v7445_v52, 0 }
 0x793   : > { %v2023_v27 = vmul.f32 1.442695, %v1999_v46 }
 0x795   : > { %6218 = vpow2.f32 %v2023_v27 }
 0x796   : > { %5745 = vmatmul.mubr.msk.bf16.vlgmr.msra.gmra.mrb[92].mxu1 %vm556_vm2, %v7392_v47  ;;  %v1972_v24 = vpop.xlane.xlu0 %1971 }
 0x797   : > { %5749 = vmatpush3.bf16.xpose.msra.mxu1 %v2977_v23  ;;  %v2000_v6 = vsub.f32 %v7457_v58, %v1972_v24  ;;  %5750 = vmatprep.mubr.msk.bf16.mxu1 %vm6569_vm1, %v8417_v26 }
 0x798   : > { %5754 = vmatprep.subr.bf16.mxu1 %v8417_v26 }
 0x799   : > { %v2025_v25 = vmul.f32 1.442695, %v2000_v6  ;;  %v7628_v6 = vld [vmem:[#allocation8 + $0x20] sm:$0xff] }
 0x79a   : > { %v3072_v22 = vpop.permute.xlu0 %3071 }
 0x79b   : > { %6220 = vpow2.f32 %v2025_v25 }
 0x79e   : > { %5751 = vmatmul.mubr.msk.bf16.vlgmr.msra.gmra.mrb[96].mxu1 %vm556_vm2, %v7447_v19  ;;  %v3125_v19 = vpop.permute.xlu1 %3124 }
 0x79f   : > { %v7562_v34 = vpop.eup %6218  ;;  %5755 = vmatpush3.bf16.xpose.msra.mxu1 %v3028_v40  ;;  %5756 = vmatprep.mubr.msk.bf16.mxu1 %vm6569_vm1, %v8417_v26  ;;  %v3130_v4 = vsel %vm556_vm2, %v3125_v19, 0 }
 0x7a0   : > { %v2063_v47 = vsel %vm954_vm3, %v7562_v34, 0.0  ;;  %5760 = vmatprep.subr.bf16.mxu1 %v8417_v26 }
 0x7a1   : > { %2064 = vadd.xlane.f32.xlu1 %v2063_v47  ;;  %v7630_v47 = vld [vmem:[#allocation8 + $0x28] sm:$0xff] }
 0x7a5   : > { %v7569_v58 = vpop.eup %6220 }
 0x7a6   : > { %5757 = vmatmul.mubr.msk.bf16.vlgmr.msra.gmra.mrb[100].mxu1 %vm556_vm2, %v3021_v45  ;;  %v2066_v52 = vsel %vm954_vm3, %v7569_v58, 0.0 }
 0x7a7   : > { %5761 = vmatpush3.bf16.xpose.msra.mxu1 %v3079_v10  ;;  %2067 = vadd.xlane.f32.xlu1 %v2066_v52 }
 0x7a8   : > { %5762 = vmatprep.mubr.msk.bf16.mxu1 %vm6569_vm1, %v8417_v26  ;;  %5766 = vmatprep.subr.bf16.mxu1 %v8417_v26 }
 0x7ae   : > { %5763 = vmatmul.mubr.msk.bf16.vlgmr.msra.gmra.mrb[104].mxu1 %vm556_vm2, %v3072_v22 }
 0x7af   : > { %5767 = vmatpush3.bf16.xpose.msra.mxu1 %v3130_v4  ;;  %5768 = vmatprep.mubr.msk.bf16.mxu1 %vm6569_vm1, %v8417_v26 }
 0x7b0   : > { %5778 = vmatprep.subr.bf16.mxu1 %v8417_v26 }
 0x7c5   : > { %v1981_v57 = vpop.xlane.xlu1 %1980 }
 0x7c6   : > { %v2003_v53 = vsub.f32 %v7485_v42, %v1981_v57 }
 0x7c8   : > { %v2031_v56 = vmul.f32 1.442695, %v2003_v53 }
 0x7c9   : > { %v2041_v27 = vpop.xlane.xlu1 %2040 }
 0x7ca   : > { %6222 = vpow2.f32 %v2031_v56 }
 0x7cb   : > { %v1984_v14 = vpop.xlane.xlu0 %1983 }
 0x7cc   : > { %v2004_v32 = vsub.f32 %v7493_v31, %v1984_v14 }
 0x7cd   : > { %v2044_v25 = vpop.xlane.xlu1 %2043 }
 0x7ce   : > { %v2033_v20 = vmul.f32 1.442695, %v2004_v32 }
 0x7cf   : > { %v3123_v21 = vpop.permute.xlu0 %3122 }
 0x7d0   : > { %6224 = vpow2.f32 %v2033_v20  ;;  %5769 = vmatmul.mubr.msk.bf16.vlgmr.msra.gmra.mrb[108].mxu1 %vm556_vm2, %v3123_v21 }
 0x7d1   : > { %5780 = vmatprep.mubr.msk.bf16.mxu1 %vm6569_vm1, %v8417_v26  ;;  %v2053_v56 = vpop.xlane.xlu1 %2052  ;;  %6226 = vrcp.f32 %v2044_v25 }
 0x7d2   : > { %6228 = vrcp.f32 %v2041_v27 }
 0x7d4   : > { %v7588_v50 = vpop.eup %6222 }
 0x7d5   : > { %v2075_v2 = vsel %vm954_vm3, %v7588_v50, 0.0 }
 0x7d6   : > { %2076 = vadd.xlane.f32.xlu0 %v2075_v2 }
 0x7da   : > { %v7592_v42 = vpop.eup %6224 }
 0x7db   : > { %v2078_v38 = vsel %vm954_vm3, %v7592_v42, 0.0  ;;  %v6227_v27 = vpop.eup %6226 }
 0x7dc   : > { %2079 = vadd.xlane.f32.xlu1 %v2078_v38 }
 0x7df   : > { %v7596_v31 = vpop.f32.mrb[64].mxu1 }
 0x7e0   : > { %v5650_v12 = vpop.f32.mrb[65].mxu1 }
 0x7e1   : > { %v7598_v44 = vpop.f32.mrb[66].mxu1 }
 0x7e2   : > { %v2504_v51 = vpack.c.bf16 %v7598_v44, %v7596_v31  ;;  %v5651_v61 = vpop.f32.mrb[67].mxu1 }
 0x7e3   : > { %v2056_v61 = vpop.xlane.xlu1 %2055 }
 0x7e4   : > { %6230 = vrcp.f32 %v2056_v61 }
 0x7e5   : > { %6232 = vrcp.f32 %v2053_v56 }
 0x7e7   : > { %v7602_v41 = vpop.f32.mrb[68].mxu1 }
 0x7e8   : > { %v5662_v49 = vpop.f32.mrb[69].mxu1 }
 0x7e9   : > { %v7604_v18 = vpop.f32.mrb[70].mxu1 }
 0x7ea   : > { %v2506_v0 = vpack.c.bf16 %v7604_v18, %v7602_v41  ;;  %v5663_v8 = vpop.f32.mrb[71].mxu1 }
 0x7ec   : > { %2409 = vrot.lane.b32.xlu0 %v6890_v7, %s6574_s13 }
 0x7ed   : > { %2127 = vrot.lane.b32.xlu1 %v6868_v37, %s6574_s13 }
 0x7f1   : > { %2221 = vrot.lane.b32.xlu1 %v6888_v5, %s6574_s13 }
 0x7f5   : > { %2315 = vrot.lane.b32.xlu1 %v6870_v39, %s6574_s13 }
 0x82e   : > { %v2065_v8 = vpop.xlane.xlu1 %2064 }
 0x834   : > { %v2068_v25 = vpop.xlane.xlu1 %2067 }
 0x835   : > { %6234 = vrcp.f32 %v2068_v25 }
 0x836   : > { %6236 = vrcp.f32 %v2065_v8 }
 0x840   : > { %v7616_v30 = vpop.f32.mrb[72].mxu1 }
 0x841   : > { %v5674_v36 = vpop.f32.mrb[73].mxu1 }
 0x842   : > { %v7618_v16 = vpop.f32.mrb[74].mxu1 }
 0x843   : > { %v2508_v63 = vpack.c.bf16 %v7618_v16, %v7616_v30  ;;  %v5675_v28 = vpop.f32.mrb[75].mxu1  ;;  %v8418_v16 = vpack.c.bf16 %v7307_v60, %v7305_v48  ;;  %v8421_v48 = vld [vmem:[#allocation19_spill] sm:$0xff]  ;;  %v8422_v60 = vld [vmem:[#allocation22_spill] sm:$0xff] }
 0x848   : > { %v7622_v62 = vpop.f32.mrb[76].mxu1 }
 0x849   : > { %v5686_v46 = vpop.f32.mrb[77].mxu1 }
 0x84a   : > { %v7624_v45 = vpop.f32.mrb[78].mxu1 }
 0x84b   : > { %v2510_v23 = vpack.c.bf16 %v7624_v45, %v7622_v62  ;;  %v5687_v24 = vpop.f32.mrb[79].mxu1  ;;  %v8420_v62 = vpack.c.bf16 %v7313_v59, %v7311_v54  ;;  %v8423_v45 = vld [vmem:[#allocation21_spill] sm:$0xff]  ;;  %v8426_v54 = vld [vmem:[#allocation27_spill] sm:$0xff] }
 0x851   : > { %v2809_v40 = vpop.f32.mrb[80].mxu1 }
 0x852   : > { %v7633_v10 = vadd.f32 %v2809_v40, %v7628_v6  ;;  %v5728_v52 = vpop.f32.mrb[81].mxu1 }
 0x853   : > { %v2812_v19 = vpop.f32.mrb[82].mxu1 }
 0x854   : > { %v7636_v22 = vadd.f32 %v2812_v19, %v7630_v47  ;;  %v5729_v4 = vpop.f32.mrb[83].mxu1  ;;  %v3173_v57 = vsel %vm954_vm3, %v7633_v10, -inf }
 0x855   : > { %3174 = vmax.xlane.f32.xlu1 %v3173_v57 }
 0x856   : > { %v3176_v53 = vsel %vm954_vm3, %v7636_v22, -inf }
 0x857   : > { %3177 = vmax.xlane.f32.xlu0 %v3176_v53 }
 0x859   : > { %v2860_v14 = vpop.f32.mrb[84].mxu1 }
 0x85a   : > { %v7643_v32 = vadd.f32 %v2860_v14, %v7628_v6  ;;  %v5734_v20 = vpop.f32.mrb[85].mxu1  ;;  %v6229_v14 = vpop.eup %6228 }
 0x85b   : > { %v2863_v21 = vpop.f32.mrb[86].mxu1 }
 0x85c   : > { %v7646_v2 = vadd.f32 %v2863_v21, %v7630_v47  ;;  %v5735_v38 = vpop.f32.mrb[87].mxu1  ;;  %v3179_v12 = vsel %vm954_vm3, %v7643_v32, -inf }
 0x85d   : > { %3180 = vmax.xlane.f32.xlu1 %v3179_v12  ;;  %v2104_v38 = vmul.f32 %v6227_v27, %v7497_v15  ;;  %v6231_v15 = vpop.eup %6230 }
 0x85e   : > { %v3182_v49 = vsel %vm954_vm3, %v7646_v2, -inf  ;;  %v2108_v25 = vmul.f32 %v6231_v15, %v7507_v17 }
 0x861   : > { %3183 = vmax.xlane.f32.xlu1 %v3182_v49  ;;  %v2911_v36 = vpop.f32.mrb[88].mxu1 }
 0x862   : > { %v7653_v28 = vadd.f32 %v2911_v36, %v7628_v6  ;;  %v5740_v46 = vpop.f32.mrb[89].mxu1  ;;  %v2103_v36 = vmul.f32 %v6229_v14, %v7489_v29 }
 0x863   : > { %v2914_v24 = vpop.f32.mrb[90].mxu1 }
 0x864   : > { %v7656_v40 = vadd.f32 %v2914_v24, %v7630_v47  ;;  %v5741_v52 = vpop.f32.mrb[91].mxu1  ;;  %v3185_v19 = vsel %vm954_vm3, %v7653_v28, -inf }
 0x865   : > { %3186 = vmax.xlane.f32.xlu1 %v3185_v19  ;;  %v2119_v52 = vpack.c.bf16 %v2104_v38, %v2103_v36 }
 0x866   : > { %v3188_v4 = vsel %vm954_vm3, %v7656_v40, -inf }
 0x869   : > { %3189 = vmax.xlane.f32.xlu1 %v3188_v4  ;;  %v2962_v57 = vpop.f32.mrb[92].mxu1  ;;  %v2080_v53 = vpop.xlane.xlu1 %2079 }
 0x86a   : > { %v7663_v20 = vadd.f32 %v2962_v57, %v7628_v6  ;;  %v5746_v21 = vpop.f32.mrb[93].mxu1  ;;  %v6233_v4 = vpop.eup %6232  ;;  %6238 = vrcp.f32 %v2080_v53 }
 0x86b   : > { %v2965_v12 = vpop.f32.mrb[94].mxu1  ;;  %v6235_v36 = vpop.eup %6234 }
 0x86c   : > { %v7667_v49 = vadd.f32 %v2965_v12, %v7630_v47  ;;  %v5747_v61 = vpop.f32.mrb[95].mxu1  ;;  %v3191_v56 = vsel %vm954_vm3, %v7663_v20, -inf  ;;  %v2107_v12 = vmul.f32 %v6233_v4, %v7503_v43  ;;  %v2112_v53 = vmul.f32 %v6235_v36, %v7569_v58 }
 0x86d   : > { %3192 = vmax.xlane.f32.xlu0 %v3191_v56  ;;  %v2128_v46 = vpop.permute.xlu1 %2127  ;;  %v2077_v61 = vpop.xlane.xlu0 %2076 }
 0x86e   : > { %5641 = vmatpush3.bf16.msra.mxu0 %v2128_v46  ;;  %v3194_v24 = vsel %vm954_vm3, %v7667_v49, -inf  ;;  %v2121_v17 = vpack.c.bf16 %v2108_v25, %v2107_v12  ;;  %6240 = vrcp.f32 %v2077_v61 }
 0x86f   : > { %3195 = vmax.xlane.f32.xlu1 %v3194_v24  ;;  %5652 = vmatprep.subr.bf16.mxu0 %v8417_v26 }
 0x871   : > { %v3013_v19 = vpop.f32.mrb[96].mxu1  ;;  %5643 = vmatmul.mubr.msk.bf16.vlgmr.msra.gmra.mrb[48].mxu0 %vm954_vm3, %v2119_v52  ;;  %v2222_v27 = vpop.permute.xlu1 %2221 }
 0x872   : > { %v7677_v29 = vadd.f32 %v3013_v19, %v7628_v6  ;;  %v5752_v57 = vpop.f32.mrb[97].mxu1  ;;  %5653 = vmatpush3.bf16.msra.mxu0 %v2222_v27  ;;  %5654 = vmatprep.mubr.msk.bf16.mxu0 %vm6569_vm1, %v8417_v26  ;;  %v6237_v52 = vpop.eup %6236 }
 0x873   : > { %v3016_v14 = vpop.f32.mrb[98].mxu1  ;;  %5664 = vmatprep.subr.bf16.mxu0 %v8417_v26  ;;  %v2111_v25 = vmul.f32 %v6237_v52, %v7562_v34  ;;  %v2410_v58 = vpop.permute.xlu0 %2409 }
 0x874   : > { %v7684_v8 = vadd.f32 %v3016_v14, %v7630_v47  ;;  %v5753_v21 = vpop.f32.mrb[99].mxu1  ;;  %v3197_v38 = vsel %vm954_vm3, %v7677_v29, -inf }
 0x875   : > { %3198 = vmax.xlane.f32.xlu0 %v3197_v38  ;;  %v2316_v46 = vpop.permute.xlu1 %2315  ;;  %v2123_v21 = vpack.c.bf16 %v2112_v53, %v2111_v25  ;;  %v6239_v38 = vpop.eup %6238 }
 0x876   : > { %v3200_v56 = vsel %vm954_vm3, %v7684_v8, -inf  ;;  %v2116_v34 = vmul.f32 %v6239_v38, %v7592_v42  ;;  %v2512_v38 = vld [vmem:[#allocation7 + $0x4] sm:$0xf] }
 0x877   : > { %3201 = vmax.xlane.f32.xlu1 %v3200_v56 }
 0x878   : > { %v6241_v61 = vpop.eup %6240 }
 0x879   : > { %v3064_v24 = vpop.f32.mrb[100].mxu1  ;;  %5655 = vmatmul.mubr.msk.bf16.vlgmr.msra.gmra.mrb[52].mxu0 %vm954_vm3, %v2121_v17 }
 0x87a   : > { %v7693_v15 = vadd.f32 %v3064_v24, %v7628_v6  ;;  %5665 = vmatpush3.bf16.msra.mxu0 %v2316_v46  ;;  %v5758_v43 = vpop.f32.mrb[101].mxu1  ;;  %5666 = vmatprep.mubr.msk.bf16.mxu0 %vm6569_vm1, %v8417_v26 }
 0x87b   : > { %v3067_v19 = vpop.f32.mrb[102].mxu1  ;;  %5676 = vmatprep.subr.bf16.mxu0 %v8417_v26  ;;  %v2115_v43 = vmul.f32 %v6241_v61, %v7588_v50  ;;  %v7748_v61 = vld [vmem:[#allocation7] sm:$0xf] }
 0x87c   : > { %v7700_v27 = vadd.f32 %v3067_v19, %v7630_v47  ;;  %v5759_v4 = vpop.f32.mrb[103].mxu1  ;;  %v3203_v57 = vsel %vm954_vm3, %v7693_v15, -inf }
 0x87d   : > { %3204 = vmax.xlane.f32.xlu0 %v3203_v57  ;;  %v2125_v19 = vpack.c.bf16 %v2116_v34, %v2115_v43 }
 0x87e   : > { %v3206_v14 = vsel %vm954_vm3, %v7700_v27, -inf }
 0x87f   : > { %3207 = vmax.xlane.f32.xlu1 %v3206_v14 }
 0x881   : > { %v3115_v12 = vpop.f32.mrb[104].mxu1  ;;  %5667 = vmatmul.mubr.msk.bf16.vlgmr.msra.gmra.mrb[56].mxu0 %vm954_vm3, %v2123_v21 }
 0x882   : > { %v7709_v56 = vadd.f32 %v3115_v12, %v7628_v6  ;;  %5677 = vmatpush3.bf16.msra.mxu0 %v2410_v58  ;;  %v5764_v17 = vpop.f32.mrb[105].mxu1  ;;  %5678 = vmatprep.mubr.msk.bf16.mxu0 %vm6569_vm1, %v8417_v26  ;;  %v2539_v58 = vsel %vm2537_vm4, %v2512_v38, 0 }
 0x883   : > { %v3118_v36 = vpop.f32.mrb[106].mxu1  ;;  %6004 = vmatprep.subr.msk.bf16.mxu0 %vm2537_vm4, %v2512_v38 }
 0x884   : > { %v7715_v46 = vadd.f32 %v3118_v36, %v7630_v47  ;;  %v5765_v24 = vpop.f32.mrb[107].mxu1  ;;  %v3209_v52 = vsel %vm954_vm3, %v7709_v56, -inf }
 0x885   : > { %3210 = vmax.xlane.f32.xlu0 %v3209_v52 }
 0x886   : > { %v3212_v53 = vsel %vm954_vm3, %v7715_v46, -inf }
 0x887   : > { %3213 = vmax.xlane.f32.xlu1 %v3212_v53 }
 0x889   : > { %5679 = vmatmul.mubr.msk.bf16.vlgmr.msra.gmra.mrb[60].mxu0 %vm954_vm3, %v2125_v19 }
 0x88a   : > { %5689 = vmatpush3.bf16.msra.mxu0 %v2539_v58 }
 0x88b   : > { %6005 = vmatprep.subr.msk.bf16.mxu0 %vm2537_vm4, %v7748_v61 }
 0x898   : > { %3404 = vrot.lane.b32.xlu1 %v6864_v33, %s6577_s12 }
 0x89c   : > { %3451 = vrot.lane.b32.xlu1 %v6888_v5, %s6577_s12 }
 0x8a0   : > { %3498 = vrot.lane.b32.xlu1 %v6884_v1, %s6577_s12 }
 0x8a3   : > { %v3166_v42 = vpop.f32.mrb[108].mxu1 }
 0x8a4   : > { %v7730_v50 = vadd.f32 %v3166_v42, %v7628_v6  ;;  %v5770_v4 = vpop.f32.mrb[109].mxu1 }
 0x8a5   : > { %v3169_v57 = vpop.f32.mrb[110].mxu1 }
 0x8a6   : > { %v5771_v25 = vpop.f32.mrb[111].mxu1  ;;  %v3215_v14 = vsel %vm954_vm3, %v7730_v50, -inf  ;;  %v7737_v21 = vadd.f32 %v3169_v57, %v7630_v47 }
 0x8a7   : > { %3216 = vmax.xlane.f32.xlu0 %v3215_v14 }
 0x8a8   : > { %v3218_v6 = vsel %vm954_vm3, %v7737_v21, -inf }
 0x8bd   : > { %3357 = vrot.lane.b32.xlu0 %v6868_v37, %s6577_s12 }
 0x8c1   : > { %3545 = vrot.lane.b32.xlu0 %v6870_v39, %s6577_s12 }
 0x8c4   : > { %3219 = vmax.xlane.f32.xlu1 %v3218_v6 }
 0x8d5   : > { %3592 = vrot.lane.b32.xlu1 %v6866_v35, %s6577_s12 }
 0x8e2   : > { %v3175_v12 = vpop.xlane.xlu1 %3174 }
 0x8e3   : > { %v3221_v47 = vsub.f32 %v7633_v10, %v3175_v12 }
 0x8e4   : > { %v3178_v17 = vpop.xlane.xlu0 %3177 }
 0x8e5   : > { %v3237_v34 = vmul.f32 1.442695, %v3221_v47  ;;  %v3222_v36 = vsub.f32 %v7636_v22, %v3178_v17 }
 0x8e7   : > { %6242 = vpow2.f32 %v3237_v34  ;;  %v3239_v24 = vmul.f32 1.442695, %v3222_v36 }
 0x8e9   : > { %6244 = vpow2.f32 %v3239_v24 }
 0x8ea   : > { %v3181_v52 = vpop.xlane.xlu1 %3180 }
 0x8eb   : > { %v3223_v43 = vsub.f32 %v7643_v32, %v3181_v52 }
 0x8ed   : > { %v3241_v53 = vmul.f32 1.442695, %v3223_v43 }
 0x8ee   : > { %v3184_v19 = vpop.xlane.xlu1 %3183 }
 0x8ef   : > { %6246 = vpow2.f32 %v3241_v53  ;;  %v3224_v10 = vsub.f32 %v7646_v2, %v3184_v19 }
 0x8f1   : > { %v7755_v42 = vpop.eup %6242  ;;  %v3243_v4 = vmul.f32 1.442695, %v3224_v10 }
 0x8f2   : > { %v3187_v57 = vpop.xlane.xlu1 %3186  ;;  %v3269_v25 = vsel %vm954_vm3, %v7755_v42, 0.0 }
 0x8f3   : > { %6248 = vpow2.f32 %v3243_v4  ;;  %v3225_v22 = vsub.f32 %v7653_v28, %v3187_v57  ;;  %3270 = vadd.xlane.f32.xlu0 %v3269_v25  ;;  %v7760_v14 = vpop.eup %6244 }
 0x8f4   : > { %v3272_v2 = vsel %vm954_vm3, %v7760_v14, 0.0 }
 0x8f5   : > { %v3245_v6 = vmul.f32 1.442695, %v3225_v22 }
 0x8f6   : > { %v3190_v32 = vpop.xlane.xlu1 %3189 }
 0x8f7   : > { %6250 = vpow2.f32 %v3245_v6  ;;  %v3226_v38 = vsub.f32 %v7656_v40, %v3190_v32 }
 0x8f9   : > { %v7765_v58 = vpop.eup %6246  ;;  %v3247_v12 = vmul.f32 1.442695, %v3226_v38  ;;  %3273 = vadd.xlane.f32.xlu1 %v3272_v2 }
 0x8fa   : > { %v3193_v47 = vpop.xlane.xlu0 %3192  ;;  %v3275_v17 = vsel %vm954_vm3, %v7765_v58, 0.0 }
 0x8fb   : > { %6252 = vpow2.f32 %v3247_v12  ;;  %v3227_v28 = vsub.f32 %v7663_v20, %v3193_v47  ;;  %3276 = vadd.xlane.f32.xlu0 %v3275_v17 }
 0x8fc   : > { %v3196_v34 = vpop.xlane.xlu1 %3195 }
 0x8fd   : > { %v7770_v36 = vpop.eup %6248  ;;  %v3249_v24 = vmul.f32 1.442695, %v3227_v28  ;;  %v3228_v40 = vsub.f32 %v7667_v49, %v3196_v34 }
 0x8fe   : > { %v3278_v52 = vsel %vm954_vm3, %v7770_v36, 0.0 }
 0x8ff   : > { %6254 = vpow2.f32 %v3249_v24  ;;  %v3251_v43 = vmul.f32 1.442695, %v3228_v40  ;;  %3279 = vadd.xlane.f32.xlu1 %v3278_v52 }
 0x901   : > { %v7775_v53 = vpop.eup %6250  ;;  %6256 = vpow2.f32 %v3251_v43 }
 0x902   : > { %v3199_v19 = vpop.xlane.xlu0 %3198  ;;  %v3281_v20 = vsel %vm954_vm3, %v7775_v53, 0.0 }
 0x903   : > { %v3229_v10 = vsub.f32 %v7677_v29, %v3199_v19  ;;  %3282 = vadd.xlane.f32.xlu0 %v3281_v20 }
 0x904   : > { %v3202_v4 = vpop.xlane.xlu1 %3201 }
 0x905   : > { %v7780_v57 = vpop.eup %6252  ;;  %v3253_v49 = vmul.f32 1.442695, %v3229_v10  ;;  %v3230_v25 = vsub.f32 %v7684_v8, %v3202_v4 }
 0x906   : > { %v3284_v22 = vsel %vm954_vm3, %v7780_v57, 0.0 }
 0x907   : > { %6258 = vpow2.f32 %v3253_v49  ;;  %v3255_v6 = vmul.f32 1.442695, %v3230_v25  ;;  %3285 = vadd.xlane.f32.xlu1 %v3284_v22 }
 0x909   : > { %v7785_v32 = vpop.eup %6254  ;;  %6260 = vpow2.f32 %v3255_v6 }
 0x90a   : > { %v3205_v38 = vpop.xlane.xlu0 %3204  ;;  %v3287_v29 = vsel %vm954_vm3, %v7785_v32, 0.0 }
 0x90b   : > { %v7789_v2 = vpop.eup %6256  ;;  %v3231_v12 = vsub.f32 %v7693_v15, %v3205_v38  ;;  %3288 = vadd.xlane.f32.xlu0 %v3287_v29 }
 0x90c   : > { %v3208_v47 = vpop.xlane.xlu1 %3207  ;;  %v3290_v8 = vsel %vm954_vm3, %v7789_v2, 0.0 }
 0x90d   : > { %v3257_v17 = vmul.f32 1.442695, %v3231_v12  ;;  %v3232_v28 = vsub.f32 %v7700_v27, %v3208_v47  ;;  %3291 = vadd.xlane.f32.xlu1 %v3290_v8 }
 0x90f   : > { %6262 = vpow2.f32 %v3257_v17  ;;  %v3259_v34 = vmul.f32 1.442695, %v3232_v28 }
 0x911   : > { %v7795_v24 = vpop.eup %6258  ;;  %6264 = vpow2.f32 %v3259_v34 }
 0x912   : > { %v3211_v40 = vpop.xlane.xlu0 %3210  ;;  %v3293_v52 = vsel %vm954_vm3, %v7795_v24, 0.0 }
 0x913   : > { %v7799_v43 = vpop.eup %6260  ;;  %v3233_v15 = vsub.f32 %v7709_v56, %v3211_v40  ;;  %3294 = vadd.xlane.f32.xlu0 %v3293_v52 }
 0x914   : > { %v3214_v19 = vpop.xlane.xlu1 %3213  ;;  %v3296_v20 = vsel %vm954_vm3, %v7799_v43, 0.0 }
 0x915   : > { %v3261_v27 = vmul.f32 1.442695, %v3233_v15  ;;  %v3234_v10 = vsub.f32 %v7715_v46, %v3214_v19  ;;  %3297 = vadd.xlane.f32.xlu1 %v3296_v20 }
 0x917   : > { %6266 = vpow2.f32 %v3261_v27  ;;  %v3263_v4 = vmul.f32 1.442695, %v3234_v10  ;;  %v2663_v10 = vsel %vm2537_vm4, %v7748_v61, 0 }
 0x918   : > { %v3405_v49 = vpop.permute.xlu1 %3404 }
 0x919   : > { %v7805_v25 = vpop.eup %6262  ;;  %6268 = vpow2.f32 %v3263_v4  ;;  %5779 = vmatpush3.bf16.msra.mxu1 %v3405_v49 }
 0x91a   : > { %v3299_v22 = vsel %vm954_vm3, %v7805_v25, 0.0  ;;  %5790 = vmatprep.subr.bf16.mxu1 %v8417_v26 }
 0x91b   : > { %v7810_v56 = vpop.eup %6264  ;;  %3300 = vadd.xlane.f32.xlu0 %v3299_v22 }
 0x91c   : > { %v3302_v6 = vsel %vm954_vm3, %v7810_v56, 0.0  ;;  %v7827_v19 = vpop.permute.xlu1 %3451 }
 0x91d   : > { %3303 = vadd.xlane.f32.xlu1 %v3302_v6 }
 0x920   : > { %v7837_v4 = vpop.permute.xlu1 %3498 }
 0x921   : > { %v7814_v46 = vpop.eup %6266 }
 0x922   : > { %v3305_v38 = vsel %vm954_vm3, %v7814_v46, 0.0 }
 0x923   : > { %v7818_v29 = vpop.eup %6268  ;;  %3306 = vadd.xlane.f32.xlu0 %v3305_v38 }
 0x924   : > { %v3308_v12 = vsel %vm954_vm3, %v7818_v29, 0.0 }
 0x925   : > { %3309 = vadd.xlane.f32.xlu1 %v3308_v12 }
 0x934   : > { %v3217_v47 = vpop.xlane.xlu0 %3216 }
 0x935   : > { %v3235_v8 = vsub.f32 %v7730_v50, %v3217_v47 }
 0x937   : > { %v3265_v17 = vmul.f32 1.442695, %v3235_v8 }
 0x939   : > { %6270 = vpow2.f32 %v3265_v17 }
 0x943   : > { %v7823_v28 = vpop.eup %6270 }
 0x944   : > { %v2167_v34 = vpop.f32.mrb[48].mxu0  ;;  %v3311_v40 = vsel %vm954_vm3, %v7823_v28, 0.0 }
 0x945   : > { %v5644_v52 = vpop.f32.mrb[49].mxu0  ;;  %3312 = vadd.xlane.f32.xlu0 %v3311_v40 }
 0x946   : > { %v2170_v15 = vpop.f32.mrb[50].mxu0  ;;  %v8419_v52 = vpack.c.bf16 %v7190_v13, %v7184_v55  ;;  %v8424_v55 = vpack.c.bf16 %v8422_v60, %v8423_v45  ;;  %v8425_v13 = vld [vmem:[#allocation28_spill] sm:$0xff] }
 0x947   : > { %v2503_v20 = vpack.c.bf16 %v2170_v15, %v2167_v34  ;;  %v5645_v27 = vpop.f32.mrb[51].mxu0  ;;  %v8427_v59 = vpack.c.bf16 %v8425_v13, %v8426_v54  ;;  %v8429_v15 = vld [vmem:[#allocation17_spill] sm:$0xff] }
 0x948   : > { %v8431_v27 = vld [vmem:[#allocation24_spill] sm:$0xff] }
 0x949   : > { %5690 = vmatprep.mubr.msk.bf16.mxu0 %vm556_vm2, %v2503_v20  ;;  %v8430_v20 = vld [vmem:[#allocation16_spill] sm:$0xff] }
 0x94a   : > { %5691 = vmatmul.mubr.msk.bf16.vlgmr.msra.gmra.mrb[64].mxu0 %vm556_vm2, %v2504_v51 }
 0x94b   : > { %5707 = vmatpush3.bf16.msra.mxu0 %v2663_v10  ;;  %v8432_v10 = vld [vmem:[#allocation23_spill] sm:$0xff] }
 0x94c   : > { %v2261_v50 = vpop.f32.mrb[52].mxu0  ;;  %5772 = vmatprep.subr.bf16.mxu0 %v8417_v26 }
 0x94d   : > { %v5656_v49 = vpop.f32.mrb[53].mxu0 }
 0x94e   : > { %v2264_v22 = vpop.f32.mrb[54].mxu0  ;;  %v8434_v49 = vld [vmem:[#allocation15_spill] sm:$0xff] }
 0x94f   : > { %v2505_v6 = vpack.c.bf16 %v2264_v22, %v2261_v50  ;;  %v5657_v38 = vpop.f32.mrb[55].mxu0  ;;  %v8433_v50 = vpack.c.bf16 %v8431_v27, %v8432_v10  ;;  %v8435_v22 = vld [vmem:[#allocation30_spill] sm:$0xff] }
 0x951   : > { %v3220_v12 = vpop.xlane.xlu1 %3219  ;;  %5694 = vmatprep.mubr.msk.bf16.mxu0 %vm556_vm2, %v2505_v6  ;;  %v8436_v6 = vld [vmem:[#allocation29_spill] sm:$0xff] }
 0x952   : > { %v3236_v61 = vsub.f32 %v7737_v21, %v3220_v12  ;;  %5695 = vmatmul.mubr.msk.bf16.gmra.mrb[68].mxu0 %vm556_vm2, %v2506_v0  ;;  %v8437_v38 = vpack.c.bf16 %v8435_v22, %v8436_v6 }
 0x954   : > { %v3267_v31 = vmul.f32 1.442695, %v3236_v61  ;;  %v2355_v44 = vpop.f32.mrb[56].mxu0  ;;  %v8438_v61 = vld [vmem:[#allocation20_spill] sm:$0xff] }
 0x955   : > { %v5668_v51 = vpop.f32.mrb[57].mxu0 }
 0x956   : > { %6272 = vpow2.f32 %v3267_v31  ;;  %v2358_v47 = vpop.f32.mrb[58].mxu0  ;;  %v7914_v31 = vpop.permute.xlu1 %3592  ;;  %v8439_v51 = vld [vmem:[#allocation26_spill] sm:$0xff] }
 0x957   : > { %v2507_v8 = vpack.c.bf16 %v2358_v47, %v2355_v44  ;;  %v5669_v17 = vpop.f32.mrb[59].mxu0  ;;  %v8440_v47 = vld [vmem:[#allocation25_spill] sm:$0xff] }
 0x959   : > { %5698 = vmatprep.mubr.msk.bf16.mxu0 %vm556_vm2, %v2507_v8  ;;  %v8441_v8 = vpack.c.bf16 %v8439_v51, %v8440_v47 }
 0x95a   : > { %5699 = vmatmul.mubr.msk.bf16.gmra.mrb[72].mxu0 %vm556_vm2, %v2508_v63  ;;  %v3358_v63 = vpop.permute.xlu0 %3357 }
 0x95b   : > { %3639 = vrot.lane.b32.xlu0 %v6890_v7, %s6577_s12 }
 0x95c   : > { %v2449_v41 = vpop.f32.mrb[60].mxu0 }
 0x95d   : > { %v5680_v18 = vpop.f32.mrb[61].mxu0 }
 0x95e   : > { %v2452_v0 = vpop.f32.mrb[62].mxu0  ;;  %v3546_v12 = vpop.permute.xlu0 %3545 }
 0x95f   : > { %v2509_v21 = vpack.c.bf16 %v2452_v0, %v2449_v41  ;;  %v5681_v34 = vpop.f32.mrb[63].mxu0  ;;  %3888 = vrot.lane.b32.xlu0 %v6868_v37, %s6578_s7 }
 0x960   : > { %v7854_v40 = vpop.eup %6272 }
 0x961   : > { %5702 = vmatprep.mubr.msk.bf16.mxu0 %vm556_vm2, %v2509_v21  ;;  %v3314_v30 = vsel %vm954_vm3, %v7854_v40, 0.0 }
 0x962   : > { %3315 = vadd.xlane.f32.xlu1 %v3314_v30  ;;  %5703 = vmatmul.mubr.msk.bf16.gmra.mrb[76].mxu0 %vm556_vm2, %v2510_v23  ;;  %v8428_v23 = vld [vmem:[#allocation18_spill] sm:$0xff] }
 0x963   : > { %5708 = vmatprep.mubr.msk.bf16.mxu0 %vm556_vm2, %v8418_v16  ;;  %3939 = vrot.lane.b32.xlu0 %v6864_v33, %s6578_s7 }
 0x967   : > { %3990 = vrot.lane.b32.xlu0 %v6888_v5, %s6578_s7 }
 0x96a   : > { %5709 = vmatmul.mubr.msk.bf16.vlgmr.msra.gmra.mrb[64].mxu0 %vm556_vm2, %v8419_v52 }
 0x96b   : > { %5773 = vmatpush3.bf16.msra.mxu0 %v3358_v63  ;;  %5712 = vmatprep.mubr.msk.bf16.mxu0 %vm556_vm2, %v8420_v62 }
 0x96c   : > { %4041 = vrot.lane.b32.xlu0 %v6884_v1, %s6578_s7  ;;  %5784 = vmatprep.subr.bf16.mxu0 %v8417_v26 }
 0x970   : > { %4039 = vrot.lane.b32.xlu0 %v8421_v48, %s6579_s26 }
 0x972   : > { %5713 = vmatmul.mubr.msk.bf16.gmra.mrb[68].mxu0 %vm556_vm2, %v8424_v55 }
 0x973   : > { %3686 = vrot.lane.b32.xlu1 %v6886_v3, %s6577_s12  ;;  %5716 = vmatprep.mubr.msk.bf16.mxu0 %vm556_vm2, %v8427_v59  ;;  %s6581_s12 = smov [#allocation10]  }
 0x974   : > { %4090 = vrot.lane.b32.xlu0 %v8428_v23, %s6579_s26 }
 0x977   : > { %3886 = vrot.lane.b32.xlu1 %v8429_v15, %s6579_s26 }
 0x978   : > { %4141 = vrot.lane.b32.xlu0 %v8430_v20, %s6579_s26 }
 0x97a   : > { %5717 = vmatmul.mubr.msk.bf16.gmra.mrb[72].mxu0 %vm556_vm2, %v8433_v50 }
 0x97b   : > { %3937 = vrot.lane.b32.xlu1 %v8434_v49, %s6579_s26  ;;  %5720 = vmatprep.mubr.msk.bf16.mxu0 %vm556_vm2, %v8437_v38 }
 0x97c   : > { %4192 = vrot.lane.b32.xlu0 %v6902_v11, %s6579_s26 }
 0x97f   : > { %3988 = vrot.lane.b32.xlu1 %v8438_v61, %s6579_s26 }
 0x980   : > { %v3271_v44 = vpop.xlane.xlu0 %3270 }
 0x981   : > { %6274 = vrcp.f32 %v3271_v44 }
 0x982   : > { %5721 = vmatmul.mubr.msk.bf16.gmra.mrb[76].mxu0 %vm556_vm2, %v8441_v8  ;;  %v3742_v8 = vld [vmem:[#allocation7 + $0x8] sm:$0xf] }
 0x983   : > { %4092 = vrot.lane.b32.xlu1 %v6870_v39, %s6578_s7  ;;  %5774 = vmatprep.mubr.msk.bf16.mxu0 %vm6569_vm1, %v8417_v26 }
 0x986   : > { %v3274_v11 = vpop.xlane.xlu1 %3273 }
 0x987   : > { %6276 = vrcp.f32 %v3274_v11  ;;  %4143 = vrot.lane.b32.xlu1 %v6866_v35, %s6578_s7  ;;  %v3768_v11 = vsel %vm2537_vm4, %v3742_v8, 0 }
 0x988   : > { %v3277_v17 = vpop.xlane.xlu0 %3276 }
 0x989   : > { %6278 = vrcp.f32 %v3277_v17 }
 0x98b   : > { %4194 = vrot.lane.b32.xlu1 %v6890_v7, %s6578_s7  ;;  %v6275_v18 = vpop.eup %6274 }
 0x98c   : > { %v3280_v41 = vpop.xlane.xlu1 %3279  ;;  %v3333_v34 = vmul.f32 %v6275_v18, %v7755_v42 }
 0x98d   : > { %6280 = vrcp.f32 %v3280_v41 }
 0x98f   : > { %4245 = vrot.lane.b32.xlu1 %v6886_v3, %s6578_s7  ;;  %s6488_s7 = sshll.u32 %s6581_s12, 4  ;;  %s6489_s7 = int_to_ptr.vmem [resolvable:$false] %s6488_s7 }
 0x990   : > { %v3283_v0 = vpop.xlane.xlu0 %3282  ;;  %p6491_p12 = scmp.lt.s32.totalorder %s8309_s10, %s6489_s7 }
 0x991   : > { %v6277_v21 = vpop.eup %6276  ;;  %6282 = vrcp.f32 %v3283_v0 }
 0x992   : > { %v3334_v30 = vmul.f32 %v6277_v21, %v7760_v14 }
 0x993   : > { %4243 = vrot.lane.b32.xlu1 %v6894_v9, %s6579_s26  ;;  %v6279_v52 = vpop.eup %6278  ;;  %s6490_s26 = scalar_lea.vmem %s6489_s7, 4096 }
 0x994   : > { %v3349_v16 = vpack.c.bf16 %v3334_v30, %v3333_v34  ;;  %v3286_v63 = vpop.xlane.xlu1 %3285  ;;  %v3335_v42 = vmul.f32 %v6279_v52, %v7765_v58  ;;  %p6492_p1 = scmp.lt.s32.totalorder %s6490_s26, %s6484_s20 }
 0x995   : > { %6284 = vrcp.f32 %v3286_v63 }
 0x996   : > { %5775 = vmatmul.mubr.msk.bf16.vlgmr.msra.gmra.mrb[80].mxu0 %vm954_vm3, %v3349_v16  ;;  %p6493_p2 = por %p6492_p1, %p6491_p12 }
 0x997   : > { %v6281_v62 = vpop.eup %6280  ;;  %5785 = vmatpush3.bf16.msra.mxu0 %v7827_v19  ;;  %5786 = vmatprep.mubr.msk.bf16.mxu0 %vm6569_vm1, %v8417_v26 }
 0x998   : > { %v3336_v14 = vmul.f32 %v6281_v62, %v7770_v36  ;;  %v3289_v48 = vpop.xlane.xlu0 %3288  ;;  %5796 = vmatprep.subr.bf16.mxu0 %v8417_v26  ;;  %p6494_p4 = pnand %p6493_p2, %p6487_p7 }
 0x999   : > { %6286 = vrcp.f32 %v3289_v48 }
 0x99a   : > { %v3292_v9 = vpop.xlane.xlu1 %3291  ;;  %v3350_v60 = vpack.c.bf16 %v3336_v14, %v3335_v42 }
 0x99b   : > { %6288 = vrcp.f32 %v3292_v9  ;;  %v6283_v45 = vpop.eup %6282 }
 0x99c   : > { %5781 = vmatmul.mubr.msk.bf16.vlgmr.msra.gmra.mrb[112].mxu1 %vm954_vm3, %v3350_v60  ;;  %v3337_v36 = vmul.f32 %v6283_v45, %v7775_v53 }
 0x99d   : > { %5791 = vmatpush3.bf16.msra.mxu1 %v7837_v4  ;;  %5792 = vmatprep.mubr.msk.bf16.mxu1 %vm6569_vm1, %v8417_v26 }
 0x99e   : > { %5802 = vmatprep.subr.bf16.mxu1 %v8417_v26 }
 0x99f   : > { %v6285_v58 = vpop.eup %6284 }
 0x9a0   : > { %v3338_v19 = vmul.f32 %v6285_v58, %v7780_v57  ;;  %v3295_v55 = vpop.xlane.xlu0 %3294 }
 0x9a1   : > { %6290 = vrcp.f32 %v3295_v55 }
 0x9a2   : > { %v3298_v13 = vpop.xlane.xlu1 %3297  ;;  %v3351_v54 = vpack.c.bf16 %v3338_v19, %v3337_v36 }
 0x9a3   : > { %v6287_v59 = vpop.eup %6286  ;;  %6292 = vrcp.f32 %v3298_v13 }
 0x9a4   : > { %5787 = vmatmul.mubr.msk.bf16.vlgmr.msra.gmra.mrb[84].mxu0 %vm954_vm3, %v3351_v54  ;;  %v3339_v4 = vmul.f32 %v6287_v59, %v7785_v32 }
 0x9a5   : > { %v6289_v23 = vpop.eup %6288  ;;  %5797 = vmatpush3.bf16.msra.mxu0 %v3546_v12  ;;  %5798 = vmatprep.mubr.msk.bf16.mxu0 %vm6569_vm1, %v8417_v26 }
 0x9a6   : > { %v3340_v15 = vmul.f32 %v6289_v23, %v7789_v2  ;;  %5808 = vmatprep.subr.bf16.mxu0 %v8417_v26 }
 0x9a8   : > { %v3301_v53 = vpop.xlane.xlu0 %3300  ;;  %v3352_v57 = vpack.c.bf16 %v3340_v15, %v3339_v4 }
 0x9a9   : > { %6294 = vrcp.f32 %v3301_v53 }
 0x9aa   : > { %5793 = vmatmul.mubr.msk.bf16.vlgmr.msra.gmra.mrb[116].mxu1 %vm954_vm3, %v3352_v57  ;;  %v3304_v20 = vpop.xlane.xlu1 %3303 }
 0x9ab   : > { %v6291_v27 = vpop.eup %6290  ;;  %5803 = vmatpush3.bf16.msra.mxu1 %v7914_v31  ;;  %6296 = vrcp.f32 %v3304_v20  ;;  %5804 = vmatprep.mubr.msk.bf16.mxu1 %vm6569_vm1, %v8417_v26 }
 0x9ac   : > { %5814 = vmatprep.subr.bf16.mxu1 %v8417_v26  ;;  %v3341_v2 = vmul.f32 %v6291_v27, %v7795_v24 }
 0x9ad   : > { %v6293_v32 = vpop.eup %6292 }
 0x9ae   : > { %v3342_v10 = vmul.f32 %v6293_v32, %v7799_v43 }
 0x9b0   : > { %v3353_v50 = vpack.c.bf16 %v3342_v10, %v3341_v2  ;;  %v3307_v43 = vpop.xlane.xlu0 %3306 }
 0x9b2   : > { %5799 = vmatmul.mubr.msk.bf16.vlgmr.msra.gmra.mrb[88].mxu0 %vm954_vm3, %v3353_v50  ;;  %v3310_v24 = vpop.xlane.xlu1 %3309 }
 0x9b3   : > { %v6295_v49 = vpop.eup %6294  ;;  %5810 = vmatprep.mubr.msk.bf16.mxu0 %vm6569_vm1, %v8417_v26  ;;  %6298 = vrcp.f32 %v3310_v24 }
 0x9b4   : > { %v3343_v6 = vmul.f32 %v6295_v49, %v7805_v25  ;;  %6300 = vrcp.f32 %v3307_v43 }
 0x9b5   : > { %v6297_v22 = vpop.eup %6296 }
 0x9b6   : > { %v3344_v38 = vmul.f32 %v6297_v22, %v7810_v56 }
 0x9b8   : > { %v3354_v12 = vpack.c.bf16 %v3344_v38, %v3343_v6 }
 0x9ba   : > { %5805 = vmatmul.mubr.msk.bf16.vlgmr.msra.gmra.mrb[120].mxu1 %vm954_vm3, %v3354_v12 }
 0x9bb   : > { %5816 = vmatprep.mubr.msk.bf16.mxu1 %vm6569_vm1, %v8417_v26 }
 0x9bd   : > { %v6299_v61 = vpop.eup %6298 }
 0x9be   : > { %v6301_v44 = vpop.eup %6300  ;;  %v3346_v51 = vmul.f32 %v6299_v61, %v7818_v29 }
 0x9bf   : > { %v3345_v47 = vmul.f32 %v6301_v44, %v7814_v46 }
 0x9c1   : > { %v3355_v56 = vpack.c.bf16 %v3346_v51, %v3345_v47 }
 0x9d2   : > { %v3313_v31 = vpop.xlane.xlu0 %3312 }
 0x9d3   : > { %6302 = vrcp.f32 %v3313_v31 }
 0x9d6   : > { %v3640_v25 = vpop.permute.xlu0 %3639 }
 0x9d7   : > { %5809 = vmatpush3.bf16.msra.mxu0 %v3640_v25 }
 0x9d8   : > { %6006 = vmatprep.subr.msk.bf16.mxu0 %vm2537_vm4, %v3742_v8 }
 0x9da   : > { %5811 = vmatmul.mubr.msk.bf16.vlgmr.msra.gmra.mrb[92].mxu0 %vm954_vm3, %v3355_v56  ;;  %v3889_v21 = vpop.permute.xlu0 %3888 }
 0x9db   : > { %5821 = vmatpush3.bf16.msra.mxu0 %v3768_v11  ;;  %v3894_v30 = vsel %vm556_vm2, %v3889_v21, 0 }
 0x9dc   : > { %5862 = vmatprep.subr.bf16.mxu0 %v8417_v26 }
 0x9dd   : > { %v6303_v46 = vpop.eup %6302 }
 0x9de   : > { %v3347_v18 = vmul.f32 %v6303_v46, %v7823_v28  ;;  %v3940_v63 = vpop.permute.xlu0 %3939 }
 0x9df   : > { %v3945_v62 = vsel %vm556_vm2, %v3940_v63, 0 }
 0x9e2   : > { %v3991_v28 = vpop.permute.xlu0 %3990 }
 0x9e3   : > { %v3996_v42 = vsel %vm556_vm2, %v3991_v28, 0 }
 0x9e6   : > { %v4042_v48 = vpop.permute.xlu0 %4041 }
 0x9e7   : > { %v4047_v9 = vsel %vm556_vm2, %v4042_v48, 0 }
 0x9ea   : > { %v4040_v45 = vpop.permute.xlu0 %4039 }
 0x9ee   : > { %v8002_v19 = vpop.permute.xlu0 %4090 }
 0x9ef   : > { %v3316_v17 = vpop.xlane.xlu1 %3315 }
 0x9f0   : > { %6304 = vrcp.f32 %v3316_v17 }
 0x9f2   : > { %v4142_v13 = vpop.permute.xlu0 %4141 }
 0x9f3   : > { %v3687_v41 = vpop.permute.xlu1 %3686 }
 0x9f4   : > { %5815 = vmatpush3.bf16.msra.mxu1 %v3687_v41 }
 0x9f5   : > { %5838 = vmatprep.subr.bf16.mxu1 %v8417_v26 }
 0x9f7   : > { %v3887_v16 = vpop.permute.xlu1 %3886 }
 0x9fa   : > { %v6305_v29 = vpop.eup %6304 }
 0x9fb   : > { %v3348_v0 = vmul.f32 %v6305_v29, %v7854_v40  ;;  %v3938_v52 = vpop.permute.xlu1 %3937 }
 0x9fd   : > { %v3356_v34 = vpack.c.bf16 %v3348_v0, %v3347_v18 }
 0x9ff   : > { %5817 = vmatmul.mubr.msk.bf16.vlgmr.msra.gmra.mrb[124].mxu1 %vm954_vm3, %v3356_v34  ;;  %v3989_v40 = vpop.permute.xlu1 %3988 }
 0xa00   : > { %5839 = vmatpush3.bf16.xpose.msra.mxu1 %v3894_v30  ;;  %5840 = vmatprep.mubr.msk.bf16.mxu1 %vm6569_vm1, %v8417_v26 }
 0xa01   : > { %5844 = vmatprep.subr.bf16.mxu1 %v8417_v26 }
 0xa03   : > { %v4093_v14 = vpop.permute.xlu1 %4092 }
 0xa04   : > { %v4098_v50 = vsel %vm556_vm2, %v4093_v14, 0  ;;  %v8029_v14 = vld [vmem:[#allocation8 + $0x38] sm:$0xff] }
 0xa07   : > { %5841 = vmatmul.mubr.msk.bf16.vlgmr.msra.gmra.mrb[128].mxu1 %vm556_vm2, %v3887_v16  ;;  %v4144_v60 = vpop.permute.xlu1 %4143 }
 0xa08   : > { %5845 = vmatpush3.bf16.xpose.msra.mxu1 %v3945_v62  ;;  %5846 = vmatprep.mubr.msk.bf16.mxu1 %vm6569_vm1, %v8417_v26  ;;  %v4149_v36 = vsel %vm556_vm2, %v4144_v60, 0 }
 0xa09   : > { %5850 = vmatprep.subr.bf16.mxu1 %v8417_v26 }
 0xa0b   : > { %v7998_v58 = vpop.permute.xlu1 %4194 }
 0xa0f   : > { %5847 = vmatmul.mubr.msk.bf16.vlgmr.msra.gmra.mrb[132].mxu1 %vm556_vm2, %v3938_v52  ;;  %v4246_v55 = vpop.permute.xlu1 %4245 }
 0xa10   : > { %5851 = vmatpush3.bf16.xpose.msra.mxu1 %v3996_v42  ;;  %5852 = vmatprep.mubr.msk.bf16.mxu1 %vm6569_vm1, %v8417_v26  ;;  %v4251_v54 = vsel %vm556_vm2, %v4246_v55, 0 }
 0xa11   : > { %5856 = vmatprep.subr.bf16.mxu1 %v8417_v26 }
 0xa13   : > { %v4244_v59 = vpop.permute.xlu1 %4243 }
 0xa17   : > { %5853 = vmatmul.mubr.msk.bf16.vlgmr.msra.gmra.mrb[136].mxu1 %vm556_vm2, %v3989_v40  ;;  %v8025_v40 = vld [vmem:[#allocation8 + $0x30] sm:$0xff] }
 0xa18   : > { %5857 = vmatpush3.bf16.xpose.msra.mxu1 %v4047_v9  ;;  %5858 = vmatprep.mubr.msk.bf16.mxu1 %vm6569_vm1, %v8417_v26 }
 0xa19   : > { %5868 = vmatprep.subr.bf16.mxu1 %v8417_v26 }
 0xa1f   : > { %5859 = vmatmul.mubr.msk.bf16.vlgmr.msra.gmra.mrb[140].mxu1 %vm556_vm2, %v4040_v45 }
 0xa20   : > { %5869 = vmatpush3.bf16.xpose.msra.mxu1 %v4149_v36  ;;  %5870 = vmatprep.mubr.msk.bf16.mxu1 %vm6569_vm1, %v8417_v26 }
 0xa21   : > { %5880 = vmatprep.subr.bf16.mxu1 %v8417_v26 }
 0xa27   : > { %5871 = vmatmul.mubr.msk.bf16.vlgmr.msra.gmra.mrb[144].mxu1 %vm556_vm2, %v4142_v13  ;;  %v4200_v13 = vsel %vm556_vm2, %v7998_v58, 0 }
 0xa28   : > { %5881 = vmatpush3.bf16.xpose.msra.mxu1 %v4251_v54  ;;  %5882 = vmatprep.mubr.msk.bf16.mxu1 %vm6569_vm1, %v8417_v26 }
 0xa29   : > { %5892 = vmatprep.subr.bf16.mxu1 %v8417_v26 }
 0xa2f   : > { %5883 = vmatmul.mubr.msk.bf16.vlgmr.msra.gmra.mrb[148].mxu1 %vm556_vm2, %v4244_v59 }
 0xa30   : > { %5894 = vmatprep.mubr.msk.bf16.mxu1 %vm6569_vm1, %v8417_v26 }
 0xa69   : > { %v3397_v23 = vpop.f32.mrb[80].mxu0 }
 0xa6a   : > { %v5776_v4 = vpop.f32.mrb[81].mxu0 }
 0xa6b   : > { %v3400_v15 = vpop.f32.mrb[82].mxu0 }
 0xa6c   : > { %v3733_v53 = vpack.c.bf16 %v3400_v15, %v3397_v23  ;;  %v5777_v57 = vpop.f32.mrb[83].mxu0 }
 0xa6d   : > { %v4193_v57 = vpop.permute.xlu0 %4192 }
 0xa6e   : > { %5822 = vmatprep.mubr.msk.bf16.mxu0 %vm556_vm2, %v3733_v53 }
 0xa6f   : > { %v3444_v20 = vpop.f32.mrb[112].mxu1 }
 0xa70   : > { %v5782_v27 = vpop.f32.mrb[113].mxu1 }
 0xa71   : > { %v3447_v32 = vpop.f32.mrb[114].mxu1 }
 0xa72   : > { %v3734_v2 = vpack.c.bf16 %v3447_v32, %v3444_v20  ;;  %v5783_v10 = vpop.f32.mrb[115].mxu1 }
 0xa74   : > { %5823 = vmatmul.mubr.msk.bf16.vlgmr.msra.gmra.mrb[64].mxu0 %vm556_vm2, %v3734_v2 }
 0xa75   : > { %5863 = vmatpush3.bf16.xpose.msra.mxu0 %v4098_v50 }
 0xa76   : > { %5874 = vmatprep.subr.bf16.mxu0 %v8417_v26 }
 0xa77   : > { %v3491_v49 = vpop.f32.mrb[84].mxu0 }
 0xa78   : > { %v5788_v22 = vpop.f32.mrb[85].mxu0 }
 0xa79   : > { %v3494_v6 = vpop.f32.mrb[86].mxu0 }
 0xa7a   : > { %v3735_v38 = vpack.c.bf16 %v3494_v6, %v3491_v49  ;;  %v5789_v12 = vpop.f32.mrb[87].mxu0 }
 0xa7c   : > { %5826 = vmatprep.mubr.msk.bf16.mxu0 %vm556_vm2, %v3735_v38 }
 0xa7d   : > { %v3538_v24 = vpop.f32.mrb[116].mxu1 }
 0xa7e   : > { %v5794_v43 = vpop.f32.mrb[117].mxu1 }
 0xa7f   : > { %v3541_v61 = vpop.f32.mrb[118].mxu1 }
 0xa80   : > { %v3736_v31 = vpack.c.bf16 %v3541_v61, %v3538_v24  ;;  %v5795_v44 = vpop.f32.mrb[119].mxu1 }
 0xa82   : > { %5827 = vmatmul.mubr.msk.bf16.gmra.mrb[68].mxu0 %vm556_vm2, %v3736_v31 }
 0xa85   : > { %v3585_v51 = vpop.f32.mrb[88].mxu0 }
 0xa86   : > { %v5800_v47 = vpop.f32.mrb[89].mxu0 }
 0xa87   : > { %v3588_v25 = vpop.f32.mrb[90].mxu0 }
 0xa88   : > { %v3737_v56 = vpack.c.bf16 %v3588_v25, %v3585_v51  ;;  %v5801_v8 = vpop.f32.mrb[91].mxu0 }
 0xa8a   : > { %5830 = vmatprep.mubr.msk.bf16.mxu0 %vm556_vm2, %v3737_v56 }
 0xa8d   : > { %v3632_v11 = vpop.f32.mrb[120].mxu1 }
 0xa8e   : > { %v5806_v17 = vpop.f32.mrb[121].mxu1 }
 0xa8f   : > { %v3635_v41 = vpop.f32.mrb[122].mxu1 }
 0xa90   : > { %v3738_v46 = vpack.c.bf16 %v3635_v41, %v3632_v11  ;;  %v5807_v29 = vpop.f32.mrb[123].mxu1 }
 0xa92   : > { %5831 = vmatmul.mubr.msk.bf16.gmra.mrb[72].mxu0 %vm556_vm2, %v3738_v46 }
 0xaad   : > { %v3679_v18 = vpop.f32.mrb[92].mxu0 }
 0xaae   : > { %v5812_v0 = vpop.f32.mrb[93].mxu0 }
 0xaaf   : > { %v3682_v21 = vpop.f32.mrb[94].mxu0 }
 0xab0   : > { %v3739_v34 = vpack.c.bf16 %v3682_v21, %v3679_v18  ;;  %v5813_v30 = vpop.f32.mrb[95].mxu0 }
 0xab2   : > { %5834 = vmatprep.mubr.msk.bf16.mxu0 %vm556_vm2, %v3739_v34 }
 0xad2   : > { %v3726_v16 = vpop.f32.mrb[124].mxu1 }
 0xad3   : > { %v5818_v63 = vpop.f32.mrb[125].mxu1 }
 0xad4   : > { %v3729_v52 = vpop.f32.mrb[126].mxu1 }
 0xad5   : > { %v3740_v62 = vpack.c.bf16 %v3729_v52, %v3726_v16  ;;  %v5819_v28 = vpop.f32.mrb[127].mxu1 }
 0xad7   : > { %5835 = vmatmul.mubr.msk.bf16.gmra.mrb[76].mxu0 %vm556_vm2, %v3740_v62 }
 0xad8   : > { %5864 = vmatprep.mubr.msk.bf16.mxu0 %vm6569_vm1, %v8417_v26 }
 0xada   : > { %v3930_v42 = vpop.f32.mrb[128].mxu1 }
 0xadb   : > { %v8032_v48 = vadd.f32 %v3930_v42, %v8025_v40  ;;  %v5842_v9 = vpop.f32.mrb[129].mxu1 }
 0xadc   : > { %v3933_v60 = vpop.f32.mrb[130].mxu1 }
 0xadd   : > { %v8035_v45 = vadd.f32 %v3933_v60, %v8029_v14  ;;  %v5843_v36 = vpop.f32.mrb[131].mxu1  ;;  %v4294_v55 = vsel %vm954_vm3, %v8032_v48, -inf }
 0xade   : > { %4295 = vmax.xlane.f32.xlu0 %v4294_v55 }
 0xadf   : > { %5865 = vmatmul.mubr.msk.bf16.vlgmr.msra.gmra.mrb[96].mxu0 %vm556_vm2, %v8002_v19  ;;  %v4297_v54 = vsel %vm954_vm3, %v8035_v45, -inf }
 0xae0   : > { %5875 = vmatpush3.bf16.xpose.msra.mxu0 %v4200_v13  ;;  %4298 = vmax.xlane.f32.xlu1 %v4297_v54 }
 0xae1   : > { %5876 = vmatprep.mubr.msk.bf16.mxu0 %vm6569_vm1, %v8417_v26  ;;  %5886 = vmatprep.subr.bf16.mxu0 %v8417_v26 }
 0xae2   : > { %v3981_v59 = vpop.f32.mrb[132].mxu1 }
 0xae3   : > { %v8049_v23 = vadd.f32 %v3981_v59, %v8025_v40  ;;  %v5848_v4 = vpop.f32.mrb[133].mxu1 }
 0xae4   : > { %v3984_v15 = vpop.f32.mrb[134].mxu1 }
 0xae5   : > { %v3985_v58 = vadd.f32 %v3984_v15, %v8029_v14  ;;  %v5849_v53 = vpop.f32.mrb[135].mxu1  ;;  %v4300_v19 = vsel %vm954_vm3, %v8049_v23, -inf }
 0xae6   : > { %4301 = vmax.xlane.f32.xlu0 %v4300_v19 }
 0xae7   : > { %5877 = vmatmul.mubr.msk.bf16.vlgmr.msra.gmra.mrb[100].mxu0 %vm556_vm2, %v4193_v57  ;;  %v4303_v20 = vsel %vm954_vm3, %v3985_v58, -inf }
 0xae8   : > { %5888 = vmatprep.mubr.msk.bf16.mxu0 %vm6569_vm1, %v8417_v26 }
 0xaea   : > { %4304 = vmax.xlane.f32.xlu0 %v4303_v20  ;;  %v4032_v27 = vpop.f32.mrb[136].mxu1 }
 0xaeb   : > { %v8059_v32 = vadd.f32 %v4032_v27, %v8025_v40  ;;  %v5854_v2 = vpop.f32.mrb[137].mxu1 }
 0xaec   : > { %v4035_v10 = vpop.f32.mrb[138].mxu1 }
 0xaed   : > { %v4036_v50 = vadd.f32 %v4035_v10, %v8029_v14  ;;  %v5855_v49 = vpop.f32.mrb[139].mxu1  ;;  %v4306_v22 = vsel %vm954_vm3, %v8059_v32, -inf }
 0xaee   : > { %4307 = vmax.xlane.f32.xlu0 %v4306_v22 }
 0xaef   : > { %v4309_v6 = vsel %vm954_vm3, %v4036_v50, -inf }
 0xaf0   : > { %4310 = vmax.xlane.f32.xlu1 %v4309_v6 }
 0xaf2   : > { %v4083_v38 = vpop.f32.mrb[140].mxu1 }
 0xaf3   : > { %v8066_v12 = vadd.f32 %v4083_v38, %v8025_v40  ;;  %v5860_v24 = vpop.f32.mrb[141].mxu1 }
 0xaf4   : > { %v4086_v43 = vpop.f32.mrb[142].mxu1 }
 0xaf5   : > { %v8069_v61 = vadd.f32 %v4086_v43, %v8029_v14  ;;  %v5861_v31 = vpop.f32.mrb[143].mxu1  ;;  %v4312_v44 = vsel %vm954_vm3, %v8066_v12, -inf }
 0xaf6   : > { %4313 = vmax.xlane.f32.xlu0 %v4312_v44 }
 0xaf7   : > { %v4315_v51 = vsel %vm954_vm3, %v8069_v61, -inf }
 0xaf8   : > { %4316 = vmax.xlane.f32.xlu1 %v4315_v51 }
 0xafa   : > { %v4185_v47 = vpop.f32.mrb[144].mxu1 }
 0xafb   : > { %v8076_v25 = vadd.f32 %v4185_v47, %v8025_v40  ;;  %v5872_v56 = vpop.f32.mrb[145].mxu1 }
 0xafc   : > { %v4188_v8 = vpop.f32.mrb[146].mxu1 }
 0xafd   : > { %v8079_v11 = vadd.f32 %v4188_v8, %v8029_v14  ;;  %v5873_v17 = vpop.f32.mrb[147].mxu1  ;;  %v4324_v41 = vsel %vm954_vm3, %v8076_v25, -inf }
 0xafe   : > { %4325 = vmax.xlane.f32.xlu0 %v4324_v41 }
 0xaff   : > { %v4327_v46 = vsel %vm954_vm3, %v8079_v11, -inf }
 0xb00   : > { %4328 = vmax.xlane.f32.xlu1 %v4327_v46 }
 0xb02   : > { %v4287_v29 = vpop.f32.mrb[148].mxu1 }
 0xb03   : > { %v5884_v18 = vpop.f32.mrb[149].mxu1  ;;  %v8098_v27 = vadd.f32 %v4287_v29, %v8025_v40 }
 0xb04   : > { %v4290_v0 = vpop.f32.mrb[150].mxu1 }
 0xb05   : > { %v8086_v21 = vadd.f32 %v4290_v0, %v8029_v14  ;;  %v5885_v34 = vpop.f32.mrb[151].mxu1  ;;  %v4336_v31 = vsel %vm954_vm3, %v8098_v27, -inf }
 0xb07   : > { %v4339_v30 = vsel %vm954_vm3, %v8086_v21, -inf }
 0xb08   : > { %4340 = vmax.xlane.f32.xlu1 %v4339_v30 }
 0xb6b   : > { %v4296_v16 = vpop.xlane.xlu0 %4295 }
 0xb6c   : > { %v4342_v36 = vsub.f32 %v8032_v48, %v4296_v16 }
 0xb6d   : > { %v4299_v52 = vpop.xlane.xlu1 %4298 }
 0xb6e   : > { %v4343_v62 = vsub.f32 %v8035_v45, %v4299_v52  ;;  %v4358_v54 = vmul.f32 1.442695, %v4342_v36 }
 0xb70   : > { %v4360_v42 = vmul.f32 1.442695, %v4343_v62 }
 0xb72   : > { %6306 = vpow2.f32 %v4360_v42 }
 0xb73   : > { %v4302_v63 = vpop.xlane.xlu0 %4301 }
 0xb74   : > { %v4344_v59 = vsub.f32 %v8049_v23, %v4302_v63 }
 0xb77   : > { %v4305_v28 = vpop.xlane.xlu0 %4304 }
 0xb78   : > { %v4345_v9 = vsub.f32 %v3985_v58, %v4305_v28  ;;  %v4362_v58 = vmul.f32 1.442695, %v4344_v59 }
 0xb7a   : > { %v4364_v55 = vmul.f32 1.442695, %v4345_v9 }
 0xb7b   : > { %v4308_v4 = vpop.xlane.xlu0 %4307 }
 0xb7c   : > { %6308 = vpow2.f32 %v4364_v55  ;;  %v4346_v20 = vsub.f32 %v8059_v32, %v4308_v4  ;;  %v8108_v6 = vpop.eup %6306 }
 0xb7d   : > { %v4311_v60 = vpop.xlane.xlu1 %4310  ;;  %6310 = vpow2.f32 %v4358_v54  ;;  %v4393_v17 = vsel %vm954_vm3, %v8108_v6, 0.0 }
 0xb7e   : > { %v4347_v13 = vsub.f32 %v4036_v50, %v4311_v60  ;;  %v4366_v38 = vmul.f32 1.442695, %v4346_v20 }
 0xb80   : > { %v4368_v15 = vmul.f32 1.442695, %v4347_v13 }
 0xb82   : > { %6312 = vpow2.f32 %v4368_v15 }
 0xb83   : > { %v4314_v2 = vpop.xlane.xlu0 %4313  ;;  %6314 = vpow2.f32 %v4362_v58 }
 0xb84   : > { %v4348_v24 = vsub.f32 %v8066_v12, %v4314_v2  ;;  %6316 = vpow2.f32 %v4366_v38 }
 0xb85   : > { %v4317_v19 = vpop.xlane.xlu1 %4316 }
 0xb86   : > { %v4349_v49 = vsub.f32 %v8069_v61, %v4317_v19  ;;  %v8119_v41 = vpop.eup %6308  ;;  %v4370_v12 = vmul.f32 1.442695, %v4348_v24 }
 0xb87   : > { %v8124_v0 = vpop.eup %6310  ;;  %v4399_v30 = vsel %vm954_vm3, %v8119_v41, 0.0 }
 0xb88   : > { %v4372_v44 = vmul.f32 1.442695, %v4349_v49  ;;  %v4390_v63 = vsel %vm954_vm3, %v8124_v0, 0.0 }
 0xb8a   : > { %6318 = vpow2.f32 %v4372_v44 }
 0xb8b   : > { %v4326_v43 = vpop.xlane.xlu0 %4325  ;;  %6320 = vpow2.f32 %v4370_v12 }
 0xb8c   : > { %v4352_v46 = vsub.f32 %v8076_v25, %v4326_v43  ;;  %v8129_v16 = vpop.eup %6312 }
 0xb8d   : > { %v4329_v22 = vpop.xlane.xlu1 %4328  ;;  %v8133_v52 = vpop.eup %6314 }
 0xb8e   : > { %v4353_v51 = vsub.f32 %v8079_v11, %v4329_v22  ;;  %v4378_v25 = vmul.f32 1.442695, %v4352_v46  ;;  %v4396_v42 = vsel %vm954_vm3, %v8133_v52, 0.0  ;;  %v8140_v9 = vpop.eup %6316 }
 0xb94   : > { %v8143_v36 = vpop.eup %6318 }
 0xb95   : > { %v4341_v47 = vpop.xlane.xlu1 %4340  ;;  %v8147_v55 = vpop.eup %6320  ;;  %v4411_v13 = vsel %vm954_vm3, %v8143_v36, 0.0 }
 0xb96   : > { %v4357_v34 = vsub.f32 %v8086_v21, %v4341_v47  ;;  %v4405_v21 = vsel %vm954_vm3, %v8129_v16, 0.0  ;;  %v4408_v59 = vsel %vm954_vm3, %v8147_v55, 0.0 }
 0xb98   : > { %v4388_v62 = vmul.f32 1.442695, %v4357_v34 }
 0xbb2   : > { %v4134_v53 = vpop.f32.mrb[96].mxu0 }
 0xbb3   : > { %v8094_v57 = vadd.f32 %v4134_v53, %v8025_v40  ;;  %v5866_v45 = vpop.f32.mrb[97].mxu0 }
 0xbb4   : > { %v4137_v48 = vpop.f32.mrb[98].mxu0 }
 0xbb5   : > { %v8101_v23 = vadd.f32 %v4137_v48, %v8029_v14  ;;  %v5867_v10 = vpop.f32.mrb[99].mxu0  ;;  %v4318_v50 = vsel %vm954_vm3, %v8094_v57, -inf }
 0xbb6   : > { %4319 = vmax.xlane.f32.xlu0 %v4318_v50 }
 0xbb7   : > { %v4321_v32 = vsel %vm954_vm3, %v8101_v23, -inf }
 0xbb8   : > { %4322 = vmax.xlane.f32.xlu1 %v4321_v32 }
 0xbba   : > { %v4236_v61 = vpop.f32.mrb[100].mxu0  ;;  %4337 = vmax.xlane.f32.xlu0 %v4336_v31 }
 0xbbb   : > { %v8115_v56 = vadd.f32 %v4236_v61, %v8025_v40  ;;  %v5878_v8 = vpop.f32.mrb[101].mxu0  ;;  %v4380_v40 = vmul.f32 1.442695, %v4353_v51 }
 0xbbc   : > { %v4239_v29 = vpop.f32.mrb[102].mxu0  ;;  %4394 = vadd.xlane.f32.xlu1 %v4393_v17 }
 0xbbd   : > { %v5879_v18 = vpop.f32.mrb[103].mxu0  ;;  %v4330_v11 = vsel %vm954_vm3, %v8115_v56, -inf  ;;  %6322 = vpow2.f32 %v4380_v40  ;;  %v4240_v28 = vadd.f32 %v4239_v29, %v8029_v14  ;;  %v4402_v14 = vsel %vm954_vm3, %v8140_v9, 0.0 }
 0xbbe   : > { %4331 = vmax.xlane.f32.xlu0 %v4330_v11  ;;  %6324 = vpow2.f32 %v4378_v25 }
 0xbbf   : > { %6326 = vpow2.f32 %v4388_v62  ;;  %v4333_v60 = vsel %vm954_vm3, %v4240_v28, -inf }
 0xbc0   : > { %4400 = vadd.xlane.f32.xlu1 %v4399_v30 }
 0xbc2   : > { %4391 = vadd.xlane.f32.xlu0 %v4390_v63 }
 0xbc4   : > { %4406 = vadd.xlane.f32.xlu1 %v4405_v21 }
 0xbc6   : > { %4397 = vadd.xlane.f32.xlu0 %v4396_v42 }
 0xbc7   : > { %v8151_v54 = vpop.eup %6322 }
 0xbc8   : > { %4334 = vmax.xlane.f32.xlu1 %v4333_v60  ;;  %v8155_v4 = vpop.eup %6324  ;;  %v4423_v15 = vsel %vm954_vm3, %v8151_v54, 0.0 }
 0xbc9   : > { %v8159_v53 = vpop.eup %6326  ;;  %v4420_v19 = vsel %vm954_vm3, %v8155_v4, 0.0 }
 0xbca   : > { %4403 = vadd.xlane.f32.xlu0 %v4402_v14  ;;  %v4435_v45 = vsel %vm954_vm3, %v8159_v53, 0.0 }
 0xbcc   : > { %4412 = vadd.xlane.f32.xlu1 %v4411_v13 }
 0xbce   : > { %4409 = vadd.xlane.f32.xlu0 %v4408_v59 }
 0xbd0   : > { %4424 = vadd.xlane.f32.xlu1 %v4423_v15 }
 0xbd2   : > { %4421 = vadd.xlane.f32.xlu0 %v4420_v19 }
 0xbd4   : > { %4436 = vadd.xlane.f32.xlu1 %v4435_v45 }
 0xbe5   : > { %4525 = vrot.lane.b32.xlu1 %v6864_v33, %s6580_s18 }
 0xbe9   : > { %4572 = vrot.lane.b32.xlu1 %v6888_v5, %s6580_s18 }
 0xbed   : > { %4619 = vrot.lane.b32.xlu1 %v6884_v1, %s6580_s18 }
 0xbf1   : > { %4713 = vrot.lane.b32.xlu1 %v6866_v35, %s6580_s18 }
 0xc43   : > { %v8173_v58 = vpop.xlane.xlu0 %4319 }
 0xc45   : > { %v4323_v20 = vpop.xlane.xlu1 %4322 }
 0xc46   : > { %v4351_v48 = vsub.f32 %v8101_v23, %v4323_v20 }
 0xc47   : > { %v4338_v2 = vpop.xlane.xlu0 %4337 }
 0xc48   : > { %v4376_v10 = vmul.f32 1.442695, %v4351_v48  ;;  %v4356_v50 = vsub.f32 %v8098_v27, %v4338_v2 }
 0xc49   : > { %v4395_v49 = vpop.xlane.xlu1 %4394 }
 0xc4a   : > { %6328 = vpow2.f32 %v4376_v10  ;;  %v4386_v33 = vmul.f32 1.442695, %v4356_v50 }
 0xc4b   : > { %v8177_v22 = vpop.xlane.xlu0 %4331 }
 0xc4c   : > { %6330 = vpow2.f32 %v4386_v33  ;;  %v4354_v2 = vsub.f32 %v8115_v56, %v8177_v22 }
 0xc4d   : > { %v4401_v5 = vpop.xlane.xlu1 %4400  ;;  %6332 = vrcp.f32 %v4395_v49 }
 0xc4e   : > { %v4382_v10 = vmul.f32 1.442695, %v4354_v2 }
 0xc4f   : > { %v4392_v1 = vpop.xlane.xlu0 %4391 }
 0xc50   : > { %6334 = vrcp.f32 %v4392_v1 }
 0xc51   : > { %v4407_v35 = vpop.xlane.xlu1 %4406 }
 0xc52   : > { %6336 = vrcp.f32 %v4407_v35 }
 0xc53   : > { %v4398_v32 = vpop.xlane.xlu0 %4397 }
 0xc54   : > { %v8179_v38 = vpop.eup %6328  ;;  %6338 = vrcp.f32 %v4398_v32 }
 0xc55   : > { %v4335_v23 = vpop.xlane.xlu1 %4334  ;;  %v4417_v24 = vsel %vm954_vm3, %v8179_v38, 0.0  ;;  %6340 = vrcp.f32 %v4401_v5 }
 0xc56   : > { %v8183_v27 = vpop.eup %6330  ;;  %v4355_v43 = vsub.f32 %v4240_v28, %v4335_v23  ;;  %4418 = vadd.xlane.f32.xlu1 %v4417_v24 }
 0xc57   : > { %v4404_v31 = vpop.xlane.xlu0 %4403  ;;  %v4432_v44 = vsel %vm954_vm3, %v8183_v27, 0.0  ;;  %v6333_v61 = vpop.eup %6332 }
 0xc58   : > { %v4384_v51 = vmul.f32 1.442695, %v4355_v43  ;;  %6342 = vrcp.f32 %v4404_v31  ;;  %4433 = vadd.xlane.f32.xlu0 %v4432_v44  ;;  %v8188_v12 = vmul.f32 %v6333_v61, %v8108_v6 }
 0xc59   : > { %v4413_v47 = vpop.xlane.xlu1 %4412 }
 0xc5a   : > { %6344 = vpow2.f32 %v4384_v51  ;;  %v6335_v8 = vpop.eup %6334 }
 0xc5b   : > { %v4410_v17 = vpop.xlane.xlu0 %4409  ;;  %v8191_v46 = vmul.f32 %v6335_v8, %v8124_v0 }
 0xc5c   : > { %6346 = vrcp.f32 %v4410_v17  ;;  %v6337_v11 = vpop.eup %6336 }
 0xc5d   : > { %v4425_v29 = vpop.xlane.xlu1 %4424  ;;  %v4470_v18 = vpack.c.bf16 %v8188_v12, %v8191_v46  ;;  %6348 = vrcp.f32 %v4413_v47  ;;  %v8196_v63 = vmul.f32 %v6337_v11, %v8129_v16 }
 0xc5e   : > { %v6339_v40 = vpop.eup %6338 }
 0xc5f   : > { %v6341_v34 = vpop.eup %6340  ;;  %v4456_v6 = vmul.f32 %v6339_v40, %v8133_v52  ;;  %v4422_v0 = vpop.xlane.xlu0 %4421 }
 0xc60   : > { %v4457_v21 = vmul.f32 %v6341_v34, %v8119_v41  ;;  %6350 = vrcp.f32 %v4422_v0  ;;  %v4863_v34 = vld [vmem:[#allocation7 + $0xc] sm:$0xf] }
 0xc61   : > { %v4437_v30 = vpop.xlane.xlu1 %4436  ;;  %6352 = vrcp.f32 %v4425_v29 }
 0xc62   : > { %v6343_v25 = vpop.eup %6342  ;;  %v4471_v16 = vpack.c.bf16 %v4457_v21, %v4456_v6 }
 0xc63   : > { %v8200_v62 = vmul.f32 %v6343_v25, %v8140_v9 }
 0xc64   : > { %v8202_v28 = vpop.eup %6344 }
 0xc65   : > { %v4526_v42 = vpop.permute.xlu1 %4525  ;;  %v4429_v60 = vsel %vm954_vm3, %v8202_v28, 0.0  ;;  %v4472_v14 = vpack.c.bf16 %v8196_v63, %v8200_v62 }
 0xc66   : > { %4430 = vadd.xlane.f32.xlu1 %v4429_v60  ;;  %5893 = vmatpush3.bf16.msra.mxu1 %v4526_v42  ;;  %v6347_v52 = vpop.eup %6346 }
 0xc67   : > { %5904 = vmatprep.subr.bf16.mxu1 %v8417_v26  ;;  %v6349_v13 = vpop.eup %6348  ;;  %v4460_v41 = vmul.f32 %v6347_v52, %v8147_v55 }
 0xc68   : > { %v4461_v59 = vmul.f32 %v6349_v13, %v8143_v36 }
 0xc69   : > { %5895 = vmatmul.mubr.msk.bf16.vlgmr.msra.gmra.mrb[152].mxu1 %vm954_vm3, %v4471_v16  ;;  %v4573_v9 = vpop.permute.xlu1 %4572 }
 0xc6a   : > { %5906 = vmatprep.mubr.msk.bf16.mxu1 %vm6569_vm1, %v8417_v26  ;;  %v4473_v19 = vpack.c.bf16 %v4461_v59, %v4460_v41  ;;  %v6351_v45 = vpop.eup %6350 }
 0xc6b   : > { %v6353_v48 = vpop.eup %6352  ;;  %v4464_v55 = vmul.f32 %v6351_v45, %v8155_v4 }
 0xc6d   : > { %v4620_v15 = vpop.permute.xlu1 %4619 }
 0xc6e   : > { %4478 = vrot.lane.b32.xlu0 %v6868_v37, %s6580_s18  ;;  %5905 = vmatpush3.bf16.msra.mxu1 %v4620_v15  ;;  %v4465_v37 = vmul.f32 %v6353_v48, %v8151_v54 }
 0xc6f   : > { %5916 = vmatprep.subr.bf16.mxu1 %v8417_v26 }
 0xc70   : > { %v4475_v36 = vpack.c.bf16 %v4465_v37, %v4464_v55 }
 0xc71   : > { %5907 = vmatmul.mubr.msk.bf16.vlgmr.msra.gmra.mrb[156].mxu1 %vm954_vm3, %v4473_v19  ;;  %v4714_v20 = vpop.permute.xlu1 %4713 }
 0xc72   : > { %4666 = vrot.lane.b32.xlu0 %v6870_v39, %s6580_s18  ;;  %5917 = vmatpush3.bf16.msra.mxu1 %v4714_v20  ;;  %v4350_v39 = vsub.f32 %v8094_v57, %v8173_v58 }
 0xc73   : > { %5918 = vmatprep.mubr.msk.bf16.mxu1 %vm6569_vm1, %v8417_v26  ;;  %5928 = vmatprep.subr.bf16.mxu1 %v8417_v26 }
 0xc74   : > { %v4374_v4 = vmul.f32 1.442695, %v4350_v39 }
 0xc76   : > { %6354 = vpow2.f32 %v4374_v4 }
 0xc77   : > { %4807 = vrot.lane.b32.xlu1 %v6886_v3, %s6580_s18  ;;  %6356 = vpow2.f32 %v4382_v10 }
 0xc79   : > { %5919 = vmatmul.mubr.msk.bf16.vlgmr.msra.gmra.mrb[160].mxu1 %vm954_vm3, %v4475_v36 }
 0xc7a   : > { %5930 = vmatprep.mubr.msk.bf16.mxu1 %vm6569_vm1, %v8417_v26 }
 0xc80   : > { %v6355_v54 = vpop.eup %6354 }
 0xc81   : > { %v4414_v50 = vsel %vm954_vm3, %v6355_v54, 0.0  ;;  %v6357_v3 = vpop.eup %6356 }
 0xc82   : > { %v4426_v49 = vsel %vm954_vm3, %v6357_v3, 0.0 }
 0xc91   : > { %4415 = vadd.xlane.f32.xlu0 %v4414_v50 }
 0xc95   : > { %4427 = vadd.xlane.f32.xlu0 %v4426_v49 }
 0xcab   : > { %4760 = vrot.lane.b32.xlu0 %v6890_v7, %s6580_s18 }
 0xce3   : > { %v4419_v56 = vpop.xlane.xlu1 %4418 }
 0xce5   : > { %v4434_v33 = vpop.xlane.xlu0 %4433 }
 0xce6   : > { %6358 = vrcp.f32 %v4434_v33 }
 0xce7   : > { %6360 = vrcp.f32 %v4437_v30  ;;  %v4889_v30 = vsel %vm2537_vm4, %v4863_v34, 0 }
 0xce8   : > { %6362 = vrcp.f32 %v4419_v56  ;;  %v5291_v56 = vld [vmem:[%s8363_s4] ss:$0 sm:$0xff] }
 0xce9   : > { %v4479_v57 = vpop.permute.xlu0 %4478 }
 0xcea   : > { %5887 = vmatpush3.bf16.msra.mxu0 %v4479_v57 }
 0xceb   : > { %5898 = vmatprep.subr.bf16.mxu0 %v8417_v26 }
 0xced   : > { %5889 = vmatmul.mubr.msk.bf16.vlgmr.msra.gmra.mrb[104].mxu0 %vm954_vm3, %v4470_v18  ;;  %v4667_v1 = vpop.permute.xlu0 %4666 }
 0xcee   : > { %5899 = vmatpush3.bf16.msra.mxu0 %v4573_v9  ;;  %5900 = vmatprep.mubr.msk.bf16.mxu0 %vm6569_vm1, %v8417_v26 }
 0xcef   : > { %5910 = vmatprep.subr.bf16.mxu0 %v8417_v26 }
 0xcf0   : > { %v6359_v7 = vpop.eup %6358 }
 0xcf1   : > { %v6361_v22 = vpop.eup %6360  ;;  %v4468_v5 = vmul.f32 %v6359_v7, %v8183_v27 }
 0xcf2   : > { %v4469_v35 = vmul.f32 %v6361_v22, %v8159_v53  ;;  %v6363_v43 = vpop.eup %6362 }
 0xcf3   : > { %v4431_v58 = vpop.xlane.xlu1 %4430  ;;  %v4463_v44 = vmul.f32 %v6363_v43, %v8179_v38 }
 0xcf4   : > { %v4477_v23 = vpack.c.bf16 %v4469_v35, %v4468_v5 }
 0xcf5   : > { %5901 = vmatmul.mubr.msk.bf16.vlgmr.msra.gmra.mrb[108].mxu0 %vm954_vm3, %v4472_v14 }
 0xcf6   : > { %5911 = vmatpush3.bf16.msra.mxu0 %v4667_v1  ;;  %5912 = vmatprep.mubr.msk.bf16.mxu0 %vm6569_vm1, %v8417_v26 }
 0xcf7   : > { %v4808_v32 = vpop.permute.xlu1 %4807  ;;  %5922 = vmatprep.subr.bf16.mxu0 %v8417_v26 }
 0xcf8   : > { %5929 = vmatpush3.bf16.msra.mxu1 %v4808_v32 }
 0xcfb   : > { %5931 = vmatmul.mubr.msk.bf16.vlgmr.msra.gmra.mrb[164].mxu1 %vm954_vm3, %v4477_v23 }
 0xd1e   : > { %v4416_v24 = vpop.xlane.xlu0 %4415 }
 0xd1f   : > { %6364 = vrcp.f32 %v4416_v24 }
 0xd22   : > { %v4428_v27 = vpop.xlane.xlu0 %4427 }
 0xd23   : > { %6366 = vrcp.f32 %v4428_v27 }
 0xd24   : > { %6368 = vrcp.f32 %v4431_v58 }
 0xd26   : > { %v4761_v47 = vpop.permute.xlu0 %4760 }
 0xd29   : > { %v6365_v31 = vpop.eup %6364 }
 0xd2a   : > { %v4462_v51 = vmul.f32 %v6365_v31, %v6355_v54 }
 0xd2c   : > { %v4474_v61 = vpack.c.bf16 %v4463_v44, %v4462_v51 }
 0xd2d   : > { %v6367_v53 = vpop.eup %6366 }
 0xd2e   : > { %5913 = vmatmul.mubr.msk.bf16.vlgmr.msra.gmra.mrb[112].mxu0 %vm954_vm3, %v4474_v61  ;;  %v6369_v8 = vpop.eup %6368  ;;  %v4466_v17 = vmul.f32 %v6367_v53, %v6357_v3 }
 0xd2f   : > { %5923 = vmatpush3.bf16.msra.mxu0 %v4761_v47  ;;  %5924 = vmatprep.mubr.msk.bf16.mxu0 %vm6569_vm1, %v8417_v26  ;;  %v4467_v12 = vmul.f32 %v6369_v8, %v8202_v28 }
 0xd30   : > { %6007 = vmatprep.subr.msk.bf16.mxu0 %vm2537_vm4, %v4863_v34 }
 0xd31   : > { %v4476_v46 = vpack.c.bf16 %v4467_v12, %v4466_v17 }
 0xd36   : > { %5925 = vmatmul.mubr.msk.bf16.vlgmr.msra.gmra.mrb[116].mxu0 %vm954_vm3, %v4476_v46 }
 0xd37   : > { %5935 = vmatpush3.bf16.msra.mxu0 %v4889_v30 }
 0xd3c   : > { %v4565_v29 = vpop.f32.mrb[152].mxu1 }
 0xd3d   : > { %v5896_v18 = vpop.f32.mrb[153].mxu1 }
 0xd3e   : > { %v4568_v38 = vpop.f32.mrb[154].mxu1 }
 0xd3f   : > { %v4855_v11 = vpack.c.bf16 %v4568_v38, %v4565_v29  ;;  %v5897_v40 = vpop.f32.mrb[155].mxu1 }
 0xd44   : > { %v4659_v25 = vpop.f32.mrb[156].mxu1 }
 0xd45   : > { %v5908_v63 = vpop.f32.mrb[157].mxu1 }
 0xd46   : > { %v4662_v26 = vpop.f32.mrb[158].mxu1 }
 0xd47   : > { %v4857_v6 = vpack.c.bf16 %v4662_v26, %v4659_v25  ;;  %v5909_v62 = vpop.f32.mrb[159].mxu1 }
 0xd4c   : > { %v4753_v0 = vpop.f32.mrb[160].mxu1 }
 0xd4d   : > { %v5920_v28 = vpop.f32.mrb[161].mxu1 }
 0xd4e   : > { %v4756_v21 = vpop.f32.mrb[162].mxu1 }
 0xd4f   : > { %v4859_v42 = vpack.c.bf16 %v4756_v21, %v4753_v0  ;;  %v5921_v60 = vpop.f32.mrb[163].mxu1 }
 0xdc0   : > { %v4518_v14 = vpop.f32.mrb[104].mxu0 }
 0xdc1   : > { %v5890_v16 = vpop.f32.mrb[105].mxu0 }
 0xdc2   : > { %v4521_v52 = vpop.f32.mrb[106].mxu0 }
 0xdc3   : > { %v4854_v9 = vpack.c.bf16 %v4521_v52, %v4518_v14  ;;  %v5891_v13 = vpop.f32.mrb[107].mxu0 }
 0xdc5   : > { %5936 = vmatprep.mubr.msk.bf16.mxu0 %vm556_vm2, %v4854_v9 }
 0xdc6   : > { %5937 = vmatmul.mubr.msk.bf16.vlgmr.msra.gmra.mrb[64].mxu0 %vm556_vm2, %v4855_v11 }
 0xdc8   : > { %v4612_v41 = vpop.f32.mrb[108].mxu0 }
 0xdc9   : > { %v5902_v59 = vpop.f32.mrb[109].mxu0 }
 0xdca   : > { %v4615_v15 = vpop.f32.mrb[110].mxu0 }
 0xdcb   : > { %v4856_v19 = vpack.c.bf16 %v4615_v15, %v4612_v41  ;;  %v5903_v45 = vpop.f32.mrb[111].mxu0 }
 0xdcd   : > { %5940 = vmatprep.mubr.msk.bf16.mxu0 %vm556_vm2, %v4856_v19 }
 0xdce   : > { %v4847_v20 = vpop.f32.mrb[164].mxu1  ;;  %5941 = vmatmul.mubr.msk.bf16.gmra.mrb[68].mxu0 %vm556_vm2, %v4857_v6 }
 0xdcf   : > { %v5932_v48 = vpop.f32.mrb[165].mxu1 }
 0xdd0   : > { %v4850_v55 = vpop.f32.mrb[166].mxu1 }
 0xdd1   : > { %v4861_v37 = vpack.c.bf16 %v4850_v55, %v4847_v20  ;;  %v5933_v36 = vpop.f32.mrb[167].mxu1 }
 0xe01   : > { %v4706_v39 = vpop.f32.mrb[112].mxu0 }
 0xe02   : > { %v5914_v4 = vpop.f32.mrb[113].mxu0 }
 0xe03   : > { %v4709_v2 = vpop.f32.mrb[114].mxu0 }
 0xe04   : > { %v4858_v10 = vpack.c.bf16 %v4709_v2, %v4706_v39  ;;  %v5915_v54 = vpop.f32.mrb[115].mxu0 }
 0xe06   : > { %5944 = vmatprep.mubr.msk.bf16.mxu0 %vm556_vm2, %v4858_v10 }
 0xe07   : > { %5945 = vmatmul.mubr.msk.bf16.gmra.mrb[72].mxu0 %vm556_vm2, %v4859_v42 }
 0xe09   : > { %v4800_v50 = vpop.f32.mrb[116].mxu0 }
 0xe0a   : > { %v5926_v3 = vpop.f32.mrb[117].mxu0 }
 0xe0b   : > { %v4803_v49 = vpop.f32.mrb[118].mxu0 }
 0xe0c   : > { %v4860_v33 = vpack.c.bf16 %v4803_v49, %v4800_v50  ;;  %v5927_v57 = vpop.f32.mrb[119].mxu0 }
 0xe0e   : > { %5948 = vmatprep.mubr.msk.bf16.mxu0 %vm556_vm2, %v4860_v33 }
 0xe0f   : > { %5949 = vmatmul.mubr.msk.bf16.gmra.mrb[76].mxu0 %vm556_vm2, %v4861_v37 }
 0xe99   : > { %v5938_v7 = vpop.f32.mrb[64].mxu0 }
 0xe9a   : > { %v5013_v58 = vadd.f32 %v5938_v7, %v5291_v56  ;;  %v4925_v22 = vpop.f32.mrb[65].mxu0 }
 0xe9b   : > { %v5011_v5 = vadd.f32 %v5291_v56, %v4925_v22  ;;  %v5939_v1 = vpop.f32.mrb[66].mxu0 }
 0xe9c   : > { %5029 = vst.msk [vmem:[%s8274_s30 + $0x10] sm:$0xff] %vm397_vm0, %v5013_v58  ;;  %v5014_v35 = vadd.f32 %v5939_v1, %v5291_v56  ;;  %v4928_v32 = vpop.f32.mrb[67].mxu0 }
 0xe9d   : > { %5027 = vst.msk [vmem:[%s8274_s30] sm:$0xff] %vm397_vm0, %v5011_v5  ;;  %v5012_v23 = vadd.f32 %v5291_v56, %v4928_v32 }
 0xe9e   : > { %5030 = vst.msk [vmem:[%s8274_s30 + $0x18] sm:$0xff] %vm397_vm0, %v5014_v35 }
 0xe9f   : > { %5028 = vst.msk [vmem:[%s8274_s30 + $0x8] sm:$0xff] %vm397_vm0, %v5012_v23 }
 0xea1   : > { %v5942_v24 = vpop.f32.mrb[68].mxu0 }
 0xea2   : > { %v5017_v27 = vadd.f32 %v5942_v24, %v5291_v56  ;;  %v4941_v43 = vpop.f32.mrb[69].mxu0 }
 0xea3   : > { %v5015_v31 = vadd.f32 %v5291_v56, %v4941_v43  ;;  %v5943_v44 = vpop.f32.mrb[70].mxu0 }
 0xea4   : > { %5033 = vst.msk [vmem:[%s8274_s30 + $0x30] sm:$0xff] %vm397_vm0, %v5017_v27  ;;  %v5018_v51 = vadd.f32 %v5943_v44, %v5291_v56  ;;  %v4944_v61 = vpop.f32.mrb[71].mxu0 }
 0xea5   : > { %5031 = vst.msk [vmem:[%s8274_s30 + $0x20] sm:$0xff] %vm397_vm0, %v5015_v31  ;;  %v5016_v53 = vadd.f32 %v5291_v56, %v4944_v61 }
 0xea6   : > { %5034 = vst.msk [vmem:[%s8274_s30 + $0x38] sm:$0xff] %vm397_vm0, %v5018_v51 }
 0xea7   : > { %5032 = vst.msk [vmem:[%s8274_s30 + $0x28] sm:$0xff] %vm397_vm0, %v5016_v53 }
 0xeda   : > { %v5946_v47 = vpop.f32.mrb[72].mxu0 }
 0xedb   : > { %v5021_v8 = vadd.f32 %v5946_v47, %v5291_v56  ;;  %v4957_v17 = vpop.f32.mrb[73].mxu0 }
 0xedc   : > { %v5019_v12 = vadd.f32 %v5291_v56, %v4957_v17  ;;  %v5947_v46 = vpop.f32.mrb[74].mxu0 }
 0xedd   : > { %5037 = vst.msk [vmem:[%s8274_s30 + $0x50] sm:$0xff] %vm397_vm0, %v5021_v8  ;;  %v5022_v29 = vadd.f32 %v5947_v46, %v5291_v56  ;;  %v4960_v18 = vpop.f32.mrb[75].mxu0 }
 0xede   : > { %5035 = vst.msk [vmem:[%s8274_s30 + $0x40] sm:$0xff] %vm397_vm0, %v5019_v12  ;;  %v5020_v38 = vadd.f32 %v5291_v56, %v4960_v18 }
 0xedf   : > { %5038 = vst.msk [vmem:[%s8274_s30 + $0x58] sm:$0xff] %vm397_vm0, %v5022_v29 }
 0xee0   : > { %5036 = vst.msk [vmem:[%s8274_s30 + $0x48] sm:$0xff] %vm397_vm0, %v5020_v38 }
 0xee2   : > { %v5950_v11 = vpop.f32.mrb[76].mxu0 }
 0xee3   : > { %v5025_v40 = vadd.f32 %v5950_v11, %v5291_v56  ;;  %v4973_v34 = vpop.f32.mrb[77].mxu0 }
 0xee4   : > { %v5023_v30 = vadd.f32 %v5291_v56, %v4973_v34  ;;  %v5951_v25 = vpop.f32.mrb[78].mxu0 }
 0xee5   : > { %5041 = vst.msk [vmem:[%s8274_s30 + $0x70] sm:$0xff] %vm397_vm0, %v5025_v40  ;;  %v5026_v63 = vadd.f32 %v5951_v25, %v5291_v56  ;;  %v4976_v26 = vpop.f32.mrb[79].mxu0 }
 0xee6   : > { %5039 = vst.msk [vmem:[%s8274_s30 + $0x60] sm:$0xff] %vm397_vm0, %v5023_v30  ;;  %v5024_v6 = vadd.f32 %v5291_v56, %v4976_v26 }
 0xee7   : > { %5042 = vst.msk [vmem:[%s8274_s30 + $0x78] sm:$0xff] %vm397_vm0, %v5026_v63 }
 0xee8   : > { %5040 = vst.msk [vmem:[%s8274_s30 + $0x68] sm:$0xff] %vm397_vm0, %v5024_v6 }
 0xee9   : > { %6497 = shalt.err (!%p6494_p4)
}
 0xeea   : > { %s6498_s18 = scalar_lea.hbm %s8307_s15, 2048  ;;  %s6502_s29 = scalar_lea.hbm %s8365_s6, 4096 }
 0xeeb   : > { %p6499_p9 = scmp.ne.s32.totalorder %s8307_s15, %s6498_s18  ;;  %p6503_p8 = scmp.lt.u32.totalorder %s8307_s15, %s8365_s6 }
 0xeec   : > { %p6504_p13 = scmp.lt.u32.totalorder %s6502_s29, %s6498_s18  ;;  %p6506_p10 = scmp.lt.u32.totalorder %s6498_s18, %s8307_s15 }
 0xeed   : > { %p6500_p0 = pnand %p6499_p9, %p6770_p5 }
 0xeee   : > { %p6505_p6 = por %p6504_p13, %p6503_p8 }
 0xeef   : > { %p6501_p11 = pneg %p6500_p0 }
 0xef0   : > { %p6507_p3 = por %p6506_p10, %p6505_p6 }
 0xef2   : > { %p6508_p7 = pnand %p6507_p3, %p6501_p11 }
 0xef4   : > { %6511 = shalt.err (!%p6508_p7)
}
 0xef5   : > { %s6582_s11 = smov 128   ;;  %s6583_s13 = smov 8  }
 0xef6   : > { %6022 = dma.vmem_to_hbm [thread:$0]  (%p6770_p5), %s8309_s10, 2048, %s8307_s15, %s5044_s25, %s6582_s11, %s6582_s11, %s6583_s13  }
 0xef7 PF: > { %s5073_s20 = sand.u32 1, %s6546_s21   ;;  %p8442_p12 = scmp.ne.s32.totalorder %s8388_s28, 0 }
 0xef8   : > { %p8443_p1 = scmp.ge.s32.totalorder %s6558_s24, 2  ;;  %s5074_s12 = scalar_lea.sflag [#allocation4], %s5073_s20 }
 0xefa   : > { %p6039_p2 = pnand %p8443_p1, %p8442_p12 }
 0xefc   : > { %6541 = dma.done.wait (!%p6039_p2), %s5074_s12, 2048  }
 0xefd   : > { %6543 = vsyncadd (!%p6039_p2), %s5074_s12, 4294965248  ;;  %p21_p4 = scmp.ge.s32.totalorder %s6756_s14, 4   ;;  %s8444_s21 = smov %s6550_s22 }
 0xefe   : > { %s8445_s22 = smov %s6554_s23  ;;  %s8446_s23 = smov %s6766_s17 }
 0xeff   : > { %s8447_s24 = smov %s6756_s14  ;;  %23 = sbr.rel (!%p21_p4) target bundleno = 7 (0x7), region = 107 }
 0xf06   :  { %5079 = vsyncpa [#allocation3], 1 }
 0xf07   :  { %5081 = vsyncpa [#allocation3 + $0x1], 1 }
 0xf08   :  { %5082 = vsyncpa [#allocation6], 1 }
 0xf09   :  { %5083 = vsyncpa [#allocation9], 1 }
 0xf0a   :  { %5084 = vsyncpa [#allocation4], 1 }
 0xf0b   :  { %5086 = vsyncpa [#allocation4 + $0x1], 1 }

</bundles_post_ra>
